<compile_context>
chip_gen: v5e
topology: v5e:2x2
jax: 0.10.0
libtpu: 0.0.40
codegen_flags: <defaults>
</compile_context>

<pallas_src>
import jax
import jax.numpy as jnp
from jax import lax
from jax.experimental import pallas as pl
from jax.experimental.pallas import tpu as pltpu

_T_CHUNK = 8  # LSTM time steps fused per sequential grid iteration


def _round_up(n, m):
    return ((n + m - 1) // m) * m


def _pick_tile(n, candidates):
    for c in candidates:
        if c <= n and n % c == 0:
            return c
    return n


def _is_v7x():
    try:
        kind = jax.devices()[0].device_kind.lower()
        return ("v7" in kind) or ("tpu7" in kind)
    except Exception:  # pragma: no cover - device query is best-effort
        return False


def _vmem_limit_bytes(block_bytes):
    """Explicit scoped-VMEM limit: double-buffered blocks + headroom, clamped."""
    need = 2 * sum(block_bytes)
    return int(max(16 << 20, min(need + (4 << 20), 64 << 20)))


# ---------------- Stage 1: input projection  (x + features) @ W_ih + b ----------------
def in_proj_kernel(x_ref, w_ref, b_ref, g_ref):
    acc = jnp.dot(x_ref[...], w_ref[...], preferred_element_type=jnp.float32)
    g_ref[...] = (acc + b_ref[...]).astype(g_ref.dtype)


# ---------------- Stage 2: LSTM recurrence (only h @ W_hh is in the serial loop) ------
def lstm_kernel(g_ref, whh_ref, hs_ref, h_scr, c_scr):
    @pl.when(pl.program_id(1) == 0)     # start of the time axis for this batch block
    def _():
        h_scr[...] = jnp.zeros_like(h_scr)
        c_scr[...] = jnp.zeros_like(c_scr)

    Hp = h_scr.shape[-1]
    t_chunk = g_ref.shape[0]
    for i in range(t_chunk):            # static unroll of the in-chunk recurrence
        # bf16 operands on the MXU (single native pass), f32 accumulation.
        rec = jnp.dot(h_scr[...].astype(jnp.bfloat16), whh_ref[...],
                      preferred_element_type=jnp.float32)
        gates = g_ref[i].astype(jnp.float32) + rec                       # (Bblk, 4Hp) f32
        # lane-aligned gate slices (Hp is a multiple of 128); f32 transcendentals
        i_g = jax.nn.sigmoid(gates[:, 0 * Hp:1 * Hp])
        f_g = jax.nn.sigmoid(gates[:, 1 * Hp:2 * Hp])
        g_g = jnp.tanh(gates[:, 2 * Hp:3 * Hp])
        o_g = jax.nn.sigmoid(gates[:, 3 * Hp:4 * Hp])
        c_new = f_g * c_scr[...] + i_g * g_g
        h_new = o_g * jnp.tanh(c_new)
        c_scr[...] = c_new
        h_scr[...] = h_new
        hs_ref[i] = h_new.astype(hs_ref.dtype)       # dense (b_block, Hp) store, time-major


# ---------------- Stage 3: FC projection  h @ W_fc + b_fc -----------------------------
def fc_kernel(h_ref, w_ref, b_ref, o_ref):
    acc = jnp.dot(h_ref[...], w_ref[...], preferred_element_type=jnp.float32)
    o_ref[...] = acc + b_ref[...]


def decoder_forward(features, captions, params):
    """features: (B, E) f32, captions: (B, S) int32 -> logits (B, S-1, V) f32."""
    emb, w_ih, w_hh, b, w_fc, b_fc = (params["emb"], params["w_ih"], params["w_hh"],
                                      params["b"], params["w_fc"], params["b_fc"])
    E = emb.shape[1]
    H = w_hh.shape[0]
    V = w_fc.shape[1]
    B, S = captions.shape
    T = S - 1

    Hp = _round_up(H, 128)          # per-gate lane alignment
    Vp = _round_up(V, 128)          # lane-dense logits stores
    Bp = _round_up(B, 8)            # sublane alignment
    Tp = _round_up(T, _T_CHUNK)     # whole chunks of time steps

    # --- weight repacking: per-gate zero-padding H -> Hp (gate order i,f,g,o kept) ---
    def pad_gates(w):
        if Hp == H:
            return w
        parts = []
        for k in range(4):
            g = w[..., k * H:(k + 1) * H]
            parts.append(jnp.pad(g, [(0, 0)] * (w.ndim - 1) + [(0, Hp - H)]))
        return jnp.concatenate(parts, axis=-1)

    w_ih_p = pad_gates(w_ih).astype(jnp.bfloat16)                             # (E, 4Hp)
    w_hh_p = pad_gates(jnp.pad(w_hh, ((0, Hp - H), (0, 0)))).astype(jnp.bfloat16)  # (Hp, 4Hp)
    b_p = pad_gates(b)                                                        # (1, 4Hp) f32
    w_fc_p = jnp.pad(w_fc, ((0, Hp - H), (0, Vp - V))).astype(jnp.bfloat16)   # (Hp, Vp)
    b_fc_p = jnp.pad(b_fc, ((0, 0), (0, Vp - V)))                             # (1, Vp) f32

    # --- glue: time-major embedding gather + single features add (fused by XLA) ---
    # TODO(synk): the embedding-table gather itself stays in XLA (no clean Pallas gather);
    # it could be folded into Stage 1 with PrefetchScalarGridSpec + pl.Element row maps.
    cap = jnp.pad(captions[:, :-1], ((0, Bp - B), (0, Tp - T)))   # (Bp, Tp), pad token 0
    feat = jnp.pad(features, ((0, Bp - B), (0, 0)))               # (Bp, E)
    xf = (emb[cap.T] + feat[None, :, :]).astype(jnp.bfloat16)     # (Tp, Bp, E) time-major
    xf = xf.reshape(Tp * Bp, E)                                   # row = t*Bp + b (free)

    R = Tp * Bp
    # Decoupled row tiles: Stage 1 has small K (=E) -> large M tile; Stage 3 has large
    # K (=Hp) and a big f32 output block -> more moderate M tile.
    row_tile1 = _pick_tile(R, (1024, 512, 256, 128, 64, 32, 16, 8))
    row_tile3 = _pick_tile(R, (256, 512, 128, 64, 32, 16, 8))
    gate_tile = _pick_tile(4 * Hp, (2048, 1024, 512, 256, 128))
    v_tile = _pick_tile(Vp, (2048, 1024, 512, 256, 128))

    # ---- Stage 1: one big parallel matmul feeding the MXU (bf16 out) ----
    s1_blocks = [row_tile1 * E * 2, E * gate_tile * 2, gate_tile * 4,
                 row_tile1 * gate_tile * 2]
    g_in = pl.pallas_call(
        in_proj_kernel,
        out_shape=jax.ShapeDtypeStruct((R, 4 * Hp), jnp.bfloat16),
        grid=(R // row_tile1, (4 * Hp) // gate_tile),
        in_specs=[
            pl.BlockSpec((row_tile1, E), lambda r, g: (r, 0)),
            pl.BlockSpec((E, gate_tile), lambda r, g: (0, g)),
            pl.BlockSpec((1, gate_tile), lambda r, g: (0, g)),
        ],
        out_specs=pl.BlockSpec((row_tile1, gate_tile), lambda r, g: (r, g)),
        compiler_params=pltpu.CompilerParams(
            dimension_semantics=("parallel", "parallel"),
            vmem_limit_bytes=_vmem_limit_bytes(s1_blocks)),
    )(xf, w_ih_p, b_p)
    g_in = g_in.reshape(Tp, Bp, 4 * Hp)        # free row-major reshape (time-major)

    # ---- Stage 2: sequential recurrence, chunked over time ----
    # Batch split only pays off on v7x (2 TensorCores); on v5e/v6e it just adds serial
    # grid steps and halves the recurrent matmul's M dimension.
    nb = 2 if (_is_v7x() and Bp % 16 == 0 and (Bp // 2) >= 16) else 1
    b_block = Bp // nb
    s2_blocks = [_T_CHUNK * b_block * 4 * Hp * 2,   # g block (bf16)
                 Hp * 4 * Hp * 2,                   # W_hh resident (bf16)
                 _T_CHUNK * b_block * Hp * 2,       # hs block (bf16)
                 2 * b_block * Hp * 4]              # h/c carries (f32)
    hs = pl.pallas_call(
        lstm_kernel,
        out_shape=jax.ShapeDtypeStruct((Tp, Bp, Hp), jnp.bfloat16),   # time-major
        grid=(nb, Tp // _T_CHUNK),
        in_specs=[
            pl.BlockSpec((_T_CHUNK, b_block, 4 * Hp), lambda bb, tc: (tc, bb, 0)),
            pl.BlockSpec((Hp, 4 * Hp), lambda bb, tc: (0, 0)),     # W_hh resident
        ],
        out_specs=pl.BlockSpec((_T_CHUNK, b_block, Hp), lambda bb, tc: (tc, bb, 0)),
        scratch_shapes=[pltpu.VMEM((b_block, Hp), jnp.float32),    # h carry (f32)
                        pltpu.VMEM((b_block, Hp), jnp.float32)],   # c carry (f32)
        compiler_params=pltpu.CompilerParams(
            dimension_semantics=("parallel", "arbitrary"),
            vmem_limit_bytes=_vmem_limit_bytes(s2_blocks)),
    )(g_in, w_hh_p)

    # Cheap XLA transpose of the small B*T*H bf16 array -> batch-major rows for Stage 3.
    hs_flat = jnp.transpose(hs, (1, 0, 2)).reshape(Bp * Tp, Hp)   # row = b*Tp + t

    # ---- Stage 3: vocab projection; vocab axis OUTER so W_fc is streamed once ----
    s3_blocks = [row_tile3 * Hp * 2, Hp * v_tile * 2, v_tile * 4,
                 row_tile3 * v_tile * 4]
    logits = pl.pallas_call(
        fc_kernel,
        out_shape=jax.ShapeDtypeStruct((Bp * Tp, Vp), jnp.float32),
        grid=(Vp // v_tile, (Bp * Tp) // row_tile3),
        in_specs=[
            pl.BlockSpec((row_tile3, Hp), lambda v, r: (r, 0)),
            pl.BlockSpec((Hp, v_tile), lambda v, r: (0, v)),   # constant across inner r
            pl.BlockSpec((1, v_tile), lambda v, r: (0, v)),
        ],
        out_specs=pl.BlockSpec((row_tile3, v_tile), lambda v, r: (r, v)),
        compiler_params=pltpu.CompilerParams(
            dimension_semantics=("parallel", "parallel"),
            vmem_limit_bytes=_vmem_limit_bytes(s3_blocks)),
    )(hs_flat, w_fc_p, b_fc_p)

    return logits.reshape(Bp, Tp, Vp)[:B, :T, :V]    # free reshape + slice off padding


def decoder_reference(features, captions, params):
    """Pure-JAX f32 reference matching PyTorch nn.LSTM + nn.Linear semantics."""
    emb, w_ih, w_hh, b, w_fc, b_fc = (params["emb"], params["w_ih"], params["w_hh"],
                                      params["b"], params["w_fc"], params["b_fc"])
    x = emb[captions[:, :-1]] + features[:, None, :]     # (B, T, E)
    B = x.shape[0]
    H = w_hh.shape[0]

    def step(carry, x_t):
        h, c = carry
        gates = x_t @ w_ih + h @ w_hh + b
        i = jax.nn.sigmoid(gates[:, 0 * H:1 * H])
        f = jax.nn.sigmoid(gates[:, 1 * H:2 * H])
        g = jnp.tanh(gates[:, 2 * H:3 * H])
        o = jax.nn.sigmoid(gates[:, 3 * H:4 * H])
        c = f * c + i * g
        h = o * jnp.tanh(c)
        return (h, c), h

    h0 = jnp.zeros((B, H), jnp.float32)
    (_, _), hs = lax.scan(step, (h0, h0), jnp.transpose(x, (1, 0, 2)))
    outs = hs @ w_fc + b_fc                               # (T, B, V)
    return jnp.transpose(outs, (1, 0, 2))


def init_params(key, vocab_size, embedding_dim, hidden_dim):
    ks = jax.random.split(key, 7)
    s = 0.1
    return {
        "emb":  s * jax.random.normal(ks[0], (vocab_size, embedding_dim), jnp.float32),
        "w_ih": s * jax.random.normal(ks[1], (embedding_dim, 4 * hidden_dim), jnp.float32),
        "w_hh": s * jax.random.normal(ks[2], (hidden_dim, 4 * hidden_dim), jnp.float32),
        # combined b_ih + b_hh, kept 2D (1, 4H) for TPU-friendly layout
        "b":    s * jax.random.normal(ks[3], (1, 4 * hidden_dim), jnp.float32),
        "w_fc": s * jax.random.normal(ks[4], (hidden_dim, vocab_size), jnp.float32),
        "b_fc": s * jax.random.normal(ks[5], (1, vocab_size), jnp.float32),
    }


if __name__ == "__main__":
    # small shapes consistent with the module (scaled down from Config); intentionally
    # unaligned so the H/V/B/T padding paths are exercised.
    vocab_size, embedding_dim, hidden_dim = 200, 64, 96
    batch, seq_len = 3, 10                                # T = seq_len - 1 = 9

    key = jax.random.PRNGKey(0)
    k_par, k_feat, k_cap = jax.random.split(key, 3)
    params = init_params(k_par, vocab_size, embedding_dim, hidden_dim)

    features = jax.random.normal(k_feat, (batch, embedding_dim), jnp.float32)
    captions = jax.random.randint(k_cap, (batch, seq_len), 0, vocab_size, jnp.int32)

    forward = jax.jit(decoder_forward)
    out = forward(features, captions, params)
    out = jax.block_until_ready(out)

    ref = decoder_reference(features, captions, params)
    assert out.shape == (batch, seq_len - 1, vocab_size), out.shape
    # bf16 MXU operands (input proj, recurrent h@W_hh, FC) and bf16 intermediates;
    # carries/gate math stay f32 -> tolerance loosened vs the pure-f32 reference.
    err = float(jnp.max(jnp.abs(out - ref)))
    assert jnp.allclose(out, ref, atol=7.5e-2, rtol=7.5e-2), err

    print("KERNEL_OK")
</pallas_src>

<mosaic_0001>
module attributes {stable_mosaic.version = 11 : i64} {
  func.func @in_proj_kernel(%arg0: i32, %arg1: i32, %arg2: memref<128x64xbf16, #tpu.memory_space<vmem>>, %arg3: memref<64x512xbf16, #tpu.memory_space<vmem>>, %arg4: memref<1x512xf32, #tpu.memory_space<vmem>>, %arg5: memref<128x512xbf16, #tpu.memory_space<vmem>>) attributes {dimension_semantics = [#tpu.dimension_semantics<parallel>, #tpu.dimension_semantics<parallel>], iteration_bounds = array<i64: 1, 1>, scalar_prefetch = 0 : i64, scratch_operands = 0 : i64, tpu.core_type = #tpu.core_type<tc>, window_params = [{transform_indices = @transform_0, window_bounds = array<i64: 128, 64>}, {transform_indices = @transform_1, window_bounds = array<i64: 64, 512>}, {transform_indices = @transform_2, window_bounds = array<i64: 1, 512>}, {transform_indices = @transform_3, window_bounds = array<i64: 128, 512>}]} {
    %c0 = arith.constant 0 : index
    %c0_0 = arith.constant 0 : index
    %0 = vector.load %arg2[%c0, %c0_0] : memref<128x64xbf16, #tpu.memory_space<vmem>>, vector<128x64xbf16>
    %c0_1 = arith.constant 0 : index
    %c0_2 = arith.constant 0 : index
    %1 = vector.load %arg3[%c0_1, %c0_2] : memref<64x512xbf16, #tpu.memory_space<vmem>>, vector<64x512xbf16>
    %cst = arith.constant dense<0.000000e+00> : vector<128x512xf32>
    %2 = tpu.matmul %0, %1, %cst {dimension_numbers = #tpu.dot_dimension_numbers<[1], [0], [0], [1], [0, 0, 1, 1], [], []>} : vector<128x64xbf16>, vector<64x512xbf16>, vector<128x512xf32> -> vector<128x512xf32>
    %c0_3 = arith.constant 0 : index
    %c0_4 = arith.constant 0 : index
    %3 = vector.load %arg4[%c0_3, %c0_4] : memref<1x512xf32, #tpu.memory_space<vmem>>, vector<1x512xf32>
    %4 = vector.broadcast %3 : vector<1x512xf32> to vector<128x512xf32>
    %5 = arith.addf %2, %4 : vector<128x512xf32>
    %6 = arith.truncf %5 : vector<128x512xf32> to vector<128x512xbf16>
    %c0_5 = arith.constant 0 : index
    %c0_6 = arith.constant 0 : index
    %7 = vector.load %arg5[%c0_5, %c0_6] : memref<128x512xbf16, #tpu.memory_space<vmem>>, vector<128x512xbf16>
    tpu.vector_store %arg5[%c0_5, %c0_6], %6 {strides = array<i32>} : memref<128x512xbf16, #tpu.memory_space<vmem>>, vector<128x512xbf16>,
    return
  }
  func.func @transform_0(%arg0: i32, %arg1: i32) -> (i32, i32) {
    %c0_i32 = arith.constant 0 : i32
    %c0_i32_0 = arith.constant 0 : i32
    return %arg0, %c0_i32 : i32, i32
  }
  func.func @transform_1(%arg0: i32, %arg1: i32) -> (i32, i32) {
    %c0_i32 = arith.constant 0 : i32
    %c0_i32_0 = arith.constant 0 : i32
    return %c0_i32, %arg1 : i32, i32
  }
  func.func @transform_2(%arg0: i32, %arg1: i32) -> (i32, i32) {
    %c0_i32 = arith.constant 0 : i32
    %c0_i32_0 = arith.constant 0 : i32
    return %c0_i32, %arg1 : i32, i32
  }
  func.func @transform_3(%arg0: i32, %arg1: i32) -> (i32, i32) {
    %c0_i32 = arith.constant 0 : i32
    return %arg0, %arg1 : i32, i32
  }
}

module attributes {stable_mosaic.version = 11 : i64} {
  func.func @lstm_kernel(%arg0: i32, %arg1: i32, %arg2: memref<8x8x512xbf16, #tpu.memory_space<vmem>>, %arg3: memref<128x512xbf16, #tpu.memory_space<vmem>>, %arg4: memref<8x8x128xbf16, #tpu.memory_space<vmem>>, %arg5: memref<8x128xf32, #tpu.memory_space<vmem>>, %arg6: memref<8x128xf32, #tpu.memory_space<vmem>>) attributes {dimension_semantics = [#tpu.dimension_semantics<parallel>, #tpu.dimension_semantics<arbitrary>], iteration_bounds = array<i64: 1, 2>, scalar_prefetch = 0 : i64, scratch_operands = 2 : i64, tpu.core_type = #tpu.core_type<tc>, window_params = [{transform_indices = @transform_0, window_bounds = array<i64: 8, 8, 512>}, {pipeline_mode = #tpu.pipeline_mode<synchronous>, transform_indices = @transform_1, window_bounds = array<i64: 128, 512>}, {transform_indices = @transform_2, window_bounds = array<i64: 8, 8, 128>}]} {
    %c0_i32 = arith.constant 0 : i32
    %0 = arith.cmpi eq, %arg1, %c0_i32 : i32
    %1 = arith.extui %0 : i1 to i32
    %c0_i32_0 = arith.constant 0 : i32
    %2 = arith.cmpi ne, %1, %c0_i32_0 : i32
    scf.if %2 {
      %cst_152 = arith.constant 0.000000e+00 : f32
      %323 = vector.broadcast %cst_152 : f32 to vector<8x128xf32>
      %c0_153 = arith.constant 0 : index
      %c0_154 = arith.constant 0 : index
      %324 = vector.load %arg5[%c0_153, %c0_154] : memref<8x128xf32, #tpu.memory_space<vmem>>, vector<8x128xf32>
      tpu.vector_store %arg5[%c0_153, %c0_154], %323 {strides = array<i32>} : memref<8x128xf32, #tpu.memory_space<vmem>>, vector<8x128xf32>,
      %cst_155 = arith.constant 0.000000e+00 : f32
      %325 = vector.broadcast %cst_155 : f32 to vector<8x128xf32>
      %c0_156 = arith.constant 0 : index
      %c0_157 = arith.constant 0 : index
      %326 = vector.load %arg6[%c0_156, %c0_157] : memref<8x128xf32, #tpu.memory_space<vmem>>, vector<8x128xf32>
      tpu.vector_store %arg6[%c0_156, %c0_157], %325 {strides = array<i32>} : memref<8x128xf32, #tpu.memory_space<vmem>>, vector<8x128xf32>,
    } else {
    }
    %c0 = arith.constant 0 : index
    %c0_1 = arith.constant 0 : index
    %3 = vector.load %arg5[%c0, %c0_1] : memref<8x128xf32, #tpu.memory_space<vmem>>, vector<8x128xf32>
    %4 = arith.truncf %3 : vector<8x128xf32> to vector<8x128xbf16>
    %c0_2 = arith.constant 0 : index
    %c0_3 = arith.constant 0 : index
    %5 = vector.load %arg3[%c0_2, %c0_3] : memref<128x512xbf16, #tpu.memory_space<vmem>>, vector<128x512xbf16>
    %cst = arith.constant dense<0.000000e+00> : vector<8x512xf32>
    %6 = tpu.matmul %4, %5, %cst {dimension_numbers = #tpu.dot_dimension_numbers<[1], [0], [0], [1], [0, 0, 1, 1], [], []>} : vector<8x128xbf16>, vector<128x512xbf16>, vector<8x512xf32> -> vector<8x512xf32>
    %c0_4 = arith.constant 0 : index
    %c0_5 = arith.constant 0 : index
    %c0_6 = arith.constant 0 : index
    %7 = vector.load %arg2[%c0_4, %c0_5, %c0_6] : memref<8x8x512xbf16, #tpu.memory_space<vmem>>, vector<1x8x512xbf16>
    %8 = vector.shape_cast %7 : vector<1x8x512xbf16> to vector<8x512xbf16>
    %9 = arith.extf %8 : vector<8x512xbf16> to vector<8x512xf32>
    %10 = arith.addf %9, %6 : vector<8x512xf32>
    %11 = vector.extract_strided_slice %10 {offsets = [0, 0], sizes = [8, 128], strides = [1, 1]} : vector<8x512xf32> to vector<8x128xf32>
    %12 = arith.negf %11 : vector<8x128xf32>
    %13 = math.exp %12 : vector<8x128xf32>
    %cst_7 = arith.constant 1.000000e+00 : f32
    %14 = vector.broadcast %cst_7 : f32 to vector<8x128xf32>
    %15 = arith.addf %14, %13 : vector<8x128xf32>
    %16 = arith.divf %14, %15 : vector<8x128xf32>
    %17 = vector.extract_strided_slice %10 {offsets = [0, 128], sizes = [8, 128], strides = [1, 1]} : vector<8x512xf32> to vector<8x128xf32>
    %18 = arith.negf %17 : vector<8x128xf32>
    %19 = math.exp %18 : vector<8x128xf32>
    %cst_8 = arith.constant 1.000000e+00 : f32
    %20 = vector.broadcast %cst_8 : f32 to vector<8x128xf32>
    %21 = arith.addf %20, %19 : vector<8x128xf32>
    %22 = arith.divf %20, %21 : vector<8x128xf32>
    %23 = vector.extract_strided_slice %10 {offsets = [0, 256], sizes = [8, 128], strides = [1, 1]} : vector<8x512xf32> to vector<8x128xf32>
    %24 = math.tanh %23 : vector<8x128xf32>
    %25 = vector.extract_strided_slice %10 {offsets = [0, 384], sizes = [8, 128], strides = [1, 1]} : vector<8x512xf32> to vector<8x128xf32>
    %26 = arith.negf %25 : vector<8x128xf32>
    %27 = math.exp %26 : vector<8x128xf32>
    %cst_9 = arith.constant 1.000000e+00 : f32
    %28 = vector.broadcast %cst_9 : f32 to vector<8x128xf32>
    %29 = arith.addf %28, %27 : vector<8x128xf32>
    %30 = arith.divf %28, %29 : vector<8x128xf32>
    %c0_10 = arith.constant 0 : index
    %c0_11 = arith.constant 0 : index
    %31 = vector.load %arg6[%c0_10, %c0_11] : memref<8x128xf32, #tpu.memory_space<vmem>>, vector<8x128xf32>
    %32 = arith.mulf %22, %31 : vector<8x128xf32>
    %33 = arith.mulf %16, %24 : vector<8x128xf32>
    %34 = arith.addf %32, %33 : vector<8x128xf32>
    %35 = math.tanh %34 : vector<8x128xf32>
    %36 = arith.mulf %30, %35 : vector<8x128xf32>
    %c0_12 = arith.constant 0 : index
    %c0_13 = arith.constant 0 : index
    %37 = vector.load %arg6[%c0_12, %c0_13] : memref<8x128xf32, #tpu.memory_space<vmem>>, vector<8x128xf32>
    tpu.vector_store %arg6[%c0_12, %c0_13], %34 {strides = array<i32>} : memref<8x128xf32, #tpu.memory_space<vmem>>, vector<8x128xf32>,
    %c0_14 = arith.constant 0 : index
    %c0_15 = arith.constant 0 : index
    %38 = vector.load %arg5[%c0_14, %c0_15] : memref<8x128xf32, #tpu.memory_space<vmem>>, vector<8x128xf32>
    tpu.vector_store %arg5[%c0_14, %c0_15], %36 {strides = array<i32>} : memref<8x128xf32, #tpu.memory_space<vmem>>, vector<8x128xf32>,
    %39 = arith.truncf %36 : vector<8x128xf32> to vector<8x128xbf16>
    %c0_16 = arith.constant 0 : index
    %c0_17 = arith.constant 0 : index
    %c0_18 = arith.constant 0 : index
    %40 = vector.load %arg4[%c0_16, %c0_17, %c0_18] : memref<8x8x128xbf16, #tpu.memory_space<vmem>>, vector<1x8x128xbf16>
    %41 = vector.shape_cast %40 : vector<1x8x128xbf16> to vector<8x128xbf16>
    %42 = vector.shape_cast %39 : vector<8x128xbf16> to vector<1x8x128xbf16>
    tpu.vector_store %arg4[%c0_16, %c0_17, %c0_18], %42 {strides = array<i32>} : memref<8x8x128xbf16, #tpu.memory_space<vmem>>, vector<1x8x128xbf16>,
    %c0_19 = arith.constant 0 : index
    %c0_20 = arith.constant 0 : index
    %43 = vector.load %arg5[%c0_19, %c0_20] : memref<8x128xf32, #tpu.memory_space<vmem>>, vector<8x128xf32>
    %44 = arith.truncf %43 : vector<8x128xf32> to vector<8x128xbf16>
    %c0_21 = arith.constant 0 : index
    %c0_22 = arith.constant 0 : index
    %45 = vector.load %arg3[%c0_21, %c0_22] : memref<128x512xbf16, #tpu.memory_space<vmem>>, vector<128x512xbf16>
    %cst_23 = arith.constant dense<0.000000e+00> : vector<8x512xf32>
    %46 = tpu.matmul %44, %45, %cst_23 {dimension_numbers = #tpu.dot_dimension_numbers<[1], [0], [0], [1], [0, 0, 1, 1], [], []>} : vector<8x128xbf16>, vector<128x512xbf16>, vector<8x512xf32> -> vector<8x512xf32>
    %c1 = arith.constant 1 : index
    %c0_24 = arith.constant 0 : index
    %c0_25 = arith.constant 0 : index
    %47 = vector.load %arg2[%c1, %c0_24, %c0_25] : memref<8x8x512xbf16, #tpu.memory_space<vmem>>, vector<1x8x512xbf16>
    %48 = vector.shape_cast %47 : vector<1x8x512xbf16> to vector<8x512xbf16>
    %49 = arith.extf %48 : vector<8x512xbf16> to vector<8x512xf32>
    %50 = arith.addf %49, %46 : vector<8x512xf32>
    %51 = vector.extract_strided_slice %50 {offsets = [0, 0], sizes = [8, 128], strides = [1, 1]} : vector<8x512xf32> to vector<8x128xf32>
    %52 = arith.negf %51 : vector<8x128xf32>
    %53 = math.exp %52 : vector<8x128xf32>
    %cst_26 = arith.constant 1.000000e+00 : f32
    %54 = vector.broadcast %cst_26 : f32 to vector<8x128xf32>
    %55 = arith.addf %54, %53 : vector<8x128xf32>
    %56 = arith.divf %54, %55 : vector<8x128xf32>
    %57 = vector.extract_strided_slice %50 {offsets = [0, 128], sizes = [8, 128], strides = [1, 1]} : vector<8x512xf32> to vector<8x128xf32>
    %58 = arith.negf %57 : vector<8x128xf32>
    %59 = math.exp %58 : vector<8x128xf32>
    %cst_27 = arith.constant 1.000000e+00 : f32
    %60 = vector.broadcast %cst_27 : f32 to vector<8x128xf32>
    %61 = arith.addf %60, %59 : vector<8x128xf32>
    %62 = arith.divf %60, %61 : vector<8x128xf32>
    %63 = vector.extract_strided_slice %50 {offsets = [0, 256], sizes = [8, 128], strides = [1, 1]} : vector<8x512xf32> to vector<8x128xf32>
    %64 = math.tanh %63 : vector<8x128xf32>
    %65 = vector.extract_strided_slice %50 {offsets = [0, 384], sizes = [8, 128], strides = [1, 1]} : vector<8x512xf32> to vector<8x128xf32>
    %66 = arith.negf %65 : vector<8x128xf32>
    %67 = math.exp %66 : vector<8x128xf32>
    %cst_28 = arith.constant 1.000000e+00 : f32
    %68 = vector.broadcast %cst_28 : f32 to vector<8x128xf32>
    %69 = arith.addf %68, %67 : vector<8x128xf32>
    %70 = arith.divf %68, %69 : vector<8x128xf32>
    %c0_29 = arith.constant 0 : index
    %c0_30 = arith.constant 0 : index
    %71 = vector.load %arg6[%c0_29, %c0_30] : memref<8x128xf32, #tpu.memory_space<vmem>>, vector<8x128xf32>
    %72 = arith.mulf %62, %71 : vector<8x128xf32>
    %73 = arith.mulf %56, %64 : vector<8x128xf32>
    %74 = arith.addf %72, %73 : vector<8x128xf32>
    %75 = math.tanh %74 : vector<8x128xf32>
    %76 = arith.mulf %70, %75 : vector<8x128xf32>
    %c0_31 = arith.constant 0 : index
    %c0_32 = arith.constant 0 : index
    %77 = vector.load %arg6[%c0_31, %c0_32] : memref<8x128xf32, #tpu.memory_space<vmem>>, vector<8x128xf32>
    tpu.vector_store %arg6[%c0_31, %c0_32], %74 {strides = array<i32>} : memref<8x128xf32, #tpu.memory_space<vmem>>, vector<8x128xf32>,
    %c0_33 = arith.constant 0 : index
    %c0_34 = arith.constant 0 : index
    %78 = vector.load %arg5[%c0_33, %c0_34] : memref<8x128xf32, #tpu.memory_space<vmem>>, vector<8x128xf32>
    tpu.vector_store %arg5[%c0_33, %c0_34], %76 {strides = array<i32>} : memref<8x128xf32, #tpu.memory_space<vmem>>, vector<8x128xf32>,
    %79 = arith.truncf %76 : vector<8x128xf32> to vector<8x128xbf16>
    %c1_35 = arith.constant 1 : index
    %c0_36 = arith.constant 0 : index
    %c0_37 = arith.constant 0 : index
    %80 = vector.load %arg4[%c1_35, %c0_36, %c0_37] : memref<8x8x128xbf16, #tpu.memory_space<vmem>>, vector<1x8x128xbf16>
    %81 = vector.shape_cast %80 : vector<1x8x128xbf16> to vector<8x128xbf16>
    %82 = vector.shape_cast %79 : vector<8x128xbf16> to vector<1x8x128xbf16>
    tpu.vector_store %arg4[%c1_35, %c0_36, %c0_37], %82 {strides = array<i32>} : memref<8x8x128xbf16, #tpu.memory_space<vmem>>, vector<1x8x128xbf16>,
    %c0_38 = arith.constant 0 : index
    %c0_39 = arith.constant 0 : index
    %83 = vector.load %arg5[%c0_38, %c0_39] : memref<8x128xf32, #tpu.memory_space<vmem>>, vector<8x128xf32>
    %84 = arith.truncf %83 : vector<8x128xf32> to vector<8x128xbf16>
    %c0_40 = arith.constant 0 : index
    %c0_41 = arith.constant 0 : index
    %85 = vector.load %arg3[%c0_40, %c0_41] : memref<128x512xbf16, #tpu.memory_space<vmem>>, vector<128x512xbf16>
    %cst_42 = arith.constant dense<0.000000e+00> : vector<8x512xf32>
    %86 = tpu.matmul %84, %85, %cst_42 {dimension_numbers = #tpu.dot_dimension_numbers<[1], [0], [0], [1], [0, 0, 1, 1], [], []>} : vector<8x128xbf16>, vector<128x512xbf16>, vector<8x512xf32> -> vector<8x512xf32>
    %c2 = arith.constant 2 : index
    %c0_43 = arith.constant 0 : index
    %c0_44 = arith.constant 0 : index
    %87 = vector.load %arg2[%c2, %c0_43, %c0_44] : memref<8x8x512xbf16, #tpu.memory_space<vmem>>, vector<1x8x512xbf16>
    %88 = vector.shape_cast %87 : vector<1x8x512xbf16> to vector<8x512xbf16>
    %89 = arith.extf %88 : vector<8x512xbf16> to vector<8x512xf32>
    %90 = arith.addf %89, %86 : vector<8x512xf32>
    %91 = vector.extract_strided_slice %90 {offsets = [0, 0], sizes = [8, 128], strides = [1, 1]} : vector<8x512xf32> to vector<8x128xf32>
    %92 = arith.negf %91 : vector<8x128xf32>
    %93 = math.exp %92 : vector<8x128xf32>
    %cst_45 = arith.constant 1.000000e+00 : f32
    %94 = vector.broadcast %cst_45 : f32 to vector<8x128xf32>
    %95 = arith.addf %94, %93 : vector<8x128xf32>
    %96 = arith.divf %94, %95 : vector<8x128xf32>
    %97 = vector.extract_strided_slice %90 {offsets = [0, 128], sizes = [8, 128], strides = [1, 1]} : vector<8x512xf32> to vector<8x128xf32>
    %98 = arith.negf %97 : vector<8x128xf32>
    %99 = math.exp %98 : vector<8x128xf32>
    %cst_46 = arith.constant 1.000000e+00 : f32
    %100 = vector.broadcast %cst_46 : f32 to vector<8x128xf32>
    %101 = arith.addf %100, %99 : vector<8x128xf32>
    %102 = arith.divf %100, %101 : vector<8x128xf32>
    %103 = vector.extract_strided_slice %90 {offsets = [0, 256], sizes = [8, 128], strides = [1, 1]} : vector<8x512xf32> to vector<8x128xf32>
    %104 = math.tanh %103 : vector<8x128xf32>
    %105 = vector.extract_strided_slice %90 {offsets = [0, 384], sizes = [8, 128], strides = [1, 1]} : vector<8x512xf32> to vector<8x128xf32>
    %106 = arith.negf %105 : vector<8x128xf32>
    %107 = math.exp %106 : vector<8x128xf32>
    %cst_47 = arith.constant 1.000000e+00 : f32
    %108 = vector.broadcast %cst_47 : f32 to vector<8x128xf32>
    %109 = arith.addf %108, %107 : vector<8x128xf32>
    %110 = arith.divf %108, %109 : vector<8x128xf32>
    %c0_48 = arith.constant 0 : index
    %c0_49 = arith.constant 0 : index
    %111 = vector.load %arg6[%c0_48, %c0_49] : memref<8x128xf32, #tpu.memory_space<vmem>>, vector<8x128xf32>
    %112 = arith.mulf %102, %111 : vector<8x128xf32>
    %113 = arith.mulf %96, %104 : vector<8x128xf32>
    %114 = arith.addf %112, %113 : vector<8x128xf32>
    %115 = math.tanh %114 : vector<8x128xf32>
    %116 = arith.mulf %110, %115 : vector<8x128xf32>
    %c0_50 = arith.constant 0 : index
    %c0_51 = arith.constant 0 : index
    %117 = vector.load %arg6[%c0_50, %c0_51] : memref<8x128xf32, #tpu.memory_space<vmem>>, vector<8x128xf32>
    tpu.vector_store %arg6[%c0_50, %c0_51], %114 {strides = array<i32>} : memref<8x128xf32, #tpu.memory_space<vmem>>, vector<8x128xf32>,
    %c0_52 = arith.constant 0 : index
    %c0_53 = arith.constant 0 : index
    %118 = vector.load %arg5[%c0_52, %c0_53] : memref<8x128xf32, #tpu.memory_space<vmem>>, vector<8x128xf32>
    tpu.vector_store %arg5[%c0_52, %c0_53], %116 {strides = array<i32>} : memref<8x128xf32, #tpu.memory_space<vmem>>, vector<8x128xf32>,
    %119 = arith.truncf %116 : vector<8x128xf32> to vector<8x128xbf16>
    %c2_54 = arith.constant 2 : index
    %c0_55 = arith.constant 0 : index
    %c0_56 = arith.constant 0 : index
    %120 = vector.load %arg4[%c2_54, %c0_55, %c0_56] : memref<8x8x128xbf16, #tpu.memory_space<vmem>>, vector<1x8x128xbf16>
    %121 = vector.shape_cast %120 : vector<1x8x128xbf16> to vector<8x128xbf16>
    %122 = vector.shape_cast %119 : vector<8x128xbf16> to vector<1x8x128xbf16>
    tpu.vector_store %arg4[%c2_54, %c0_55, %c0_56], %122 {strides = array<i32>} : memref<8x8x128xbf16, #tpu.memory_space<vmem>>, vector<1x8x128xbf16>,
    %c0_57 = arith.constant 0 : index
    %c0_58 = arith.constant 0 : index
    %123 = vector.load %arg5[%c0_57, %c0_58] : memref<8x128xf32, #tpu.memory_space<vmem>>, vector<8x128xf32>
    %124 = arith.truncf %123 : vector<8x128xf32> to vector<8x128xbf16>
    %c0_59 = arith.constant 0 : index
    %c0_60 = arith.constant 0 : index
    %125 = vector.load %arg3[%c0_59, %c0_60] : memref<128x512xbf16, #tpu.memory_space<vmem>>, vector<128x512xbf16>
    %cst_61 = arith.constant dense<0.000000e+00> : vector<8x512xf32>
    %126 = tpu.matmul %124, %125, %cst_61 {dimension_numbers = #tpu.dot_dimension_numbers<[1], [0], [0], [1], [0, 0, 1, 1], [], []>} : vector<8x128xbf16>, vector<128x512xbf16>, vector<8x512xf32> -> vector<8x512xf32>
    %c3 = arith.constant 3 : index
    %c0_62 = arith.constant 0 : index
    %c0_63 = arith.constant 0 : index
    %127 = vector.load %arg2[%c3, %c0_62, %c0_63] : memref<8x8x512xbf16, #tpu.memory_space<vmem>>, vector<1x8x512xbf16>
    %128 = vector.shape_cast %127 : vector<1x8x512xbf16> to vector<8x512xbf16>
    %129 = arith.extf %128 : vector<8x512xbf16> to vector<8x512xf32>
    %130 = arith.addf %129, %126 : vector<8x512xf32>
    %131 = vector.extract_strided_slice %130 {offsets = [0, 0], sizes = [8, 128], strides = [1, 1]} : vector<8x512xf32> to vector<8x128xf32>
    %132 = arith.negf %131 : vector<8x128xf32>
    %133 = math.exp %132 : vector<8x128xf32>
    %cst_64 = arith.constant 1.000000e+00 : f32
    %134 = vector.broadcast %cst_64 : f32 to vector<8x128xf32>
    %135 = arith.addf %134, %133 : vector<8x128xf32>
    %136 = arith.divf %134, %135 : vector<8x128xf32>
    %137 = vector.extract_strided_slice %130 {offsets = [0, 128], sizes = [8, 128], strides = [1, 1]} : vector<8x512xf32> to vector<8x128xf32>
    %138 = arith.negf %137 : vector<8x128xf32>
    %139 = math.exp %138 : vector<8x128xf32>
    %cst_65 = arith.constant 1.000000e+00 : f32
    %140 = vector.broadcast %cst_65 : f32 to vector<8x128xf32>
    %141 = arith.addf %140, %139 : vector<8x128xf32>
    %142 = arith.divf %140, %141 : vector<8x128xf32>
    %143 = vector.extract_strided_slice %130 {offsets = [0, 256], sizes = [8, 128], strides = [1, 1]} : vector<8x512xf32> to vector<8x128xf32>
    %144 = math.tanh %143 : vector<8x128xf32>
    %145 = vector.extract_strided_slice %130 {offsets = [0, 384], sizes = [8, 128], strides = [1, 1]} : vector<8x512xf32> to vector<8x128xf32>
    %146 = arith.negf %145 : vector<8x128xf32>
    %147 = math.exp %146 : vector<8x128xf32>
    %cst_66 = arith.constant 1.000000e+00 : f32
    %148 = vector.broadcast %cst_66 : f32 to vector<8x128xf32>
    %149 = arith.addf %148, %147 : vector<8x128xf32>
    %150 = arith.divf %148, %149 : vector<8x128xf32>
    %c0_67 = arith.constant 0 : index
    %c0_68 = arith.constant 0 : index
    %151 = vector.load %arg6[%c0_67, %c0_68] : memref<8x128xf32, #tpu.memory_space<vmem>>, vector<8x128xf32>
    %152 = arith.mulf %142, %151 : vector<8x128xf32>
    %153 = arith.mulf %136, %144 : vector<8x128xf32>
    %154 = arith.addf %152, %153 : vector<8x128xf32>
    %155 = math.tanh %154 : vector<8x128xf32>
    %156 = arith.mulf %150, %155 : vector<8x128xf32>
    %c0_69 = arith.constant 0 : index
    %c0_70 = arith.constant 0 : index
    %157 = vector.load %arg6[%c0_69, %c0_70] : memref<8x128xf32, #tpu.memory_space<vmem>>, vector<8x128xf32>
    tpu.vector_store %arg6[%c0_69, %c0_70], %154 {strides = array<i32>} : memref<8x128xf32, #tpu.memory_space<vmem>>, vector<8x128xf32>,
    %c0_71 = arith.constant 0 : index
    %c0_72 = arith.constant 0 : index
    %158 = vector.load %arg5[%c0_71, %c0_72] : memref<8x128xf32, #tpu.memory_space<vmem>>, vector<8x128xf32>
    tpu.vector_store %arg5[%c0_71, %c0_72], %156 {strides = array<i32>} : memref<8x128xf32, #tpu.memory_space<vmem>>, vector<8x128xf32>,
    %159 = arith.truncf %156 : vector<8x128xf32> to vector<8x128xbf16>
    %c3_73 = arith.constant 3 : index
    %c0_74 = arith.constant 0 : index
    %c0_75 = arith.constant 0 : index
    %160 = vector.load %arg4[%c3_73, %c0_74, %c0_75] : memref<8x8x128xbf16, #tpu.memory_space<vmem>>, vector<1x8x128xbf16>
    %161 = vector.shape_cast %160 : vector<1x8x128xbf16> to vector<8x128xbf16>
    %162 = vector.shape_cast %159 : vector<8x128xbf16> to vector<1x8x128xbf16>
    tpu.vector_store %arg4[%c3_73, %c0_74, %c0_75], %162 {strides = array<i32>} : memref<8x8x128xbf16, #tpu.memory_space<vmem>>, vector<1x8x128xbf16>,
    %c0_76 = arith.constant 0 : index
    %c0_77 = arith.constant 0 : index
    %163 = vector.load %arg5[%c0_76, %c0_77] : memref<8x128xf32, #tpu.memory_space<vmem>>, vector<8x128xf32>
    %164 = arith.truncf %163 : vector<8x128xf32> to vector<8x128xbf16>
    %c0_78 = arith.constant 0 : index
    %c0_79 = arith.constant 0 : index
    %165 = vector.load %arg3[%c0_78, %c0_79] : memref<128x512xbf16, #tpu.memory_space<vmem>>, vector<128x512xbf16>
    %cst_80 = arith.constant dense<0.000000e+00> : vector<8x512xf32>
    %166 = tpu.matmul %164, %165, %cst_80 {dimension_numbers = #tpu.dot_dimension_numbers<[1], [0], [0], [1], [0, 0, 1, 1], [], []>} : vector<8x128xbf16>, vector<128x512xbf16>, vector<8x512xf32> -> vector<8x512xf32>
    %c4 = arith.constant 4 : index
    %c0_81 = arith.constant 0 : index
    %c0_82 = arith.constant 0 : index
    %167 = vector.load %arg2[%c4, %c0_81, %c0_82] : memref<8x8x512xbf16, #tpu.memory_space<vmem>>, vector<1x8x512xbf16>
    %168 = vector.shape_cast %167 : vector<1x8x512xbf16> to vector<8x512xbf16>
    %169 = arith.extf %168 : vector<8x512xbf16> to vector<8x512xf32>
    %170 = arith.addf %169, %166 : vector<8x512xf32>
    %171 = vector.extract_strided_slice %170 {offsets = [0, 0], sizes = [8, 128], strides = [1, 1]} : vector<8x512xf32> to vector<8x128xf32>
    %172 = arith.negf %171 : vector<8x128xf32>
    %173 = math.exp %172 : vector<8x128xf32>
    %cst_83 = arith.constant 1.000000e+00 : f32
    %174 = vector.broadcast %cst_83 : f32 to vector<8x128xf32>
    %175 = arith.addf %174, %173 : vector<8x128xf32>
    %176 = arith.divf %174, %175 : vector<8x128xf32>
    %177 = vector.extract_strided_slice %170 {offsets = [0, 128], sizes = [8, 128], strides = [1, 1]} : vector<8x512xf32> to vector<8x128xf32>
    %178 = arith.negf %177 : vector<8x128xf32>
    %179 = math.exp %178 : vector<8x128xf32>
    %cst_84 = arith.constant 1.000000e+00 : f32
    %180 = vector.broadcast %cst_84 : f32 to vector<8x128xf32>
    %181 = arith.addf %180, %179 : vector<8x128xf32>
    %182 = arith.divf %180, %181 : vector<8x128xf32>
    %183 = vector.extract_strided_slice %170 {offsets = [0, 256], sizes = [8, 128], strides = [1, 1]} : vector<8x512xf32> to vector<8x128xf32>
    %184 = math.tanh %183 : vector<8x128xf32>
    %185 = vector.extract_strided_slice %170 {offsets = [0, 384], sizes = [8, 128], strides = [1, 1]} : vector<8x512xf32> to vector<8x128xf32>
    %186 = arith.negf %185 : vector<8x128xf32>
    %187 = math.exp %186 : vector<8x128xf32>
    %cst_85 = arith.constant 1.000000e+00 : f32
    %188 = vector.broadcast %cst_85 : f32 to vector<8x128xf32>
    %189 = arith.addf %188, %187 : vector<8x128xf32>
    %190 = arith.divf %188, %189 : vector<8x128xf32>
    %c0_86 = arith.constant 0 : index
    %c0_87 = arith.constant 0 : index
    %191 = vector.load %arg6[%c0_86, %c0_87] : memref<8x128xf32, #tpu.memory_space<vmem>>, vector<8x128xf32>
    %192 = arith.mulf %182, %191 : vector<8x128xf32>
    %193 = arith.mulf %176, %184 : vector<8x128xf32>
    %194 = arith.addf %192, %193 : vector<8x128xf32>
    %195 = math.tanh %194 : vector<8x128xf32>
    %196 = arith.mulf %190, %195 : vector<8x128xf32>
    %c0_88 = arith.constant 0 : index
    %c0_89 = arith.constant 0 : index
    %197 = vector.load %arg6[%c0_88, %c0_89] : memref<8x128xf32, #tpu.memory_space<vmem>>, vector<8x128xf32>
    tpu.vector_store %arg6[%c0_88, %c0_89], %194 {strides = array<i32>} : memref<8x128xf32, #tpu.memory_space<vmem>>, vector<8x128xf32>,
    %c0_90 = arith.constant 0 : index
    %c0_91 = arith.constant 0 : index
    %198 = vector.load %arg5[%c0_90, %c0_91] : memref<8x128xf32, #tpu.memory_space<vmem>>, vector<8x128xf32>
    tpu.vector_store %arg5[%c0_90, %c0_91], %196 {strides = array<i32>} : memref<8x128xf32, #tpu.memory_space<vmem>>, vector<8x128xf32>,
    %199 = arith.truncf %196 : vector<8x128xf32> to vector<8x128xbf16>
    %c4_92 = arith.constant 4 : index
    %c0_93 = arith.constant 0 : index
    %c0_94 = arith.constant 0 : index
    %200 = vector.load %arg4[%c4_92, %c0_93, %c0_94] : memref<8x8x128xbf16, #tpu.memory_space<vmem>>, vector<1x8x128xbf16>
    %201 = vector.shape_cast %200 : vector<1x8x128xbf16> to vector<8x128xbf16>
    %202 = vector.shape_cast %199 : vector<8x128xbf16> to vector<1x8x128xbf16>
    tpu.vector_store %arg4[%c4_92, %c0_93, %c0_94], %202 {strides = array<i32>} : memref<8x8x128xbf16, #tpu.memory_space<vmem>>, vector<1x8x128xbf16>,
    %c0_95 = arith.constant 0 : index
    %c0_96 = arith.constant 0 : index
    %203 = vector.load %arg5[%c0_95, %c0_96] : memref<8x128xf32, #tpu.memory_space<vmem>>, vector<8x128xf32>
    %204 = arith.truncf %203 : vector<8x128xf32> to vector<8x128xbf16>
    %c0_97 = arith.constant 0 : index
    %c0_98 = arith.constant 0 : index
    %205 = vector.load %arg3[%c0_97, %c0_98] : memref<128x512xbf16, #tpu.memory_space<vmem>>, vector<128x512xbf16>
    %cst_99 = arith.constant dense<0.000000e+00> : vector<8x512xf32>
    %206 = tpu.matmul %204, %205, %cst_99 {dimension_numbers = #tpu.dot_dimension_numbers<[1], [0], [0], [1], [0, 0, 1, 1], [], []>} : vector<8x128xbf16>, vector<128x512xbf16>, vector<8x512xf32> -> vector<8x512xf32>
    %c5 = arith.constant 5 : index
    %c0_100 = arith.constant 0 : index
    %c0_101 = arith.constant 0 : index
    %207 = vector.load %arg2[%c5, %c0_100, %c0_101] : memref<8x8x512xbf16, #tpu.memory_space<vmem>>, vector<1x8x512xbf16>
    %208 = vector.shape_cast %207 : vector<1x8x512xbf16> to vector<8x512xbf16>
    %209 = arith.extf %208 : vector<8x512xbf16> to vector<8x512xf32>
    %210 = arith.addf %209, %206 : vector<8x512xf32>
    %211 = vector.extract_strided_slice %210 {offsets = [0, 0], sizes = [8, 128], strides = [1, 1]} : vector<8x512xf32> to vector<8x128xf32>
    %212 = arith.negf %211 : vector<8x128xf32>
    %213 = math.exp %212 : vector<8x128xf32>
    %cst_102 = arith.constant 1.000000e+00 : f32
    %214 = vector.broadcast %cst_102 : f32 to vector<8x128xf32>
    %215 = arith.addf %214, %213 : vector<8x128xf32>
    %216 = arith.divf %214, %215 : vector<8x128xf32>
    %217 = vector.extract_strided_slice %210 {offsets = [0, 128], sizes = [8, 128], strides = [1, 1]} : vector<8x512xf32> to vector<8x128xf32>
    %218 = arith.negf %217 : vector<8x128xf32>
    %219 = math.exp %218 : vector<8x128xf32>
    %cst_103 = arith.constant 1.000000e+00 : f32
    %220 = vector.broadcast %cst_103 : f32 to vector<8x128xf32>
    %221 = arith.addf %220, %219 : vector<8x128xf32>
    %222 = arith.divf %220, %221 : vector<8x128xf32>
    %223 = vector.extract_strided_slice %210 {offsets = [0, 256], sizes = [8, 128], strides = [1, 1]} : vector<8x512xf32> to vector<8x128xf32>
    %224 = math.tanh %223 : vector<8x128xf32>
    %225 = vector.extract_strided_slice %210 {offsets = [0, 384], sizes = [8, 128], strides = [1, 1]} : vector<8x512xf32> to vector<8x128xf32>
    %226 = arith.negf %225 : vector<8x128xf32>
    %227 = math.exp %226 : vector<8x128xf32>
    %cst_104 = arith.constant 1.000000e+00 : f32
    %228 = vector.broadcast %cst_104 : f32 to vector<8x128xf32>
    %229 = arith.addf %228, %227 : vector<8x128xf32>
    %230 = arith.divf %228, %229 : vector<8x128xf32>
    %c0_105 = arith.constant 0 : index
    %c0_106 = arith.constant 0 : index
    %231 = vector.load %arg6[%c0_105, %c0_106] : memref<8x128xf32, #tpu.memory_space<vmem>>, vector<8x128xf32>
    %232 = arith.mulf %222, %231 : vector<8x128xf32>
    %233 = arith.mulf %216, %224 : vector<8x128xf32>
    %234 = arith.addf %232, %233 : vector<8x128xf32>
    %235 = math.tanh %234 : vector<8x128xf32>
    %236 = arith.mulf %230, %235 : vector<8x128xf32>
    %c0_107 = arith.constant 0 : index
    %c0_108 = arith.constant 0 : index
    %237 = vector.load %arg6[%c0_107, %c0_108] : memref<8x128xf32, #tpu.memory_space<vmem>>, vector<8x128xf32>
    tpu.vector_store %arg6[%c0_107, %c0_108], %234 {strides = array<i32>} : memref<8x128xf32, #tpu.memory_space<vmem>>, vector<8x128xf32>,
    %c0_109 = arith.constant 0 : index
    %c0_110 = arith.constant 0 : index
    %238 = vector.load %arg5[%c0_109, %c0_110] : memref<8x128xf32, #tpu.memory_space<vmem>>, vector<8x128xf32>
    tpu.vector_store %arg5[%c0_109, %c0_110], %236 {strides = array<i32>} : memref<8x128xf32, #tpu.memory_space<vmem>>, vector<8x128xf32>,
    %239 = arith.truncf %236 : vector<8x128xf32> to vector<8x128xbf16>
    %c5_111 = arith.constant 5 : index
    %c0_112 = arith.constant 0 : index
    %c0_113 = arith.constant 0 : index
    %240 = vector.load %arg4[%c5_111, %c0_112, %c0_113] : memref<8x8x128xbf16, #tpu.memory_space<vmem>>, vector<1x8x128xbf16>
    %241 = vector.shape_cast %240 : vector<1x8x128xbf16> to vector<8x128xbf16>
    %242 = vector.shape_cast %239 : vector<8x128xbf16> to vector<1x8x128xbf16>
    tpu.vector_store %arg4[%c5_111, %c0_112, %c0_113], %242 {strides = array<i32>} : memref<8x8x128xbf16, #tpu.memory_space<vmem>>, vector<1x8x128xbf16>,
    %c0_114 = arith.constant 0 : index
    %c0_115 = arith.constant 0 : index
    %243 = vector.load %arg5[%c0_114, %c0_115] : memref<8x128xf32, #tpu.memory_space<vmem>>, vector<8x128xf32>
    %244 = arith.truncf %243 : vector<8x128xf32> to vector<8x128xbf16>
    %c0_116 = arith.constant 0 : index
    %c0_117 = arith.constant 0 : index
    %245 = vector.load %arg3[%c0_116, %c0_117] : memref<128x512xbf16, #tpu.memory_space<vmem>>, vector<128x512xbf16>
    %cst_118 = arith.constant dense<0.000000e+00> : vector<8x512xf32>
    %246 = tpu.matmul %244, %245, %cst_118 {dimension_numbers = #tpu.dot_dimension_numbers<[1], [0], [0], [1], [0, 0, 1, 1], [], []>} : vector<8x128xbf16>, vector<128x512xbf16>, vector<8x512xf32> -> vector<8x512xf32>
    %c6 = arith.constant 6 : index
    %c0_119 = arith.constant 0 : index
    %c0_120 = arith.constant 0 : index
    %247 = vector.load %arg2[%c6, %c0_119, %c0_120] : memref<8x8x512xbf16, #tpu.memory_space<vmem>>, vector<1x8x512xbf16>
    %248 = vector.shape_cast %247 : vector<1x8x512xbf16> to vector<8x512xbf16>
    %249 = arith.extf %248 : vector<8x512xbf16> to vector<8x512xf32>
    %250 = arith.addf %249, %246 : vector<8x512xf32>
    %251 = vector.extract_strided_slice %250 {offsets = [0, 0], sizes = [8, 128], strides = [1, 1]} : vector<8x512xf32> to vector<8x128xf32>
    %252 = arith.negf %251 : vector<8x128xf32>
    %253 = math.exp %252 : vector<8x128xf32>
    %cst_121 = arith.constant 1.000000e+00 : f32
    %254 = vector.broadcast %cst_121 : f32 to vector<8x128xf32>
    %255 = arith.addf %254, %253 : vector<8x128xf32>
    %256 = arith.divf %254, %255 : vector<8x128xf32>
    %257 = vector.extract_strided_slice %250 {offsets = [0, 128], sizes = [8, 128], strides = [1, 1]} : vector<8x512xf32> to vector<8x128xf32>
    %258 = arith.negf %257 : vector<8x128xf32>
    %259 = math.exp %258 : vector<8x128xf32>
    %cst_122 = arith.constant 1.000000e+00 : f32
    %260 = vector.broadcast %cst_122 : f32 to vector<8x128xf32>
    %261 = arith.addf %260, %259 : vector<8x128xf32>
    %262 = arith.divf %260, %261 : vector<8x128xf32>
    %263 = vector.extract_strided_slice %250 {offsets = [0, 256], sizes = [8, 128], strides = [1, 1]} : vector<8x512xf32> to vector<8x128xf32>
    %264 = math.tanh %263 : vector<8x128xf32>
    %265 = vector.extract_strided_slice %250 {offsets = [0, 384], sizes = [8, 128], strides = [1, 1]} : vector<8x512xf32> to vector<8x128xf32>
    %266 = arith.negf %265 : vector<8x128xf32>
    %267 = math.exp %266 : vector<8x128xf32>
    %cst_123 = arith.constant 1.000000e+00 : f32
    %268 = vector.broadcast %cst_123 : f32 to vector<8x128xf32>
    %269 = arith.addf %268, %267 : vector<8x128xf32>
    %270 = arith.divf %268, %269 : vector<8x128xf32>
    %c0_124 = arith.constant 0 : index
    %c0_125 = arith.constant 0 : index
    %271 = vector.load %arg6[%c0_124, %c0_125] : memref<8x128xf32, #tpu.memory_space<vmem>>, vector<8x128xf32>
    %272 = arith.mulf %262, %271 : vector<8x128xf32>
    %273 = arith.mulf %256, %264 : vector<8x128xf32>
    %274 = arith.addf %272, %273 : vector<8x128xf32>
    %275 = math.tanh %274 : vector<8x128xf32>
    %276 = arith.mulf %270, %275 : vector<8x128xf32>
    %c0_126 = arith.constant 0 : index
    %c0_127 = arith.constant 0 : index
    %277 = vector.load %arg6[%c0_126, %c0_127] : memref<8x128xf32, #tpu.memory_space<vmem>>, vector<8x128xf32>
    tpu.vector_store %arg6[%c0_126, %c0_127], %274 {strides = array<i32>} : memref<8x128xf32, #tpu.memory_space<vmem>>, vector<8x128xf32>,
    %c0_128 = arith.constant 0 : index
    %c0_129 = arith.constant 0 : index
    %278 = vector.load %arg5[%c0_128, %c0_129] : memref<8x128xf32, #tpu.memory_space<vmem>>, vector<8x128xf32>
    tpu.vector_store %arg5[%c0_128, %c0_129], %276 {strides = array<i32>} : memref<8x128xf32, #tpu.memory_space<vmem>>, vector<8x128xf32>,
    %279 = arith.truncf %276 : vector<8x128xf32> to vector<8x128xbf16>
    %c6_130 = arith.constant 6 : index
    %c0_131 = arith.constant 0 : index
    %c0_132 = arith.constant 0 : index
    %280 = vector.load %arg4[%c6_130, %c0_131, %c0_132] : memref<8x8x128xbf16, #tpu.memory_space<vmem>>, vector<1x8x128xbf16>
    %281 = vector.shape_cast %280 : vector<1x8x128xbf16> to vector<8x128xbf16>
    %282 = vector.shape_cast %279 : vector<8x128xbf16> to vector<1x8x128xbf16>
    tpu.vector_store %arg4[%c6_130, %c0_131, %c0_132], %282 {strides = array<i32>} : memref<8x8x128xbf16, #tpu.memory_space<vmem>>, vector<1x8x128xbf16>,
    %c0_133 = arith.constant 0 : index
    %c0_134 = arith.constant 0 : index
    %283 = vector.load %arg5[%c0_133, %c0_134] : memref<8x128xf32, #tpu.memory_space<vmem>>, vector<8x128xf32>
    %284 = arith.truncf %283 : vector<8x128xf32> to vector<8x128xbf16>
    %c0_135 = arith.constant 0 : index
    %c0_136 = arith.constant 0 : index
    %285 = vector.load %arg3[%c0_135, %c0_136] : memref<128x512xbf16, #tpu.memory_space<vmem>>, vector<128x512xbf16>
    %cst_137 = arith.constant dense<0.000000e+00> : vector<8x512xf32>
    %286 = tpu.matmul %284, %285, %cst_137 {dimension_numbers = #tpu.dot_dimension_numbers<[1], [0], [0], [1], [0, 0, 1, 1], [], []>} : vector<8x128xbf16>, vector<128x512xbf16>, vector<8x512xf32> -> vector<8x512xf32>
    %c7 = arith.constant 7 : index
    %c0_138 = arith.constant 0 : index
    %c0_139 = arith.constant 0 : index
    %287 = vector.load %arg2[%c7, %c0_138, %c0_139] : memref<8x8x512xbf16, #tpu.memory_space<vmem>>, vector<1x8x512xbf16>
    %288 = vector.shape_cast %287 : vector<1x8x512xbf16> to vector<8x512xbf16>
    %289 = arith.extf %288 : vector<8x512xbf16> to vector<8x512xf32>
    %290 = arith.addf %289, %286 : vector<8x512xf32>
    %291 = vector.extract_strided_slice %290 {offsets = [0, 0], sizes = [8, 128], strides = [1, 1]} : vector<8x512xf32> to vector<8x128xf32>
    %292 = arith.negf %291 : vector<8x128xf32>
    %293 = math.exp %292 : vector<8x128xf32>
    %cst_140 = arith.constant 1.000000e+00 : f32
    %294 = vector.broadcast %cst_140 : f32 to vector<8x128xf32>
    %295 = arith.addf %294, %293 : vector<8x128xf32>
    %296 = arith.divf %294, %295 : vector<8x128xf32>
    %297 = vector.extract_strided_slice %290 {offsets = [0, 128], sizes = [8, 128], strides = [1, 1]} : vector<8x512xf32> to vector<8x128xf32>
    %298 = arith.negf %297 : vector<8x128xf32>
    %299 = math.exp %298 : vector<8x128xf32>
    %cst_141 = arith.constant 1.000000e+00 : f32
    %300 = vector.broadcast %cst_141 : f32 to vector<8x128xf32>
    %301 = arith.addf %300, %299 : vector<8x128xf32>
    %302 = arith.divf %300, %301 : vector<8x128xf32>
    %303 = vector.extract_strided_slice %290 {offsets = [0, 256], sizes = [8, 128], strides = [1, 1]} : vector<8x512xf32> to vector<8x128xf32>
    %304 = math.tanh %303 : vector<8x128xf32>
    %305 = vector.extract_strided_slice %290 {offsets = [0, 384], sizes = [8, 128], strides = [1, 1]} : vector<8x512xf32> to vector<8x128xf32>
    %306 = arith.negf %305 : vector<8x128xf32>
    %307 = math.exp %306 : vector<8x128xf32>
    %cst_142 = arith.constant 1.000000e+00 : f32
    %308 = vector.broadcast %cst_142 : f32 to vector<8x128xf32>
    %309 = arith.addf %308, %307 : vector<8x128xf32>
    %310 = arith.divf %308, %309 : vector<8x128xf32>
    %c0_143 = arith.constant 0 : index
    %c0_144 = arith.constant 0 : index
    %311 = vector.load %arg6[%c0_143, %c0_144] : memref<8x128xf32, #tpu.memory_space<vmem>>, vector<8x128xf32>
    %312 = arith.mulf %302, %311 : vector<8x128xf32>
    %313 = arith.mulf %296, %304 : vector<8x128xf32>
    %314 = arith.addf %312, %313 : vector<8x128xf32>
    %315 = math.tanh %314 : vector<8x128xf32>
    %316 = arith.mulf %310, %315 : vector<8x128xf32>
    %c0_145 = arith.constant 0 : index
    %c0_146 = arith.constant 0 : index
    %317 = vector.load %arg6[%c0_145, %c0_146] : memref<8x128xf32, #tpu.memory_space<vmem>>, vector<8x128xf32>
    tpu.vector_store %arg6[%c0_145, %c0_146], %314 {strides = array<i32>} : memref<8x128xf32, #tpu.memory_space<vmem>>, vector<8x128xf32>,
    %c0_147 = arith.constant 0 : index
    %c0_148 = arith.constant 0 : index
    %318 = vector.load %arg5[%c0_147, %c0_148] : memref<8x128xf32, #tpu.memory_space<vmem>>, vector<8x128xf32>
    tpu.vector_store %arg5[%c0_147, %c0_148], %316 {strides = array<i32>} : memref<8x128xf32, #tpu.memory_space<vmem>>, vector<8x128xf32>,
    %319 = arith.truncf %316 : vector<8x128xf32> to vector<8x128xbf16>
    %c7_149 = arith.constant 7 : index
    %c0_150 = arith.constant 0 : index
    %c0_151 = arith.constant 0 : index
    %320 = vector.load %arg4[%c7_149, %c0_150, %c0_151] : memref<8x8x128xbf16, #tpu.memory_space<vmem>>, vector<1x8x128xbf16>
    %321 = vector.shape_cast %320 : vector<1x8x128xbf16> to vector<8x128xbf16>
    %322 = vector.shape_cast %319 : vector<8x128xbf16> to vector<1x8x128xbf16>
    tpu.vector_store %arg4[%c7_149, %c0_150, %c0_151], %322 {strides = array<i32>} : memref<8x8x128xbf16, #tpu.memory_space<vmem>>, vector<1x8x128xbf16>,
    return
  }
  func.func @transform_0(%arg0: i32, %arg1: i32) -> (i32, i32, i32) {
    %c0_i32 = arith.constant 0 : i32
    %c0_i32_0 = arith.constant 0 : i32
    return %arg1, %arg0, %c0_i32 : i32, i32, i32
  }
  func.func @transform_1(%arg0: i32, %arg1: i32) -> (i32, i32) {
    %c0_i32 = arith.constant 0 : i32
    %c0_i32_0 = arith.constant 0 : i32
    %c0_i32_1 = arith.constant 0 : i32
    return %c0_i32, %c0_i32_0 : i32, i32
  }
  func.func @transform_2(%arg0: i32, %arg1: i32) -> (i32, i32, i32) {
    %c0_i32 = arith.constant 0 : i32
    %c0_i32_0 = arith.constant 0 : i32
    return %arg1, %arg0, %c0_i32 : i32, i32, i32
  }
}

module attributes {stable_mosaic.version = 11 : i64} {
  func.func @fc_kernel(%arg0: i32, %arg1: i32, %arg2: memref<128x128xbf16, #tpu.memory_space<vmem>>, %arg3: memref<128x256xbf16, #tpu.memory_space<vmem>>, %arg4: memref<1x256xf32, #tpu.memory_space<vmem>>, %arg5: memref<128x256xf32, #tpu.memory_space<vmem>>) attributes {dimension_semantics = [#tpu.dimension_semantics<parallel>, #tpu.dimension_semantics<parallel>], iteration_bounds = array<i64: 1, 1>, scalar_prefetch = 0 : i64, scratch_operands = 0 : i64, tpu.core_type = #tpu.core_type<tc>, window_params = [{transform_indices = @transform_0, window_bounds = array<i64: 128, 128>}, {transform_indices = @transform_1, window_bounds = array<i64: 128, 256>}, {transform_indices = @transform_2, window_bounds = array<i64: 1, 256>}, {transform_indices = @transform_3, window_bounds = array<i64: 128, 256>}]} {
    %c0 = arith.constant 0 : index
    %c0_0 = arith.constant 0 : index
    %0 = vector.load %arg2[%c0, %c0_0] : memref<128x128xbf16, #tpu.memory_space<vmem>>, vector<128x128xbf16>
    %c0_1 = arith.constant 0 : index
    %c0_2 = arith.constant 0 : index
    %1 = vector.load %arg3[%c0_1, %c0_2] : memref<128x256xbf16, #tpu.memory_space<vmem>>, vector<128x256xbf16>
    %cst = arith.constant dense<0.000000e+00> : vector<128x256xf32>
    %2 = tpu.matmul %0, %1, %cst {dimension_numbers = #tpu.dot_dimension_numbers<[1], [0], [0], [1], [0, 0, 1, 1], [], []>} : vector<128x128xbf16>, vector<128x256xbf16>, vector<128x256xf32> -> vector<128x256xf32>
    %c0_3 = arith.constant 0 : index
    %c0_4 = arith.constant 0 : index
    %3 = vector.load %arg4[%c0_3, %c0_4] : memref<1x256xf32, #tpu.memory_space<vmem>>, vector<1x256xf32>
    %4 = vector.broadcast %3 : vector<1x256xf32> to vector<128x256xf32>
    %5 = arith.addf %2, %4 : vector<128x256xf32>
    %c0_5 = arith.constant 0 : index
    %c0_6 = arith.constant 0 : index
    %6 = vector.load %arg5[%c0_5, %c0_6] : memref<128x256xf32, #tpu.memory_space<vmem>>, vector<128x256xf32>
    tpu.vector_store %arg5[%c0_5, %c0_6], %5 {strides = array<i32>} : memref<128x256xf32, #tpu.memory_space<vmem>>, vector<128x256xf32>,
    return
  }
  func.func @transform_0(%arg0: i32, %arg1: i32) -> (i32, i32) {
    %c0_i32 = arith.constant 0 : i32
    %c0_i32_0 = arith.constant 0 : i32
    return %arg1, %c0_i32 : i32, i32
  }
  func.func @transform_1(%arg0: i32, %arg1: i32) -> (i32, i32) {
    %c0_i32 = arith.constant 0 : i32
    %c0_i32_0 = arith.constant 0 : i32
    return %c0_i32, %arg0 : i32, i32
  }
  func.func @transform_2(%arg0: i32, %arg1: i32) -> (i32, i32) {
    %c0_i32 = arith.constant 0 : i32
    %c0_i32_0 = arith.constant 0 : i32
    return %c0_i32, %arg0 : i32, i32
  }
  func.func @transform_3(%arg0: i32, %arg1: i32) -> (i32, i32) {
    %c0_i32 = arith.constant 0 : i32
    return %arg1, %arg0 : i32, i32
  }
}

</mosaic_0001>

<bundles_post_ra>
// kernel: decoder_forward.3
= control target key start
LH: loop header
LB: loop body
LE: loop exit
PB: predicated region body
PF: predicated region fallthrough
CT: control target
= control target key end

     0   :  { %vm177_vm0 = vcmask 523264   ;;  %s961_s1 = inlined_call_operand.vmem [shape: bf16[64,512], index: 1, kind: input, shape index: {}]   ;;  %s962_s0 = inlined_call_operand.vmem [shape: bf16[128,64], index: 0, kind: input, shape index: {}]   ;;  %s963_s2 = inlined_call_operand.vmem [shape: f32[1,512], index: 2, kind: input, shape index: {}]   ;;  %s964_s3 = inlined_call_operand.vmem [shape: bf16[128,512], index: 3, kind: output, shape index: {}]  }
   0x1   :  { %v548_v0 = vld [vmem:[%s961_s1 + $0x60] sm:$0xf]  ;;  %v616_v1 = vld [vmem:[%s961_s1 + $0x6c] sm:$0xf0]  ;;  %v614_v2 = vld [vmem:[%s961_s1 + $0x64] sm:$0xf] }
   0x2   :  { %v549_v3 = vor.u32 %v616_v1, %v548_v0  ;;  %v550_v4 = vld [vmem:[%s961_s1 + $0x70] sm:$0xf0]  ;;  %v556_v5 = vld [vmem:[%s961_s1 + $0x68] sm:$0xf]  ;;  %v617_v6 = vld [vmem:[%s961_s1 + $0x74] sm:$0xf0] }
   0x3   :  { %v553_v7 = vor.u32 %v614_v2, %v550_v4  ;;  %v557_v8 = vor.u32 %v617_v6, %v556_v5  ;;  %v615_v9 = vld [vmem:[%s961_s1 + $0x6c] sm:$0xf]  ;;  %v558_v10 = vld [vmem:[%s961_s1 + $0x78] sm:$0xf0]  ;;  %v532_v11 = vld [vmem:[%s961_s1 + $0x40] sm:$0xf] }
   0x4   :  { %206 = vmatpush.bf16.msra.mxu0 %v549_v3  ;;  %v561_v12 = vor.u32 %v615_v9, %v558_v10  ;;  %v612_v13 = vld [vmem:[%s961_s1 + $0x4c] sm:$0xf0]  ;;  %v610_v14 = vld [vmem:[%s961_s1 + $0x44] sm:$0xf]  ;;  %v534_v15 = vld [vmem:[%s961_s1 + $0x50] sm:$0xf0] }
   0x5   :  { %255 = vmatpush.bf16.msra.mxu1 %v553_v7  ;;  %304 = vmatpush.bf16.msra.mxu2 %v557_v8  ;;  %v533_v16 = vor.u32 %v612_v13, %v532_v11  ;;  %v537_v17 = vor.u32 %v610_v14, %v534_v15  ;;  %v540_v18 = vld [vmem:[%s961_s1 + $0x48] sm:$0xf]  ;;  %v613_v19 = vld [vmem:[%s961_s1 + $0x54] sm:$0xf0]  ;;  %v611_v20 = vld [vmem:[%s961_s1 + $0x4c] sm:$0xf] }
   0x6   :  { %353 = vmatpush.bf16.msra.mxu3 %v561_v12  ;;  %v541_v21 = vor.u32 %v613_v19, %v540_v18  ;;  %v542_v22 = vld [vmem:[%s961_s1 + $0x58] sm:$0xf0]  ;;  %v516_v23 = vld [vmem:[%s961_s1 + $0x20] sm:$0xf]  ;;  %v608_v24 = vld [vmem:[%s961_s1 + $0x2c] sm:$0xf0] }
   0x7   :  { %v545_v25 = vor.u32 %v611_v20, %v542_v22  ;;  %v606_v26 = vld [vmem:[%s961_s1 + $0x24] sm:$0xf]  ;;  %v518_v27 = vld [vmem:[%s961_s1 + $0x30] sm:$0xf0]  ;;  %v524_v28 = vld [vmem:[%s961_s1 + $0x28] sm:$0xf]  ;;  %v517_v29 = vor.u32 %v608_v24, %v516_v23 }
   0x8   :  { %207 = vmatpush.bf16.msra.mxu0 %v533_v16  ;;  %v609_v30 = vld [vmem:[%s961_s1 + $0x34] sm:$0xf0]  ;;  %v607_v31 = vld [vmem:[%s961_s1 + $0x2c] sm:$0xf]  ;;  %v526_v32 = vld [vmem:[%s961_s1 + $0x38] sm:$0xf0]  ;;  %v521_v33 = vor.u32 %v606_v26, %v518_v27 }
   0x9   :  { %256 = vmatpush.bf16.msra.mxu1 %v537_v17  ;;  %305 = vmatpush.bf16.msra.mxu2 %v541_v21  ;;  %v525_v34 = vor.u32 %v609_v30, %v524_v28  ;;  %v500_v35 = vld [vmem:[%s961_s1] sm:$0xf]  ;;  %v604_v36 = vld [vmem:[%s961_s1 + $0xc] sm:$0xf0]  ;;  %v602_v37 = vld [vmem:[%s961_s1 + $0x4] sm:$0xf]  ;;  %v529_v38 = vor.u32 %v607_v31, %v526_v32 }
   0xa   :  { %354 = vmatpush.bf16.msra.mxu3 %v545_v25  ;;  %v502_v39 = vld [vmem:[%s961_s1 + $0x10] sm:$0xf0]  ;;  %v508_v40 = vld [vmem:[%s961_s1 + $0x8] sm:$0xf]  ;;  %v605_v41 = vld [vmem:[%s961_s1 + $0x14] sm:$0xf0]  ;;  %v501_v44 = vor.u32 %v604_v36, %v500_v35 }
   0xb   :  { %v603_v42 = vld [vmem:[%s961_s1 + $0xc] sm:$0xf]  ;;  %v510_v43 = vld [vmem:[%s961_s1 + $0x18] sm:$0xf0]  ;;  %v505_v45 = vor.u32 %v602_v37, %v502_v39  ;;  %v509_v46 = vor.u32 %v605_v41, %v508_v40  ;;  %v594_v48 = vld [vmem:[%s962_s0] sm:$0xff] }
   0xc   :  { %208 = vmatpush.bf16.msra.mxu0 %v517_v29  ;;  %v513_v47 = vor.u32 %v603_v42, %v510_v43  ;;  %v595_v49 = vld [vmem:[%s962_s0 + $0x8] sm:$0xff]  ;;  %v596_v50 = vld [vmem:[%s962_s0 + $0x10] sm:$0xff]  ;;  %v597_v51 = vld [vmem:[%s962_s0 + $0x18] sm:$0xff] }
   0xd   :  { %257 = vmatpush.bf16.msra.mxu1 %v521_v33  ;;  %306 = vmatpush.bf16.msra.mxu2 %v525_v34  ;;  %v598_v52 = vld [vmem:[%s962_s0 + $0x20] sm:$0xff]  ;;  %v599_v53 = vld [vmem:[%s962_s0 + $0x28] sm:$0xff]  ;;  %v600_v54 = vld [vmem:[%s962_s0 + $0x30] sm:$0xff] }
   0xe   :  { %355 = vmatpush.bf16.msra.mxu3 %v529_v38  ;;  %v601_v55 = vld [vmem:[%s962_s0 + $0x38] sm:$0xff]  ;;  %v47_v56 = vld [vmem:[%s963_s2] sm:$0xf] }
   0xf   :  { %v793_v57 = vperm.slane %v47_v56, 0  ;;  %v795_v58 = vperm.slane %v47_v56, 1  ;;  %v799_v0 = vperm.slane %v47_v56, 2  ;;  %v801_v1 = vperm.slane %v47_v56, 3 }
  0x10   :  { %209 = vmatpush.bf16.msra.mxu0 %v501_v44 }
  0x11   :  { %258 = vmatpush.bf16.msra.mxu1 %v505_v45  ;;  %307 = vmatpush.bf16.msra.mxu2 %v509_v46 }
  0x12   :  { %356 = vmatpush.bf16.msra.mxu3 %v513_v47 }
  0x13   :  { %562 = vmatmul.msk.bf16.vlgmr.msra.gmra.mxu0 %vm177_vm0, %v594_v48 }
  0x14   :  { %570 = vmatmul.msk.bf16.vlgmr.msra.gmra.mxu1 %vm177_vm0, %v594_v48  ;;  %578 = vmatmul.msk.bf16.vlgmr.msra.gmra.mxu2 %vm177_vm0, %v594_v48 }
  0x15   :  { %586 = vmatmul.msk.bf16.vlgmr.msra.gmra.mxu3 %vm177_vm0, %v594_v48 }
  0x23   :  { %563 = vmatmul.msk.bf16.gmra.mxu0 %vm177_vm0, %v595_v49 }
  0x24   :  { %571 = vmatmul.msk.bf16.gmra.mxu1 %vm177_vm0, %v595_v49  ;;  %579 = vmatmul.msk.bf16.gmra.mxu2 %vm177_vm0, %v595_v49 }
  0x25   :  { %587 = vmatmul.msk.bf16.gmra.mxu3 %vm177_vm0, %v595_v49 }
  0x33   :  { %564 = vmatmul.msk.bf16.gmra.mxu0 %vm177_vm0, %v596_v50 }
  0x34   :  { %572 = vmatmul.msk.bf16.gmra.mxu1 %vm177_vm0, %v596_v50  ;;  %580 = vmatmul.msk.bf16.gmra.mxu2 %vm177_vm0, %v596_v50 }
  0x35   :  { %588 = vmatmul.msk.bf16.gmra.mxu3 %vm177_vm0, %v596_v50 }
  0x43   :  { %565 = vmatmul.msk.bf16.gmra.mxu0 %vm177_vm0, %v597_v51 }
  0x44   :  { %573 = vmatmul.msk.bf16.gmra.mxu1 %vm177_vm0, %v597_v51  ;;  %581 = vmatmul.msk.bf16.gmra.mxu2 %vm177_vm0, %v597_v51 }
  0x45   :  { %589 = vmatmul.msk.bf16.gmra.mxu3 %vm177_vm0, %v597_v51 }
  0x53   :  { %566 = vmatmul.msk.bf16.gmra.mxu0 %vm177_vm0, %v598_v52 }
  0x54   :  { %574 = vmatmul.msk.bf16.gmra.mxu1 %vm177_vm0, %v598_v52  ;;  %582 = vmatmul.msk.bf16.gmra.mxu2 %vm177_vm0, %v598_v52 }
  0x55   :  { %590 = vmatmul.msk.bf16.gmra.mxu3 %vm177_vm0, %v598_v52 }
  0x63   :  { %567 = vmatmul.msk.bf16.gmra.mxu0 %vm177_vm0, %v599_v53 }
  0x64   :  { %575 = vmatmul.msk.bf16.gmra.mxu1 %vm177_vm0, %v599_v53  ;;  %583 = vmatmul.msk.bf16.gmra.mxu2 %vm177_vm0, %v599_v53 }
  0x65   :  { %591 = vmatmul.msk.bf16.gmra.mxu3 %vm177_vm0, %v599_v53 }
  0x73   :  { %568 = vmatmul.msk.bf16.gmra.mxu0 %vm177_vm0, %v600_v54 }
  0x74   :  { %576 = vmatmul.msk.bf16.gmra.mxu1 %vm177_vm0, %v600_v54  ;;  %584 = vmatmul.msk.bf16.gmra.mxu2 %vm177_vm0, %v600_v54 }
  0x75   :  { %592 = vmatmul.msk.bf16.gmra.mxu3 %vm177_vm0, %v600_v54 }
  0x83   :  { %569 = vmatmul.msk.bf16.gmra.mxu0 %vm177_vm0, %v601_v55 }
  0x84   :  { %577 = vmatmul.msk.bf16.gmra.mxu1 %vm177_vm0, %v601_v55  ;;  %585 = vmatmul.msk.bf16.gmra.mxu2 %vm177_vm0, %v601_v55 }
  0x85   :  { %593 = vmatmul.msk.bf16.gmra.mxu3 %vm177_vm0, %v601_v55 }
  0x90   :  { %v211_v59 = vpop.f32.mrf.mxu0 }
  0x91   :  { %v212_v60 = vadd.f32 %v211_v59, %v793_v57  ;;  %v260_v61 = vpop.f32.mrf.mxu1 }
  0x92   :  { %v261_v62 = vadd.f32 %v260_v61, %v795_v58 }
  0x94   :  { %v398_v63 = vpack.c.bf16 %v261_v62, %v212_v60 }
  0x96   :  { %430 = vst [vmem:[%s964_s3] sm:$0xff] %v398_v63 }
  0x97   :  { %v309_v2 = vpop.f32.mrf.mxu2 }
  0x98   :  { %v310_v3 = vadd.f32 %v309_v2, %v799_v0  ;;  %v358_v4 = vpop.f32.mrf.mxu3  ;;  %v213_v5 = vpop.f32.mrf.mxu0 }
  0x99   :  { %v359_v6 = vadd.f32 %v358_v4, %v801_v1  ;;  %v214_v7 = vadd.f32 %v213_v5, %v793_v57  ;;  %v262_v8 = vpop.f32.mrf.mxu1 }
  0x9a   :  { %v263_v9 = vadd.f32 %v262_v8, %v795_v58 }
  0x9b   :  { %v399_v10 = vpack.c.bf16 %v359_v6, %v310_v3 }
  0x9c   :  { %v400_v11 = vpack.c.bf16 %v263_v9, %v214_v7 }
  0x9d   :  { %431 = vst [vmem:[%s964_s3 + $0x8] sm:$0xff] %v399_v10 }
  0x9e   :  { %432 = vst [vmem:[%s964_s3 + $0x10] sm:$0xff] %v400_v11 }
  0x9f   :  { %v311_v12 = vpop.f32.mrf.mxu2 }
  0xa0   :  { %v312_v13 = vadd.f32 %v311_v12, %v799_v0  ;;  %v360_v14 = vpop.f32.mrf.mxu3  ;;  %v216_v15 = vpop.f32.mrf.mxu0 }
  0xa1   :  { %v361_v16 = vadd.f32 %v360_v14, %v801_v1  ;;  %v217_v17 = vadd.f32 %v216_v15, %v793_v57  ;;  %v265_v18 = vpop.f32.mrf.mxu1 }
  0xa2   :  { %v266_v19 = vadd.f32 %v265_v18, %v795_v58 }
  0xa3   :  { %v401_v20 = vpack.c.bf16 %v361_v16, %v312_v13 }
  0xa4   :  { %v402_v21 = vpack.c.bf16 %v266_v19, %v217_v17 }
  0xa5   :  { %433 = vst [vmem:[%s964_s3 + $0x18] sm:$0xff] %v401_v20 }
  0xa6   :  { %434 = vst [vmem:[%s964_s3 + $0x20] sm:$0xff] %v402_v21 }
  0xa7   :  { %v314_v22 = vpop.f32.mrf.mxu2 }
  0xa8   :  { %v315_v23 = vadd.f32 %v314_v22, %v799_v0  ;;  %v363_v24 = vpop.f32.mrf.mxu3  ;;  %v218_v25 = vpop.f32.mrf.mxu0 }
  0xa9   :  { %v364_v26 = vadd.f32 %v363_v24, %v801_v1  ;;  %v219_v27 = vadd.f32 %v218_v25, %v793_v57  ;;  %v267_v28 = vpop.f32.mrf.mxu1 }
  0xaa   :  { %v268_v29 = vadd.f32 %v267_v28, %v795_v58 }
  0xab   :  { %v403_v30 = vpack.c.bf16 %v364_v26, %v315_v23 }
  0xac   :  { %v404_v31 = vpack.c.bf16 %v268_v29, %v219_v27 }
  0xad   :  { %435 = vst [vmem:[%s964_s3 + $0x28] sm:$0xff] %v403_v30 }
  0xae   :  { %436 = vst [vmem:[%s964_s3 + $0x30] sm:$0xff] %v404_v31 }
  0xaf   :  { %v316_v32 = vpop.f32.mrf.mxu2 }
  0xb0   :  { %v317_v33 = vadd.f32 %v316_v32, %v799_v0  ;;  %v365_v34 = vpop.f32.mrf.mxu3  ;;  %v221_v35 = vpop.f32.mrf.mxu0 }
  0xb1   :  { %v366_v36 = vadd.f32 %v365_v34, %v801_v1  ;;  %v222_v37 = vadd.f32 %v221_v35, %v793_v57  ;;  %v270_v38 = vpop.f32.mrf.mxu1 }
  0xb2   :  { %v271_v39 = vadd.f32 %v270_v38, %v795_v58 }
  0xb3   :  { %v405_v40 = vpack.c.bf16 %v366_v36, %v317_v33 }
  0xb4   :  { %v406_v41 = vpack.c.bf16 %v271_v39, %v222_v37 }
  0xb5   :  { %437 = vst [vmem:[%s964_s3 + $0x38] sm:$0xff] %v405_v40 }
  0xb6   :  { %438 = vst [vmem:[%s964_s3 + $0x40] sm:$0xff] %v406_v41 }
  0xb7   :  { %v319_v42 = vpop.f32.mrf.mxu2 }
  0xb8   :  { %v320_v43 = vadd.f32 %v319_v42, %v799_v0  ;;  %v368_v44 = vpop.f32.mrf.mxu3  ;;  %v223_v45 = vpop.f32.mrf.mxu0 }
  0xb9   :  { %v369_v46 = vadd.f32 %v368_v44, %v801_v1  ;;  %v224_v47 = vadd.f32 %v223_v45, %v793_v57  ;;  %v272_v48 = vpop.f32.mrf.mxu1 }
  0xba   :  { %v273_v49 = vadd.f32 %v272_v48, %v795_v58 }
  0xbb   :  { %v407_v50 = vpack.c.bf16 %v369_v46, %v320_v43 }
  0xbc   :  { %v408_v51 = vpack.c.bf16 %v273_v49, %v224_v47 }
  0xbd   :  { %439 = vst [vmem:[%s964_s3 + $0x48] sm:$0xff] %v407_v50 }
  0xbe   :  { %440 = vst [vmem:[%s964_s3 + $0x50] sm:$0xff] %v408_v51 }
  0xbf   :  { %v321_v52 = vpop.f32.mrf.mxu2 }
  0xc0   :  { %v322_v53 = vadd.f32 %v321_v52, %v799_v0  ;;  %v370_v54 = vpop.f32.mrf.mxu3  ;;  %v226_v55 = vpop.f32.mrf.mxu0 }
  0xc1   :  { %v371_v56 = vadd.f32 %v370_v54, %v801_v1  ;;  %v227_v59 = vadd.f32 %v226_v55, %v793_v57  ;;  %v275_v60 = vpop.f32.mrf.mxu1 }
  0xc2   :  { %v276_v61 = vadd.f32 %v275_v60, %v795_v58 }
  0xc3   :  { %v409_v62 = vpack.c.bf16 %v371_v56, %v322_v53 }
  0xc4   :  { %v410_v63 = vpack.c.bf16 %v276_v61, %v227_v59 }
  0xc5   :  { %441 = vst [vmem:[%s964_s3 + $0x58] sm:$0xff] %v409_v62 }
  0xc6   :  { %442 = vst [vmem:[%s964_s3 + $0x60] sm:$0xff] %v410_v63 }
  0xc7   :  { %v324_v2 = vpop.f32.mrf.mxu2 }
  0xc8   :  { %v325_v3 = vadd.f32 %v324_v2, %v799_v0  ;;  %v373_v4 = vpop.f32.mrf.mxu3  ;;  %v228_v5 = vpop.f32.mrf.mxu0 }
  0xc9   :  { %v374_v6 = vadd.f32 %v373_v4, %v801_v1  ;;  %v229_v7 = vadd.f32 %v228_v5, %v793_v57  ;;  %v277_v8 = vpop.f32.mrf.mxu1 }
  0xca   :  { %v278_v9 = vadd.f32 %v277_v8, %v795_v58 }
  0xcb   :  { %v411_v10 = vpack.c.bf16 %v374_v6, %v325_v3 }
  0xcc   :  { %v412_v11 = vpack.c.bf16 %v278_v9, %v229_v7 }
  0xcd   :  { %443 = vst [vmem:[%s964_s3 + $0x68] sm:$0xff] %v411_v10 }
  0xce   :  { %444 = vst [vmem:[%s964_s3 + $0x70] sm:$0xff] %v412_v11 }
  0xcf   :  { %v326_v12 = vpop.f32.mrf.mxu2 }
  0xd0   :  { %v327_v13 = vadd.f32 %v326_v12, %v799_v0  ;;  %v375_v14 = vpop.f32.mrf.mxu3  ;;  %v231_v15 = vpop.f32.mrf.mxu0 }
  0xd1   :  { %v376_v16 = vadd.f32 %v375_v14, %v801_v1  ;;  %v232_v17 = vadd.f32 %v231_v15, %v793_v57  ;;  %v280_v18 = vpop.f32.mrf.mxu1 }
  0xd2   :  { %v281_v19 = vadd.f32 %v280_v18, %v795_v58 }
  0xd3   :  { %v413_v20 = vpack.c.bf16 %v376_v16, %v327_v13 }
  0xd4   :  { %v414_v21 = vpack.c.bf16 %v281_v19, %v232_v17 }
  0xd5   :  { %445 = vst [vmem:[%s964_s3 + $0x78] sm:$0xff] %v413_v20 }
  0xd6   :  { %446 = vst [vmem:[%s964_s3 + $0x80] sm:$0xff] %v414_v21 }
  0xd7   :  { %v329_v22 = vpop.f32.mrf.mxu2 }
  0xd8   :  { %v330_v23 = vadd.f32 %v329_v22, %v799_v0  ;;  %v378_v24 = vpop.f32.mrf.mxu3  ;;  %v233_v25 = vpop.f32.mrf.mxu0 }
  0xd9   :  { %v379_v26 = vadd.f32 %v378_v24, %v801_v1  ;;  %v234_v27 = vadd.f32 %v233_v25, %v793_v57  ;;  %v282_v28 = vpop.f32.mrf.mxu1 }
  0xda   :  { %v283_v29 = vadd.f32 %v282_v28, %v795_v58 }
  0xdb   :  { %v415_v30 = vpack.c.bf16 %v379_v26, %v330_v23 }
  0xdc   :  { %v416_v31 = vpack.c.bf16 %v283_v29, %v234_v27 }
  0xdd   :  { %447 = vst [vmem:[%s964_s3 + $0x88] sm:$0xff] %v415_v30 }
  0xde   :  { %448 = vst [vmem:[%s964_s3 + $0x90] sm:$0xff] %v416_v31 }
  0xdf   :  { %v331_v32 = vpop.f32.mrf.mxu2 }
  0xe0   :  { %v332_v33 = vadd.f32 %v331_v32, %v799_v0  ;;  %v380_v34 = vpop.f32.mrf.mxu3  ;;  %v236_v35 = vpop.f32.mrf.mxu0 }
  0xe1   :  { %v381_v36 = vadd.f32 %v380_v34, %v801_v1  ;;  %v237_v37 = vadd.f32 %v236_v35, %v793_v57  ;;  %v285_v38 = vpop.f32.mrf.mxu1 }
  0xe2   :  { %v286_v39 = vadd.f32 %v285_v38, %v795_v58 }
  0xe3   :  { %v417_v40 = vpack.c.bf16 %v381_v36, %v332_v33 }
  0xe4   :  { %v418_v41 = vpack.c.bf16 %v286_v39, %v237_v37 }
  0xe5   :  { %449 = vst [vmem:[%s964_s3 + $0x98] sm:$0xff] %v417_v40 }
  0xe6   :  { %450 = vst [vmem:[%s964_s3 + $0xa0] sm:$0xff] %v418_v41 }
  0xe7   :  { %v334_v42 = vpop.f32.mrf.mxu2 }
  0xe8   :  { %v335_v43 = vadd.f32 %v334_v42, %v799_v0  ;;  %v383_v44 = vpop.f32.mrf.mxu3  ;;  %v238_v45 = vpop.f32.mrf.mxu0 }
  0xe9   :  { %v384_v46 = vadd.f32 %v383_v44, %v801_v1  ;;  %v239_v47 = vadd.f32 %v238_v45, %v793_v57  ;;  %v287_v48 = vpop.f32.mrf.mxu1 }
  0xea   :  { %v288_v49 = vadd.f32 %v287_v48, %v795_v58 }
  0xeb   :  { %v419_v50 = vpack.c.bf16 %v384_v46, %v335_v43 }
  0xec   :  { %v420_v51 = vpack.c.bf16 %v288_v49, %v239_v47 }
  0xed   :  { %451 = vst [vmem:[%s964_s3 + $0xa8] sm:$0xff] %v419_v50 }
  0xee   :  { %452 = vst [vmem:[%s964_s3 + $0xb0] sm:$0xff] %v420_v51 }
  0xef   :  { %v336_v52 = vpop.f32.mrf.mxu2 }
  0xf0   :  { %v337_v53 = vadd.f32 %v336_v52, %v799_v0  ;;  %v385_v54 = vpop.f32.mrf.mxu3  ;;  %v241_v55 = vpop.f32.mrf.mxu0 }
  0xf1   :  { %v386_v56 = vadd.f32 %v385_v54, %v801_v1  ;;  %v242_v59 = vadd.f32 %v241_v55, %v793_v57  ;;  %v290_v60 = vpop.f32.mrf.mxu1 }
  0xf2   :  { %v291_v61 = vadd.f32 %v290_v60, %v795_v58 }
  0xf3   :  { %v421_v62 = vpack.c.bf16 %v386_v56, %v337_v53 }
  0xf4   :  { %v422_v63 = vpack.c.bf16 %v291_v61, %v242_v59 }
  0xf5   :  { %453 = vst [vmem:[%s964_s3 + $0xb8] sm:$0xff] %v421_v62 }
  0xf6   :  { %454 = vst [vmem:[%s964_s3 + $0xc0] sm:$0xff] %v422_v63 }
  0xf7   :  { %v339_v2 = vpop.f32.mrf.mxu2 }
  0xf8   :  { %v340_v3 = vadd.f32 %v339_v2, %v799_v0  ;;  %v388_v4 = vpop.f32.mrf.mxu3  ;;  %v243_v5 = vpop.f32.mrf.mxu0 }
  0xf9   :  { %v389_v6 = vadd.f32 %v388_v4, %v801_v1  ;;  %v244_v7 = vadd.f32 %v243_v5, %v793_v57  ;;  %v292_v8 = vpop.f32.mrf.mxu1 }
  0xfa   :  { %v293_v9 = vadd.f32 %v292_v8, %v795_v58 }
  0xfb   :  { %v423_v10 = vpack.c.bf16 %v389_v6, %v340_v3 }
  0xfc   :  { %v424_v11 = vpack.c.bf16 %v293_v9, %v244_v7 }
  0xfd   :  { %455 = vst [vmem:[%s964_s3 + $0xc8] sm:$0xff] %v423_v10 }
  0xfe   :  { %456 = vst [vmem:[%s964_s3 + $0xd0] sm:$0xff] %v424_v11 }
  0xff   :  { %v341_v12 = vpop.f32.mrf.mxu2 }
 0x100   :  { %v342_v13 = vadd.f32 %v341_v12, %v799_v0  ;;  %v390_v14 = vpop.f32.mrf.mxu3  ;;  %v246_v15 = vpop.f32.mrf.mxu0 }
 0x101   :  { %v391_v16 = vadd.f32 %v390_v14, %v801_v1  ;;  %v247_v17 = vadd.f32 %v246_v15, %v793_v57  ;;  %v295_v18 = vpop.f32.mrf.mxu1 }
 0x102   :  { %v296_v19 = vadd.f32 %v295_v18, %v795_v58 }
 0x103   :  { %v425_v20 = vpack.c.bf16 %v391_v16, %v342_v13 }
 0x104   :  { %v426_v21 = vpack.c.bf16 %v296_v19, %v247_v17 }
 0x105   :  { %457 = vst [vmem:[%s964_s3 + $0xd8] sm:$0xff] %v425_v20 }
 0x106   :  { %458 = vst [vmem:[%s964_s3 + $0xe0] sm:$0xff] %v426_v21 }
 0x107   :  { %v344_v22 = vpop.f32.mrf.mxu2 }
 0x108   :  { %v345_v23 = vadd.f32 %v344_v22, %v799_v0  ;;  %v393_v24 = vpop.f32.mrf.mxu3  ;;  %v248_v25 = vpop.f32.mrf.mxu0 }
 0x109   :  { %v394_v26 = vadd.f32 %v393_v24, %v801_v1  ;;  %v249_v27 = vadd.f32 %v248_v25, %v793_v57  ;;  %v297_v28 = vpop.f32.mrf.mxu1 }
 0x10a   :  { %v298_v29 = vadd.f32 %v297_v28, %v795_v58 }
 0x10b   :  { %v427_v30 = vpack.c.bf16 %v394_v26, %v345_v23 }
 0x10c   :  { %v428_v31 = vpack.c.bf16 %v298_v29, %v249_v27 }
 0x10d   :  { %459 = vst [vmem:[%s964_s3 + $0xe8] sm:$0xff] %v427_v30 }
 0x10e   :  { %460 = vst [vmem:[%s964_s3 + $0xf0] sm:$0xff] %v428_v31 }
 0x10f   :  { %v346_v32 = vpop.f32.mrf.mxu2 }
 0x110   :  { %v347_v33 = vadd.f32 %v346_v32, %v799_v0  ;;  %v395_v34 = vpop.f32.mrf.mxu3 }
 0x111   :  { %v396_v35 = vadd.f32 %v395_v34, %v801_v1 }
 0x113   :  { %v429_v57 = vpack.c.bf16 %v396_v35, %v347_v33 }
 0x115   :  { %461 = vst [vmem:[%s964_s3 + $0xf8] sm:$0xff] %v429_v57 }

// kernel: decoder_forward.5
= control target key start
LH: loop header
LB: loop body
LE: loop exit
PB: predicated region body
PF: predicated region fallthrough
CT: control target
= control target key end

     0   :  { %s725_s1 = inlined_call_operand.vmem [shape: bf16[128,256], index: 1, kind: input, shape index: {}]   ;;  %s726_s0 = inlined_call_operand.vmem [shape: bf16[128,128], index: 0, kind: input, shape index: {}]   ;;  %s727_s2 = inlined_call_operand.vmem [shape: f32[1,256], index: 2, kind: input, shape index: {}]   ;;  %s728_s3 = inlined_call_operand.vmem [shape: f32[128,256], index: 3, kind: output, shape index: {}]  }
   0x1   :  { %v404_v0 = vld [vmem:[%s725_s1 + $0x70] sm:$0xf]  ;;  %v433_v1 = vld [vmem:[%s725_s1 + $0x74] sm:$0xf0]  ;;  %v432_v2 = vld [vmem:[%s725_s1 + $0x74] sm:$0xf] }
   0x2   :  { %v405_v3 = vor.u32 %v433_v1, %v404_v0  ;;  %v406_v4 = vld [vmem:[%s725_s1 + $0x78] sm:$0xf0]  ;;  %v396_v5 = vld [vmem:[%s725_s1 + $0x60] sm:$0xf]  ;;  %v431_v6 = vld [vmem:[%s725_s1 + $0x64] sm:$0xf0] }
   0x3   :  { %v409_v7 = vor.u32 %v432_v2, %v406_v4  ;;  %v430_v8 = vld [vmem:[%s725_s1 + $0x64] sm:$0xf]  ;;  %v398_v9 = vld [vmem:[%s725_s1 + $0x68] sm:$0xf0]  ;;  %v397_v10 = vor.u32 %v431_v6, %v396_v5  ;;  %v388_v12 = vld [vmem:[%s725_s1 + $0x50] sm:$0xf] }
   0x4   :  { %180 = vmatpush.bf16.msra.mxu0 %v405_v3  ;;  %434 = vmatpush.bf16.msra.mxu2 %v405_v3  ;;  %v401_v11 = vor.u32 %v430_v8, %v398_v9  ;;  %v429_v13 = vld [vmem:[%s725_s1 + $0x54] sm:$0xf0]  ;;  %v428_v14 = vld [vmem:[%s725_s1 + $0x54] sm:$0xf]  ;;  %v390_v15 = vld [vmem:[%s725_s1 + $0x58] sm:$0xf0] }
   0x5   :  { %229 = vmatpush.bf16.msra.mxu1 %v409_v7  ;;  %442 = vmatpush.bf16.msra.mxu3 %v409_v7  ;;  %v389_v16 = vor.u32 %v429_v13, %v388_v12  ;;  %v393_v17 = vor.u32 %v428_v14, %v390_v15  ;;  %v380_v18 = vld [vmem:[%s725_s1 + $0x40] sm:$0xf]  ;;  %v427_v19 = vld [vmem:[%s725_s1 + $0x44] sm:$0xf0]  ;;  %v426_v20 = vld [vmem:[%s725_s1 + $0x44] sm:$0xf] }
   0x6   :  { %v382_v21 = vld [vmem:[%s725_s1 + $0x48] sm:$0xf0]  ;;  %v381_v22 = vor.u32 %v427_v19, %v380_v18  ;;  %v372_v24 = vld [vmem:[%s725_s1 + $0x30] sm:$0xf]  ;;  %v425_v25 = vld [vmem:[%s725_s1 + $0x34] sm:$0xf0] }
   0x7   :  { %v385_v23 = vor.u32 %v426_v20, %v382_v21  ;;  %v424_v26 = vld [vmem:[%s725_s1 + $0x34] sm:$0xf]  ;;  %v374_v27 = vld [vmem:[%s725_s1 + $0x38] sm:$0xf0]  ;;  %v373_v28 = vor.u32 %v425_v25, %v372_v24  ;;  %v364_v30 = vld [vmem:[%s725_s1 + $0x20] sm:$0xf] }
   0x8   :  { %181 = vmatpush.bf16.msra.mxu0 %v397_v10  ;;  %435 = vmatpush.bf16.msra.mxu2 %v397_v10  ;;  %v377_v29 = vor.u32 %v424_v26, %v374_v27  ;;  %v423_v31 = vld [vmem:[%s725_s1 + $0x24] sm:$0xf0]  ;;  %v422_v32 = vld [vmem:[%s725_s1 + $0x24] sm:$0xf]  ;;  %v366_v33 = vld [vmem:[%s725_s1 + $0x28] sm:$0xf0] }
   0x9   :  { %230 = vmatpush.bf16.msra.mxu1 %v401_v11  ;;  %443 = vmatpush.bf16.msra.mxu3 %v401_v11  ;;  %v365_v34 = vor.u32 %v423_v31, %v364_v30  ;;  %v369_v35 = vor.u32 %v422_v32, %v366_v33  ;;  %v356_v36 = vld [vmem:[%s725_s1 + $0x10] sm:$0xf]  ;;  %v421_v37 = vld [vmem:[%s725_s1 + $0x14] sm:$0xf0]  ;;  %v420_v38 = vld [vmem:[%s725_s1 + $0x14] sm:$0xf] }
   0xa   :  { %v358_v39 = vld [vmem:[%s725_s1 + $0x18] sm:$0xf0]  ;;  %v357_v40 = vor.u32 %v421_v37, %v356_v36  ;;  %v348_v42 = vld [vmem:[%s725_s1] sm:$0xf]  ;;  %v419_v43 = vld [vmem:[%s725_s1 + $0x4] sm:$0xf0] }
   0xb   :  { %v361_v41 = vor.u32 %v420_v38, %v358_v39  ;;  %v418_v44 = vld [vmem:[%s725_s1 + $0x4] sm:$0xf]  ;;  %v350_v45 = vld [vmem:[%s725_s1 + $0x8] sm:$0xf0]  ;;  %v349_v46 = vor.u32 %v419_v43, %v348_v42  ;;  %v412_v52 = vld [vmem:[%s726_s0 + $0x10] sm:$0xff] }
   0xc   :  { %182 = vmatpush.bf16.msra.mxu0 %v389_v16  ;;  %436 = vmatpush.bf16.msra.mxu2 %v389_v16  ;;  %v353_v47 = vor.u32 %v418_v44, %v350_v45  ;;  %v410_v48 = vld [vmem:[%s726_s0] sm:$0xff]  ;;  %v411_v50 = vld [vmem:[%s726_s0 + $0x8] sm:$0xff]  ;;  %v416_v53 = vld [vmem:[%s726_s0 + $0x30] sm:$0xff] }
   0xd   :  { %231 = vmatpush.bf16.msra.mxu1 %v393_v17  ;;  %444 = vmatpush.bf16.msra.mxu3 %v393_v17  ;;  %v414_v49 = vld [vmem:[%s726_s0 + $0x20] sm:$0xff]  ;;  %v415_v51 = vld [vmem:[%s726_s0 + $0x28] sm:$0xff]  ;;  %v413_v54 = vld [vmem:[%s726_s0 + $0x18] sm:$0xff] }
   0xe   :  { %v417_v55 = vld [vmem:[%s726_s0 + $0x38] sm:$0xff]  ;;  %v46_v56 = vld [vmem:[%s727_s2] sm:$0x3] }
   0xf   :  { %v593_v57 = vperm.slane %v46_v56, 0  ;;  %v595_v58 = vperm.slane %v46_v56, 1 }
  0x10   :  { %183 = vmatpush.bf16.msra.mxu0 %v381_v22  ;;  %437 = vmatpush.bf16.msra.mxu2 %v381_v22 }
  0x11   :  { %232 = vmatpush.bf16.msra.mxu1 %v385_v23  ;;  %445 = vmatpush.bf16.msra.mxu3 %v385_v23 }
  0x14   :  { %184 = vmatpush.bf16.msra.mxu0 %v373_v28  ;;  %438 = vmatpush.bf16.msra.mxu2 %v373_v28 }
  0x15   :  { %233 = vmatpush.bf16.msra.mxu1 %v377_v29  ;;  %446 = vmatpush.bf16.msra.mxu3 %v377_v29 }
  0x18   :  { %185 = vmatpush.bf16.msra.mxu0 %v365_v34  ;;  %439 = vmatpush.bf16.msra.mxu2 %v365_v34 }
  0x19   :  { %234 = vmatpush.bf16.msra.mxu1 %v369_v35  ;;  %447 = vmatpush.bf16.msra.mxu3 %v369_v35 }
  0x1c   :  { %186 = vmatpush.bf16.msra.mxu0 %v357_v40  ;;  %440 = vmatpush.bf16.msra.mxu2 %v357_v40 }
  0x1d   :  { %235 = vmatpush.bf16.msra.mxu1 %v361_v41  ;;  %448 = vmatpush.bf16.msra.mxu3 %v361_v41 }
  0x20   :  { %187 = vmatpush.bf16.msra.mxu0 %v349_v46  ;;  %441 = vmatpush.bf16.msra.mxu2 %v349_v46 }
  0x21   :  { %236 = vmatpush.bf16.msra.mxu1 %v353_v47  ;;  %449 = vmatpush.bf16.msra.mxu3 %v353_v47 }
  0x23   :  { %188 = vmatmul.bf16.vlgmr.msra.gmra.mxu0 %v410_v48  ;;  %208 = vmatmul.bf16.vlgmr.msra.gmra.mxu2 %v414_v49 }
  0x24   :  { %237 = vmatmul.bf16.vlgmr.msra.gmra.mxu1 %v410_v48  ;;  %257 = vmatmul.bf16.vlgmr.msra.gmra.mxu3 %v414_v49 }
  0x33   :  { %193 = vmatmul.bf16.gmra.mxu0 %v411_v50  ;;  %213 = vmatmul.bf16.gmra.mxu2 %v415_v51 }
  0x34   :  { %242 = vmatmul.bf16.gmra.mxu1 %v411_v50  ;;  %262 = vmatmul.bf16.gmra.mxu3 %v415_v51 }
  0x43   :  { %198 = vmatmul.bf16.gmra.mxu0 %v412_v52  ;;  %218 = vmatmul.bf16.gmra.mxu2 %v416_v53 }
  0x44   :  { %247 = vmatmul.bf16.gmra.mxu1 %v412_v52  ;;  %267 = vmatmul.bf16.gmra.mxu3 %v416_v53 }
  0x53   :  { %203 = vmatmul.bf16.gmra.mxu0 %v413_v54  ;;  %223 = vmatmul.bf16.gmra.mxu2 %v417_v55 }
  0x54   :  { %252 = vmatmul.bf16.gmra.mxu1 %v413_v54  ;;  %272 = vmatmul.bf16.gmra.mxu3 %v417_v55 }
  0xa0   :  { %v189_v59 = vpop.f32.mrf.mxu0 }
  0xa1   :  { %v190_v60 = vadd.f32 %v189_v59, %v593_v57  ;;  %v238_v61 = vpop.f32.mrf.mxu1 }
  0xa2   :  { %v239_v62 = vadd.f32 %v238_v61, %v595_v58 }
  0xa3   :  { %278 = vst [vmem:[%s728_s3] sm:$0xff] %v190_v60 }
  0xa4   :  { %279 = vst [vmem:[%s728_s3 + $0x8] sm:$0xff] %v239_v62 }
  0xa6   :  { %v209_v63 = vpop.f32.mrf.mxu2 }
  0xa7   :  { %v210_v0 = vadd.f32 %v209_v63, %v593_v57  ;;  %v258_v1 = vpop.f32.mrf.mxu3 }
  0xa8   :  { %v259_v2 = vadd.f32 %v258_v1, %v595_v58  ;;  %v191_v3 = vpop.f32.mrf.mxu0 }
  0xa9   :  { %294 = vst [vmem:[%s728_s3 + $0x80] sm:$0xff] %v210_v0  ;;  %v192_v4 = vadd.f32 %v191_v3, %v593_v57  ;;  %v240_v5 = vpop.f32.mrf.mxu1 }
  0xaa   :  { %295 = vst [vmem:[%s728_s3 + $0x88] sm:$0xff] %v259_v2  ;;  %v241_v6 = vadd.f32 %v240_v5, %v595_v58 }
  0xab   :  { %280 = vst [vmem:[%s728_s3 + $0x10] sm:$0xff] %v192_v4 }
  0xac   :  { %281 = vst [vmem:[%s728_s3 + $0x18] sm:$0xff] %v241_v6 }
  0xae   :  { %v211_v7 = vpop.f32.mrf.mxu2 }
  0xaf   :  { %v212_v8 = vadd.f32 %v211_v7, %v593_v57  ;;  %v260_v9 = vpop.f32.mrf.mxu3 }
  0xb0   :  { %v261_v10 = vadd.f32 %v260_v9, %v595_v58  ;;  %v194_v11 = vpop.f32.mrf.mxu0 }
  0xb1   :  { %296 = vst [vmem:[%s728_s3 + $0x90] sm:$0xff] %v212_v8  ;;  %v195_v12 = vadd.f32 %v194_v11, %v593_v57  ;;  %v243_v13 = vpop.f32.mrf.mxu1 }
  0xb2   :  { %297 = vst [vmem:[%s728_s3 + $0x98] sm:$0xff] %v261_v10  ;;  %v244_v14 = vadd.f32 %v243_v13, %v595_v58 }
  0xb3   :  { %282 = vst [vmem:[%s728_s3 + $0x20] sm:$0xff] %v195_v12 }
  0xb4   :  { %283 = vst [vmem:[%s728_s3 + $0x28] sm:$0xff] %v244_v14 }
  0xb6   :  { %v214_v15 = vpop.f32.mrf.mxu2 }
  0xb7   :  { %v215_v16 = vadd.f32 %v214_v15, %v593_v57  ;;  %v263_v17 = vpop.f32.mrf.mxu3 }
  0xb8   :  { %v264_v18 = vadd.f32 %v263_v17, %v595_v58  ;;  %v196_v19 = vpop.f32.mrf.mxu0 }
  0xb9   :  { %298 = vst [vmem:[%s728_s3 + $0xa0] sm:$0xff] %v215_v16  ;;  %v197_v20 = vadd.f32 %v196_v19, %v593_v57  ;;  %v245_v21 = vpop.f32.mrf.mxu1 }
  0xba   :  { %299 = vst [vmem:[%s728_s3 + $0xa8] sm:$0xff] %v264_v18  ;;  %v246_v22 = vadd.f32 %v245_v21, %v595_v58 }
  0xbb   :  { %284 = vst [vmem:[%s728_s3 + $0x30] sm:$0xff] %v197_v20 }
  0xbc   :  { %285 = vst [vmem:[%s728_s3 + $0x38] sm:$0xff] %v246_v22 }
  0xbe   :  { %v216_v23 = vpop.f32.mrf.mxu2 }
  0xbf   :  { %v217_v24 = vadd.f32 %v216_v23, %v593_v57  ;;  %v265_v25 = vpop.f32.mrf.mxu3 }
  0xc0   :  { %v266_v26 = vadd.f32 %v265_v25, %v595_v58  ;;  %v199_v27 = vpop.f32.mrf.mxu0 }
  0xc1   :  { %300 = vst [vmem:[%s728_s3 + $0xb0] sm:$0xff] %v217_v24  ;;  %v200_v28 = vadd.f32 %v199_v27, %v593_v57  ;;  %v248_v29 = vpop.f32.mrf.mxu1 }
  0xc2   :  { %301 = vst [vmem:[%s728_s3 + $0xb8] sm:$0xff] %v266_v26  ;;  %v249_v30 = vadd.f32 %v248_v29, %v595_v58 }
  0xc3   :  { %286 = vst [vmem:[%s728_s3 + $0x40] sm:$0xff] %v200_v28 }
  0xc4   :  { %287 = vst [vmem:[%s728_s3 + $0x48] sm:$0xff] %v249_v30 }
  0xc6   :  { %v219_v31 = vpop.f32.mrf.mxu2 }
  0xc7   :  { %v220_v32 = vadd.f32 %v219_v31, %v593_v57  ;;  %v268_v33 = vpop.f32.mrf.mxu3 }
  0xc8   :  { %v269_v34 = vadd.f32 %v268_v33, %v595_v58  ;;  %v201_v35 = vpop.f32.mrf.mxu0 }
  0xc9   :  { %302 = vst [vmem:[%s728_s3 + $0xc0] sm:$0xff] %v220_v32  ;;  %v202_v36 = vadd.f32 %v201_v35, %v593_v57  ;;  %v250_v37 = vpop.f32.mrf.mxu1 }
  0xca   :  { %303 = vst [vmem:[%s728_s3 + $0xc8] sm:$0xff] %v269_v34  ;;  %v251_v38 = vadd.f32 %v250_v37, %v595_v58 }
  0xcb   :  { %288 = vst [vmem:[%s728_s3 + $0x50] sm:$0xff] %v202_v36 }
  0xcc   :  { %289 = vst [vmem:[%s728_s3 + $0x58] sm:$0xff] %v251_v38 }
  0xce   :  { %v221_v39 = vpop.f32.mrf.mxu2 }
  0xcf   :  { %v222_v40 = vadd.f32 %v221_v39, %v593_v57  ;;  %v270_v41 = vpop.f32.mrf.mxu3 }
  0xd0   :  { %v271_v42 = vadd.f32 %v270_v41, %v595_v58  ;;  %v204_v43 = vpop.f32.mrf.mxu0 }
  0xd1   :  { %304 = vst [vmem:[%s728_s3 + $0xd0] sm:$0xff] %v222_v40  ;;  %v205_v44 = vadd.f32 %v204_v43, %v593_v57  ;;  %v253_v45 = vpop.f32.mrf.mxu1 }
  0xd2   :  { %305 = vst [vmem:[%s728_s3 + $0xd8] sm:$0xff] %v271_v42  ;;  %v254_v46 = vadd.f32 %v253_v45, %v595_v58 }
  0xd3   :  { %290 = vst [vmem:[%s728_s3 + $0x60] sm:$0xff] %v205_v44 }
  0xd4   :  { %291 = vst [vmem:[%s728_s3 + $0x68] sm:$0xff] %v254_v46 }
  0xd6   :  { %v224_v47 = vpop.f32.mrf.mxu2 }
  0xd7   :  { %v225_v48 = vadd.f32 %v224_v47, %v593_v57  ;;  %v273_v49 = vpop.f32.mrf.mxu3 }
  0xd8   :  { %v274_v50 = vadd.f32 %v273_v49, %v595_v58  ;;  %v206_v51 = vpop.f32.mrf.mxu0 }
  0xd9   :  { %306 = vst [vmem:[%s728_s3 + $0xe0] sm:$0xff] %v225_v48  ;;  %v207_v52 = vadd.f32 %v206_v51, %v593_v57  ;;  %v255_v53 = vpop.f32.mrf.mxu1 }
  0xda   :  { %307 = vst [vmem:[%s728_s3 + $0xe8] sm:$0xff] %v274_v50  ;;  %v256_v54 = vadd.f32 %v255_v53, %v595_v58 }
  0xdb   :  { %292 = vst [vmem:[%s728_s3 + $0x70] sm:$0xff] %v207_v52 }
  0xdc   :  { %293 = vst [vmem:[%s728_s3 + $0x78] sm:$0xff] %v256_v54 }
  0xde   :  { %v226_v55 = vpop.f32.mrf.mxu2 }
  0xdf   :  { %v227_v56 = vadd.f32 %v226_v55, %v593_v57  ;;  %v275_v59 = vpop.f32.mrf.mxu3 }
  0xe0   :  { %v276_v60 = vadd.f32 %v275_v59, %v595_v58 }
  0xe1   :  { %308 = vst [vmem:[%s728_s3 + $0xf0] sm:$0xff] %v227_v56 }
  0xe2   :  { %309 = vst [vmem:[%s728_s3 + $0xf8] sm:$0xff] %v276_v60 }

// kernel: decoder_forward.4
= control target key start
LH: loop header
LB: loop body
LE: loop exit
PB: predicated region body
PF: predicated region fallthrough
CT: control target
= control target key end

     0   :  { %s4412_s9 = smov 0   ;;  %s4414_s10 = smov 0   ;;  %s6065_s0 = inlined_call_operand.vmem [shape: bf16[16,8,512], index: 0, kind: input, shape index: {}]   ;;  %s6066_s1 = inlined_call_operand.vmem [shape: bf16[128,512], index: 1, kind: input, shape index: {}]   ;;  %s6067_s2 = inlined_call_operand.vmem [shape: bf16[16,8,128], index: 2, kind: output, shape index: {}]  }
   0x1   :  { %s4416_s11 = smov 0  }
   0x2 LB: > { %s21_s12 = sadd.s32 1, %s4390_s10  ;;  %p2884_p0 = scmp.ge.s32.totalorder %s4394_s11, 1  ;;  %s4394_s11 = sphi %s4416_s11, %s12_s11   ;;  %s4390_s10 = sphi %s4414_s10, %s6069_s10   ;;  %s4386_s9 = sphi %s4412_s9, %s6068_s9  }
   0x3   : > { %p22_p1 = scmp.ge.s32.totalorder %s21_s12, 2  ;;  %p134_p2 = scmp.lt.s32.totalorder %s4394_s11, 3 }
   0x5   : > { %s6071_s12 = smov (%p22_p1, %s21_s12), 0  ;;  %p135_p3 = pnand %p2884_p0, %p134_p2 }
   0x6   : > { %s2885_s13 = sshll.u32 (!%p135_p3), %s4386_s9, 3  ;;  %p2890_p5 = scmp.ne.s32.totalorder (!%p135_p3), %s4386_s9, 0 }
   0x7   : > { %138 = sbr.rel (%p135_p3) target bundleno = 1431 (0x597), region = 28  ;;  %p165_p4 = scmp.lt.s32.totalorder (!%p135_p3), %s2885_s13, 15 }
   0xc   : > { %s6073_s13 = smov (!%p165_p4, %s2885_s13), 15  ;;  %187 = sbr.rel (%p2890_p5) target bundleno = 20 (0x14), region = 32 }
   0xd   : > { %s3962_s14 = sshll.u32 %s6073_s13, 4  ;;  %s2889_s15 = sshll.u32 %s6073_s13, 2 }
   0xe   : > { %s4433_s18 = scalar_lea.vmem %s6065_s0, %s3962_s14  ;;  %s4438_s21 = scalar_lea.vmem %s6067_s2, %s2889_s15 }
  0x11   : > { %v4396_v0 = vmov 0.0  }
  0x12   : > { %188 = vst [vmem:[#allocation2] sm:$0xff] %v4396_v0 }
  0x13   : > { %189 = vst [vmem:[#allocation3] sm:$0xff] %v4396_v0 }
  0x14 PF: > { %v3005_v1 = vld [vmem:[%s6066_s1 + $0xe0] sm:$0xf]  ;;  %v3993_v2 = vld [vmem:[%s6066_s1 + $0xec] sm:$0xf0]  ;;  %v3991_v3 = vld [vmem:[%s6066_s1 + $0xe4] sm:$0xf] }
  0x15   : > { %v3006_v4 = vor.u32 %v3993_v2, %v3005_v1  ;;  %v3007_v5 = vld [vmem:[%s6066_s1 + $0xf0] sm:$0xf0]  ;;  %v3992_v6 = vld [vmem:[%s6066_s1 + $0xec] sm:$0xf]  ;;  %v3015_v7 = vld [vmem:[%s6066_s1 + $0xf8] sm:$0xf0] }
  0x16   : > { %v3010_v8 = vor.u32 %v3991_v3, %v3007_v5  ;;  %v3018_v9 = vor.u32 %v3992_v6, %v3015_v7  ;;  %v2989_v10 = vld [vmem:[%s6066_s1 + $0xc0] sm:$0xf]  ;;  %v3989_v11 = vld [vmem:[%s6066_s1 + $0xcc] sm:$0xf0]  ;;  %v3987_v12 = vld [vmem:[%s6066_s1 + $0xc4] sm:$0xf] }
  0x17   : > { %384 = vmatpush.bf16.msra.mxu0 %v3006_v4  ;;  %v2990_v13 = vor.u32 %v3989_v11, %v2989_v10  ;;  %v2991_v14 = vld [vmem:[%s6066_s1 + $0xd0] sm:$0xf0]  ;;  %v3988_v15 = vld [vmem:[%s6066_s1 + $0xcc] sm:$0xf]  ;;  %v2999_v16 = vld [vmem:[%s6066_s1 + $0xd8] sm:$0xf0] }
  0x18   : > { %397 = vmatpush.bf16.msra.mxu1 %v3010_v8  ;;  %423 = vmatpush.bf16.msra.mxu3 %v3018_v9  ;;  %v2994_v17 = vor.u32 %v3987_v12, %v2991_v14  ;;  %v3002_v18 = vor.u32 %v3988_v15, %v2999_v16  ;;  %v3013_v19 = vld [vmem:[%s6066_s1 + $0xe8] sm:$0xf]  ;;  %v3994_v20 = vld [vmem:[%s6066_s1 + $0xf4] sm:$0xf0]  ;;  %v2973_v21 = vld [vmem:[%s6066_s1 + $0xa0] sm:$0xf] }
  0x19   : > { %v3014_v22 = vor.u32 %v3994_v20, %v3013_v19  ;;  %v3985_v23 = vld [vmem:[%s6066_s1 + $0xac] sm:$0xf0]  ;;  %v3983_v24 = vld [vmem:[%s6066_s1 + $0xa4] sm:$0xf]  ;;  %v2975_v25 = vld [vmem:[%s6066_s1 + $0xb0] sm:$0xf0] }
  0x1a   : > { %v3984_v26 = vld [vmem:[%s6066_s1 + $0xac] sm:$0xf]  ;;  %v2983_v27 = vld [vmem:[%s6066_s1 + $0xb8] sm:$0xf0]  ;;  %v2997_v28 = vld [vmem:[%s6066_s1 + $0xc8] sm:$0xf]  ;;  %v2974_v29 = vor.u32 %v3985_v23, %v2973_v21  ;;  %v2978_v33 = vor.u32 %v3983_v24, %v2975_v25 }
  0x1b   : > { %385 = vmatpush.bf16.msra.mxu0 %v2990_v13  ;;  %410 = vmatpush.bf16.msra.mxu2 %v3014_v22  ;;  %v3990_v30 = vld [vmem:[%s6066_s1 + $0xd4] sm:$0xf0]  ;;  %v2957_v31 = vld [vmem:[%s6066_s1 + $0x80] sm:$0xf]  ;;  %v3981_v32 = vld [vmem:[%s6066_s1 + $0x8c] sm:$0xf0]  ;;  %v2986_v34 = vor.u32 %v3984_v26, %v2983_v27 }
  0x1c   : > { %398 = vmatpush.bf16.msra.mxu1 %v2994_v17  ;;  %424 = vmatpush.bf16.msra.mxu3 %v3002_v18  ;;  %v2998_v35 = vor.u32 %v3990_v30, %v2997_v28  ;;  %v3979_v36 = vld [vmem:[%s6066_s1 + $0x84] sm:$0xf]  ;;  %v2959_v37 = vld [vmem:[%s6066_s1 + $0x90] sm:$0xf0]  ;;  %v3980_v38 = vld [vmem:[%s6066_s1 + $0x8c] sm:$0xf]  ;;  %v2958_v42 = vor.u32 %v3981_v32, %v2957_v31 }
  0x1d   : > { %v2967_v39 = vld [vmem:[%s6066_s1 + $0x98] sm:$0xf0]  ;;  %v2981_v40 = vld [vmem:[%s6066_s1 + $0xa8] sm:$0xf]  ;;  %v3986_v41 = vld [vmem:[%s6066_s1 + $0xb4] sm:$0xf0]  ;;  %v2962_v46 = vor.u32 %v3979_v36, %v2959_v37 }
  0x1e   : > { %v2982_v43 = vor.u32 %v3986_v41, %v2981_v40  ;;  %v2941_v44 = vld [vmem:[%s6066_s1 + $0x60] sm:$0xf]  ;;  %v3977_v45 = vld [vmem:[%s6066_s1 + $0x6c] sm:$0xf0]  ;;  %v2970_v47 = vor.u32 %v3980_v38, %v2967_v39  ;;  %v3975_v48 = vld [vmem:[%s6066_s1 + $0x64] sm:$0xf] }
  0x1f   : > { %386 = vmatpush.bf16.msra.mxu0 %v2974_v29  ;;  %411 = vmatpush.bf16.msra.mxu2 %v2998_v35  ;;  %v2965_v49 = vld [vmem:[%s6066_s1 + $0x88] sm:$0xf]  ;;  %v3982_v50 = vld [vmem:[%s6066_s1 + $0x94] sm:$0xf0]  ;;  %v2943_v51 = vld [vmem:[%s6066_s1 + $0x70] sm:$0xf0]  ;;  %v2942_v54 = vor.u32 %v3977_v45, %v2941_v44 }
  0x20   : > { %399 = vmatpush.bf16.msra.mxu1 %v2978_v33  ;;  %425 = vmatpush.bf16.msra.mxu3 %v2986_v34  ;;  %v3976_v52 = vld [vmem:[%s6066_s1 + $0x6c] sm:$0xf]  ;;  %v2951_v53 = vld [vmem:[%s6066_s1 + $0x78] sm:$0xf0]  ;;  %v2966_v55 = vor.u32 %v3982_v50, %v2965_v49  ;;  %v2925_v56 = vld [vmem:[%s6066_s1 + $0x40] sm:$0xf]  ;;  %v2946_v58 = vor.u32 %v3975_v48, %v2943_v51 }
  0x21   : > { %v3973_v57 = vld [vmem:[%s6066_s1 + $0x4c] sm:$0xf0]  ;;  %v2954_v59 = vor.u32 %v3976_v52, %v2951_v53  ;;  %v3971_v60 = vld [vmem:[%s6066_s1 + $0x44] sm:$0xf]  ;;  %v2949_v61 = vld [vmem:[%s6066_s1 + $0x68] sm:$0xf] }
  0x22   : > { %v3978_v62 = vld [vmem:[%s6066_s1 + $0x74] sm:$0xf0]  ;;  %v2927_v63 = vld [vmem:[%s6066_s1 + $0x50] sm:$0xf0]  ;;  %v3972_v0 = vld [vmem:[%s6066_s1 + $0x4c] sm:$0xf]  ;;  %v2926_v2 = vor.u32 %v3973_v57, %v2925_v56 }
  0x23   : > { %387 = vmatpush.bf16.msra.mxu0 %v2958_v42  ;;  %412 = vmatpush.bf16.msra.mxu2 %v2982_v43  ;;  %v2935_v1 = vld [vmem:[%s6066_s1 + $0x58] sm:$0xf0]  ;;  %v2950_v3 = vor.u32 %v3978_v62, %v2949_v61  ;;  %v2909_v4 = vld [vmem:[%s6066_s1 + $0x20] sm:$0xf]  ;;  %v3969_v5 = vld [vmem:[%s6066_s1 + $0x2c] sm:$0xf0]  ;;  %v2930_v6 = vor.u32 %v3971_v60, %v2927_v63 }
  0x24   : > { %400 = vmatpush.bf16.msra.mxu1 %v2962_v46  ;;  %426 = vmatpush.bf16.msra.mxu3 %v2970_v47  ;;  %v2938_v7 = vor.u32 %v3972_v0, %v2935_v1  ;;  %v3967_v8 = vld [vmem:[%s6066_s1 + $0x24] sm:$0xf]  ;;  %v2933_v9 = vld [vmem:[%s6066_s1 + $0x48] sm:$0xf]  ;;  %v3974_v10 = vld [vmem:[%s6066_s1 + $0x54] sm:$0xf0]  ;;  %v2910_v14 = vor.u32 %v3969_v5, %v2909_v4 }
  0x25   : > { %v2911_v11 = vld [vmem:[%s6066_s1 + $0x30] sm:$0xf0]  ;;  %v3968_v12 = vld [vmem:[%s6066_s1 + $0x2c] sm:$0xf]  ;;  %v2919_v13 = vld [vmem:[%s6066_s1 + $0x38] sm:$0xf0]  ;;  %v2934_v15 = vor.u32 %v3974_v10, %v2933_v9 }
  0x26   : > { %v2893_v16 = vld [vmem:[%s6066_s1] sm:$0xf]  ;;  %v3965_v17 = vld [vmem:[%s6066_s1 + $0xc] sm:$0xf0]  ;;  %v2914_v18 = vor.u32 %v3967_v8, %v2911_v11  ;;  %v2922_v19 = vor.u32 %v3968_v12, %v2919_v13  ;;  %v3963_v20 = vld [vmem:[%s6066_s1 + $0x4] sm:$0xf] }
  0x27   : > { %388 = vmatpush.bf16.msra.mxu0 %v2942_v54  ;;  %413 = vmatpush.bf16.msra.mxu2 %v2966_v55  ;;  %v2917_v21 = vld [vmem:[%s6066_s1 + $0x28] sm:$0xf]  ;;  %v3970_v22 = vld [vmem:[%s6066_s1 + $0x34] sm:$0xf0]  ;;  %v2895_v23 = vld [vmem:[%s6066_s1 + $0x10] sm:$0xf0]  ;;  %v2894_v26 = vor.u32 %v3965_v17, %v2893_v16 }
  0x28   : > { %401 = vmatpush.bf16.msra.mxu1 %v2946_v58  ;;  %427 = vmatpush.bf16.msra.mxu3 %v2954_v59  ;;  %v3964_v24 = vld [vmem:[%s6066_s1 + $0xc] sm:$0xf]  ;;  %v2903_v25 = vld [vmem:[%s6066_s1 + $0x18] sm:$0xf0]  ;;  %v190_v27 = vld [vmem:[#allocation2] sm:$0xff]  ;;  %v2918_v28 = vor.u32 %v3970_v22, %v2917_v21  ;;  %v2898_v29 = vor.u32 %v3963_v20, %v2895_v23 }
  0x29   : > { %v2906_v30 = vor.u32 %v3964_v24, %v2903_v25  ;;  %v2901_v31 = vld [vmem:[%s6066_s1 + $0x8] sm:$0xf]  ;;  %v3966_v32 = vld [vmem:[%s6066_s1 + $0x14] sm:$0xf0]  ;;  %v191_v33 = vpack.c.bf16 %v190_v27, %v190_v27  ;;  %v3136_v35 = vld [vmem:[%s6066_s1 + $0xe0] sm:$0xf] }
  0x2a   : > { %v2902_v34 = vor.u32 %v3966_v32, %v2901_v31  ;;  %v4025_v36 = vld [vmem:[%s6066_s1 + $0xec] sm:$0xf0]  ;;  %v4023_v37 = vld [vmem:[%s6066_s1 + $0xe4] sm:$0xf]  ;;  %v3138_v39 = vld [vmem:[%s6066_s1 + $0xf0] sm:$0xf0] }
  0x2b   : > { %389 = vmatpush.bf16.msra.mxu0 %v2926_v2  ;;  %414 = vmatpush.bf16.msra.mxu2 %v2950_v3  ;;  %v3137_v38 = vor.u32 %v4025_v36, %v3136_v35  ;;  %v3144_v40 = vld [vmem:[%s6066_s1 + $0xe8] sm:$0xf]  ;;  %v4026_v41 = vld [vmem:[%s6066_s1 + $0xf4] sm:$0xf0]  ;;  %v3141_v42 = vor.u32 %v4023_v37, %v3138_v39  ;;  %v4024_v44 = vld [vmem:[%s6066_s1 + $0xec] sm:$0xf] }
  0x2c   : > { %402 = vmatpush.bf16.msra.mxu1 %v2930_v6  ;;  %428 = vmatpush.bf16.msra.mxu3 %v2938_v7  ;;  %v3145_v43 = vor.u32 %v4026_v41, %v3144_v40  ;;  %v3146_v45 = vld [vmem:[%s6066_s1 + $0xf8] sm:$0xf0]  ;;  %v3120_v47 = vld [vmem:[%s6066_s1 + $0xc0] sm:$0xf]  ;;  %v4021_v48 = vld [vmem:[%s6066_s1 + $0xcc] sm:$0xf0] }
  0x2d   : > { %v3149_v46 = vor.u32 %v4024_v44, %v3146_v45  ;;  %v4019_v49 = vld [vmem:[%s6066_s1 + $0xc4] sm:$0xf]  ;;  %v3121_v50 = vor.u32 %v4021_v48, %v3120_v47  ;;  %v3122_v51 = vld [vmem:[%s6066_s1 + $0xd0] sm:$0xf0]  ;;  %v3128_v52 = vld [vmem:[%s6066_s1 + $0xc8] sm:$0xf] }
  0x2e   : > { %v4022_v53 = vld [vmem:[%s6066_s1 + $0xd4] sm:$0xf0]  ;;  %v3125_v54 = vor.u32 %v4019_v49, %v3122_v51  ;;  %v4020_v56 = vld [vmem:[%s6066_s1 + $0xcc] sm:$0xf]  ;;  %v3130_v57 = vld [vmem:[%s6066_s1 + $0xd8] sm:$0xf0] }
  0x2f   : > { %390 = vmatpush.bf16.msra.mxu0 %v2910_v14  ;;  %415 = vmatpush.bf16.msra.mxu2 %v2934_v15  ;;  %v3129_v55 = vor.u32 %v4022_v53, %v3128_v52  ;;  %v3133_v58 = vor.u32 %v4020_v56, %v3130_v57  ;;  %v3104_v59 = vld [vmem:[%s6066_s1 + $0xa0] sm:$0xf]  ;;  %v4017_v60 = vld [vmem:[%s6066_s1 + $0xac] sm:$0xf0]  ;;  %v4015_v61 = vld [vmem:[%s6066_s1 + $0xa4] sm:$0xf] }
  0x30   : > { %403 = vmatpush.bf16.msra.mxu1 %v2914_v18  ;;  %429 = vmatpush.bf16.msra.mxu3 %v2922_v19  ;;  %v3105_v62 = vor.u32 %v4017_v60, %v3104_v59  ;;  %v3106_v63 = vld [vmem:[%s6066_s1 + $0xb0] sm:$0xf0]  ;;  %v3112_v0 = vld [vmem:[%s6066_s1 + $0xa8] sm:$0xf]  ;;  %v4018_v1 = vld [vmem:[%s6066_s1 + $0xb4] sm:$0xf0] }
  0x31   : > { %v3109_v2 = vor.u32 %v4015_v61, %v3106_v63  ;;  %v3113_v3 = vor.u32 %v4018_v1, %v3112_v0  ;;  %v4016_v4 = vld [vmem:[%s6066_s1 + $0xac] sm:$0xf]  ;;  %v3114_v5 = vld [vmem:[%s6066_s1 + $0xb8] sm:$0xf0]  ;;  %v436_v6 = vld [vmem:[%s4433_s18] sm:$0xff] }
  0x32   : > { %v3117_v7 = vor.u32 %v4016_v4, %v3114_v5  ;;  %v3088_v8 = vld [vmem:[%s6066_s1 + $0x80] sm:$0xf]  ;;  %v4013_v9 = vld [vmem:[%s6066_s1 + $0x8c] sm:$0xf0]  ;;  %v4011_v10 = vld [vmem:[%s6066_s1 + $0x84] sm:$0xf]  ;;  %v438_v19 = vunpack.c.l.bf16 %v436_v6  ;;  %v439_v21 = vunpack.c.h.bf16 %v436_v6 }
  0x33   : > { %391 = vmatpush.bf16.msra.mxu0 %v2894_v26  ;;  %416 = vmatpush.bf16.msra.mxu2 %v2918_v28  ;;  %v3089_v11 = vor.u32 %v4013_v9, %v3088_v8  ;;  %v3090_v12 = vld [vmem:[%s6066_s1 + $0x90] sm:$0xf0]  ;;  %v3096_v13 = vld [vmem:[%s6066_s1 + $0x88] sm:$0xf]  ;;  %v4014_v14 = vld [vmem:[%s6066_s1 + $0x94] sm:$0xf0] }
  0x34   : > { %404 = vmatpush.bf16.msra.mxu1 %v2898_v29  ;;  %430 = vmatpush.bf16.msra.mxu3 %v2906_v30  ;;  %v3093_v15 = vor.u32 %v4011_v10, %v3090_v12  ;;  %v3097_v16 = vor.u32 %v4014_v14, %v3096_v13  ;;  %v4012_v17 = vld [vmem:[%s6066_s1 + $0x8c] sm:$0xf]  ;;  %v3098_v18 = vld [vmem:[%s6066_s1 + $0x98] sm:$0xf0]  ;;  %v3072_v22 = vld [vmem:[%s6066_s1 + $0x60] sm:$0xf] }
  0x35   : > { %v3101_v20 = vor.u32 %v4012_v17, %v3098_v18  ;;  %v4009_v23 = vld [vmem:[%s6066_s1 + $0x6c] sm:$0xf0]  ;;  %v4007_v24 = vld [vmem:[%s6066_s1 + $0x64] sm:$0xf]  ;;  %v3074_v26 = vld [vmem:[%s6066_s1 + $0x70] sm:$0xf0] }
  0x36   : > { %392 = vmatmul.bf16.vlgmr.msra.gmra.mxu0 %v191_v33  ;;  %v3073_v25 = vor.u32 %v4009_v23, %v3072_v22  ;;  %v3080_v27 = vld [vmem:[%s6066_s1 + $0x68] sm:$0xf]  ;;  %v4010_v28 = vld [vmem:[%s6066_s1 + $0x74] sm:$0xf0]  ;;  %v3077_v30 = vor.u32 %v4007_v24, %v3074_v26  ;;  %v4008_v32 = vld [vmem:[%s6066_s1 + $0x6c] sm:$0xf] }
  0x37   : > { %405 = vmatmul.bf16.vlgmr.msra.gmra.mxu1 %v191_v33  ;;  %431 = vmatmul.bf16.vlgmr.msra.gmra.mxu3 %v191_v33  ;;  %v3081_v31 = vor.u32 %v4010_v28, %v3080_v27  ;;  %v4754_v36 = vld [vmem:[%s4433_s18 + $0x8] sm:$0xff]  ;;  %v3056_v39 = vld [vmem:[%s6066_s1 + $0x40] sm:$0xf]  ;;  %v4005_v40 = vld [vmem:[%s6066_s1 + $0x4c] sm:$0xf0] }
  0x38   : > { %417 = vmatpush.bf16.msra.mxu2 %v2902_v34  ;;  %708 = vmatpush.bf16.msrb.mxu0 %v3137_v38  ;;  %v4003_v41 = vld [vmem:[%s6066_s1 + $0x44] sm:$0xf]  ;;  %v3058_v44 = vld [vmem:[%s6066_s1 + $0x50] sm:$0xf0]  ;;  %v3064_v45 = vld [vmem:[%s6066_s1 + $0x48] sm:$0xf]  ;;  %v441_v47 = vunpack.c.h.bf16 %v4754_v36  ;;  %v440_v23 = vunpack.c.l.bf16 %v4754_v36 }
  0x39   : > { %721 = vmatpush.bf16.msrb.mxu1 %v3141_v42  ;;  %747 = vmatpush.bf16.msrb.mxu3 %v3149_v46  ;;  %v3061_v48 = vor.u32 %v4003_v41, %v3058_v44  ;;  %v4006_v49 = vld [vmem:[%s6066_s1 + $0x54] sm:$0xf0]  ;;  %v3066_v52 = vld [vmem:[%s6066_s1 + $0x58] sm:$0xf0]  ;;  %v3999_v56 = vld [vmem:[%s6066_s1 + $0x24] sm:$0xf] }
  0x3a   : > { %v3065_v51 = vor.u32 %v4006_v49, %v3064_v45  ;;  %v3042_v59 = vld [vmem:[%s6066_s1 + $0x30] sm:$0xf0]  ;;  %v3048_v60 = vld [vmem:[%s6066_s1 + $0x28] sm:$0xf]  ;;  %v4002_v61 = vld [vmem:[%s6066_s1 + $0x34] sm:$0xf0] }
  0x3b   : > { %418 = vmatmul.bf16.vlgmr.msra.gmra.mxu2 %v191_v33  ;;  %v3082_v33 = vld [vmem:[%s6066_s1 + $0x78] sm:$0xf0]  ;;  %v3045_v0 = vor.u32 %v3999_v56, %v3042_v59  ;;  %v3049_v1 = vor.u32 %v4002_v61, %v3048_v60  ;;  %v3997_v8 = vld [vmem:[%s6066_s1 + $0xc] sm:$0xf0]  ;;  %v3995_v12 = vld [vmem:[%s6066_s1 + $0x4] sm:$0xf] }
  0x3c   : > { %734 = vmatpush.bf16.msrb.mxu2 %v3145_v43  ;;  %709 = vmatpush.bf16.msrb.mxu0 %v3121_v50  ;;  %v3085_v37 = vor.u32 %v4008_v32, %v3082_v33  ;;  %v3057_v43 = vor.u32 %v4005_v40, %v3056_v39  ;;  %v4004_v50 = vld [vmem:[%s6066_s1 + $0x4c] sm:$0xf]  ;;  %v3026_v13 = vld [vmem:[%s6066_s1 + $0x10] sm:$0xf0]  ;;  %v3032_v14 = vld [vmem:[%s6066_s1 + $0x8] sm:$0xf] }
  0x3d   : > { %722 = vmatpush.bf16.msrb.mxu1 %v3125_v54  ;;  %748 = vmatpush.bf16.msrb.mxu3 %v3133_v58  ;;  %v3069_v53 = vor.u32 %v4004_v50, %v3066_v52  ;;  %v3040_v54 = vld [vmem:[%s6066_s1 + $0x20] sm:$0xf]  ;;  %v3029_v17 = vor.u32 %v3995_v12, %v3026_v13  ;;  %v3998_v18 = vld [vmem:[%s6066_s1 + $0x14] sm:$0xf0]  ;;  %v3034_v22 = vld [vmem:[%s6066_s1 + $0x18] sm:$0xf0] }
  0x3e   : > { %v504_v50 = vld [vmem:[#allocation3] sm:$0xff] }
  0x3f   : > { %v4056_v13 = vld [vmem:[%s6066_s1 + $0xec] sm:$0xf] }
  0x40   : > { %735 = vmatpush.bf16.msrb.mxu2 %v3129_v55  ;;  %710 = vmatpush.bf16.msrb.mxu0 %v3105_v62  ;;  %v4001_v55 = vld [vmem:[%s6066_s1 + $0x2c] sm:$0xf0] }
  0x41   : > { %723 = vmatpush.bf16.msrb.mxu1 %v3109_v2  ;;  %749 = vmatpush.bf16.msrb.mxu3 %v3117_v7  ;;  %v3041_v58 = vor.u32 %v4001_v55, %v3040_v54  ;;  %v4000_v2 = vld [vmem:[%s6066_s1 + $0x2c] sm:$0xf]  ;;  %v3024_v7 = vld [vmem:[%s6066_s1] sm:$0xf] }
  0x44   : > { %736 = vmatpush.bf16.msrb.mxu2 %v3113_v3  ;;  %711 = vmatpush.bf16.msrb.mxu0 %v3089_v11  ;;  %v3050_v3 = vld [vmem:[%s6066_s1 + $0x38] sm:$0xf0]  ;;  %v3025_v11 = vor.u32 %v3997_v8, %v3024_v7  ;;  %v3272_v8 = vld [vmem:[%s6066_s1 + $0xf0] sm:$0xf0] }
  0x45   : > { %724 = vmatpush.bf16.msrb.mxu1 %v3093_v15  ;;  %750 = vmatpush.bf16.msrb.mxu3 %v3101_v20  ;;  %v3053_v5 = vor.u32 %v4000_v2, %v3050_v3  ;;  %v3033_v20 = vor.u32 %v3998_v18, %v3032_v14  ;;  %v3280_v14 = vld [vmem:[%s6066_s1 + $0xf8] sm:$0xf0]  ;;  %v4051_v18 = vld [vmem:[%s6066_s1 + $0xc4] sm:$0xf] }
  0x48   : > { %737 = vmatpush.bf16.msrb.mxu2 %v3097_v16  ;;  %712 = vmatpush.bf16.msrb.mxu0 %v3073_v25 }
  0x49   : > { %725 = vmatpush.bf16.msrb.mxu1 %v3077_v30  ;;  %751 = vmatpush.bf16.msrb.mxu3 %v3085_v37 }
  0x4c   : > { %738 = vmatpush.bf16.msrb.mxu2 %v3081_v31  ;;  %713 = vmatpush.bf16.msrb.mxu0 %v3057_v43 }
  0x4d   : > { %726 = vmatpush.bf16.msrb.mxu1 %v3061_v48  ;;  %752 = vmatpush.bf16.msrb.mxu3 %v3069_v53 }
  0x50   : > { %739 = vmatpush.bf16.msrb.mxu2 %v3065_v51  ;;  %714 = vmatpush.bf16.msrb.mxu0 %v3041_v58 }
  0x51   : > { %727 = vmatpush.bf16.msrb.mxu1 %v3045_v0  ;;  %753 = vmatpush.bf16.msrb.mxu3 %v3053_v5  ;;  %v4057_v5 = vld [vmem:[%s6066_s1 + $0xec] sm:$0xf0] }
  0x54   : > { %740 = vmatpush.bf16.msrb.mxu2 %v3049_v1  ;;  %715 = vmatpush.bf16.msrb.mxu0 %v3025_v11 }
  0x55   : > { %728 = vmatpush.bf16.msrb.mxu1 %v3029_v17  ;;  %v4053_v17 = vld [vmem:[%s6066_s1 + $0xcc] sm:$0xf0] }
  0x58   : > { %741 = vmatpush.bf16.msrb.mxu2 %v3033_v20  ;;  %v3256_v20 = vld [vmem:[%s6066_s1 + $0xd0] sm:$0xf0] }
  0xb3   : > { %v393_v29 = vpop.f32.mrf.mxu0 }
  0xb4   : > { %v442_v34 = vadd.f32 %v438_v19, %v393_v29  ;;  %v406_v35 = vpop.f32.mrf.mxu1 }
  0xb5   : > { %v443_v38 = vadd.f32 %v439_v21, %v406_v35  ;;  %v3996_v21 = vld [vmem:[%s6066_s1 + $0xc] sm:$0xf] }
  0xb6   : > { %v3019_v42 = vmul.f32 -1.442695, %v442_v34  ;;  %v3037_v25 = vor.u32 %v3996_v21, %v3034_v22  ;;  %v3262_v21 = vld [vmem:[%s6066_s1 + $0xc8] sm:$0xf]  ;;  %v4054_v22 = vld [vmem:[%s6066_s1 + $0xd4] sm:$0xf0] }
  0xb7   : > { %v3020_v46 = vmul.f32 -1.442695, %v443_v38 }
  0xb8   : > { %4244 = vpow2.f32 %v3019_v42  ;;  %754 = vmatpush.bf16.msrb.mxu3 %v3037_v25  ;;  %v4052_v25 = vld [vmem:[%s6066_s1 + $0xcc] sm:$0xf] }
  0xb9   : > { %4246 = vpow2.f32 %v3020_v46 }
  0xba   : > { %v432_v57 = vpop.f32.mrf.mxu3 }
  0xbb   : > { %v445_v62 = vadd.f32 %v441_v47, %v432_v57  ;;  %v395_v63 = vpop.f32.mrf.mxu0 }
  0xbc   : > { %v408_v4 = vpop.f32.mrf.mxu1 }
  0xbd   : > { %v3021_v6 = vmul.f32 -1.442695, %v445_v62  ;;  %v3270_v4 = vld [vmem:[%s6066_s1 + $0xe0] sm:$0xf] }
  0xbe   : > { %v4245_v9 = vpop.eup %4244  ;;  %v419_v10 = vpop.f32.mrf.mxu2  ;;  %v3271_v7 = vor.u32 %v4057_v5, %v3270_v4  ;;  %v3216_v4 = vld [vmem:[%s6066_s1 + $0x78] sm:$0xf0] }
  0xbf   : > { %v4247_v15 = vpop.eup %4246  ;;  %v449_v16 = vadd.f32 1.0, %v4245_v9  ;;  %4248 = vpow2.f32 %v3021_v6  ;;  %v444_v27 = vadd.f32 %v440_v23, %v419_v10  ;;  %v4055_v6 = vld [vmem:[%s6066_s1 + $0xe4] sm:$0xf]  ;;  %v3278_v9 = vld [vmem:[%s6066_s1 + $0xe8] sm:$0xf]  ;;  %v3259_v23 = vor.u32 %v4051_v18, %v3256_v20 }
  0xc0   : > { %v468_v19 = vadd.f32 1.0, %v4247_v15  ;;  %v4058_v10 = vld [vmem:[%s6066_s1 + $0xf4] sm:$0xf0]  ;;  %v3275_v11 = vor.u32 %v4055_v6, %v3272_v8  ;;  %1034 = vmatpush.bf16.msra.mxu0 %v3271_v7  ;;  %v3283_v15 = vor.u32 %v4056_v13, %v3280_v14  ;;  %v3198_v18 = vld [vmem:[%s6066_s1 + $0x48] sm:$0xf] }
  0xc1   : > { %4250 = vrcp.f32 %v449_v16  ;;  %v461_v37 = vand.u32 2147483648, %v449_v16  ;;  %v459_v39 = vand.u32 2147483647, %v449_v16  ;;  %vm455_vm2 = vweird.f32 %v449_v16  ;;  %v4956_v7 = vld [vmem:[%s4433_s18 + $0x18] sm:$0xff]  ;;  %v4036_v20 = vld [vmem:[%s6066_s1 + $0x4c] sm:$0xf] }
  0xc2   : > { %4252 = vrcp.f32 %v468_v19  ;;  %v434_v24 = vpop.f32.mrf.mxu3  ;;  %v480_v36 = vand.u32 2147483648, %v468_v19  ;;  %v478_v41 = vand.u32 2147483647, %v468_v19  ;;  %vm474_vm3 = vweird.f32 %v468_v19  ;;  %1047 = vmatpush.bf16.msra.mxu1 %v3275_v11  ;;  %1073 = vmatpush.bf16.msra.mxu3 %v3283_v15  ;;  %v4035_v11 = vld [vmem:[%s6066_s1 + $0x44] sm:$0xf] }
  0xc3   : > { %v462_v46 = vor.u32 1.1754944e-38, %v461_v37  ;;  %vm460_vm6 = vcmp.eq.f32.partialorder %v459_v39, 8.507059e+37  ;;  %v3279_v12 = vor.u32 %v4058_v10, %v3278_v9  ;;  %v3263_v24 = vor.u32 %v4054_v22, %v3262_v21  ;;  %v3150_v39 = vld [vmem:[%s4433_s18 + $0x10] sm:$0xff]  ;;  %v3190_v9 = vld [vmem:[%s6066_s1 + $0x40] sm:$0xf] }
  0xc4   : > { %v481_v48 = vor.u32 1.1754944e-38, %v480_v36  ;;  %vm479_vm7 = vcmp.eq.f32.partialorder %v478_v41, 8.507059e+37  ;;  %v4048_v36 = vld [vmem:[%s6066_s1 + $0xac] sm:$0xf]  ;;  %v3222_v41 = vld [vmem:[%s6066_s1 + $0x80] sm:$0xf] }
  0xc5   : > { %v4249_v26 = vpop.eup %4248  ;;  %1060 = vmatpush.bf16.msra.mxu2 %v3279_v12  ;;  %v4037_v10 = vld [vmem:[%s6066_s1 + $0x4c] sm:$0xf0]  ;;  %v3192_v15 = vld [vmem:[%s6066_s1 + $0x50] sm:$0xf0]  ;;  %v3200_v22 = vld [vmem:[%s6066_s1 + $0x58] sm:$0xf0] }
  0xc6   : > { %v488_v28 = vadd.f32 1.0, %v4249_v26  ;;  %v421_v29 = vpop.f32.mrf.mxu2  ;;  %v3264_v26 = vld [vmem:[%s6066_s1 + $0xd8] sm:$0xf0]  ;;  %1048 = vmatpush.bf16.msra.mxu1 %v3259_v23  ;;  %v3191_v14 = vor.u32 %v4037_v10, %v3190_v9  ;;  %v3203_v23 = vor.u32 %v4036_v20, %v3200_v22 }
  0xc7   : > { %v4251_v30 = vpop.eup %4250  ;;  %v4049_v29 = vld [vmem:[%s6066_s1 + $0xac] sm:$0xf0] }
  0xc8   : > { %v4253_v31 = vpop.eup %4252  ;;  %v451_v32 = vmul.f32 %v4251_v30, %v449_v16  ;;  %4254 = vrcp.f32 %v488_v28  ;;  %vm456_vm0 = vweird.f32 %v4251_v30  ;;  %v500_v60 = vand.u32 2147483648, %v488_v28  ;;  %v3254_v16 = vld [vmem:[%s6066_s1 + $0xc0] sm:$0xf] }
  0xc9   : > { %v470_v33 = vmul.f32 %v4253_v31, %v468_v19  ;;  %4256 = vtanh.f32 %v444_v27  ;;  %vm475_vm1 = vweird.f32 %v4253_v31  ;;  %vm457_vm4 = vmor %vm455_vm2, %vm456_vm0  ;;  %vm494_vm9 = vweird.f32 %v488_v28  ;;  %1061 = vmatpush.bf16.msra.mxu2 %v3263_v24  ;;  %v3174_v24 = vld [vmem:[%s6066_s1 + $0x20] sm:$0xf] }
  0xca   : > { %v452_v34 = vsub.f32 1.0, %v451_v32  ;;  %vm476_vm5 = vmor %vm474_vm3, %vm475_vm1  ;;  %v498_v61 = vand.u32 2147483647, %v488_v28  ;;  %v501_v63 = vor.u32 1.1754944e-38, %v500_v60  ;;  %v3255_v19 = vor.u32 %v4053_v17, %v3254_v16  ;;  %v3240_v32 = vld [vmem:[%s6066_s1 + $0xb0] sm:$0xf0] }
  0xcb   : > { %v471_v35 = vsub.f32 1.0, %v470_v33  ;;  %v3267_v27 = vor.u32 %v4052_v25, %v3264_v26  ;;  %v3246_v33 = vld [vmem:[%s6066_s1 + $0xa8] sm:$0xf]  ;;  %v3208_v60 = vld [vmem:[%s6066_s1 + $0x70] sm:$0xf0]  ;;  %v766_v16 = vunpack.c.h.bf16 %v4956_v7  ;;  %v3195_v17 = vor.u32 %v4035_v11, %v3192_v15 }
  0xcc   : > { %v453_v38 = vmul.f32 %v4251_v30, %v452_v34  ;;  %vm499_vm11 = vcmp.eq.f32.partialorder %v498_v61, 8.507059e+37  ;;  %1035 = vmatpush.bf16.msra.mxu0 %v3255_v19  ;;  %v4050_v34 = vld [vmem:[%s6066_s1 + $0xb4] sm:$0xf0]  ;;  %v3214_v61 = vld [vmem:[%s6066_s1 + $0x68] sm:$0xf] }
  0xcd   : > { %v472_v40 = vmul.f32 %v4253_v31, %v471_v35  ;;  %1074 = vmatpush.bf16.msra.mxu3 %v3267_v27  ;;  %v3247_v37 = vor.u32 %v4050_v34, %v3246_v33  ;;  %v4038_v19 = vld [vmem:[%s6066_s1 + $0x54] sm:$0xf0]  ;;  %v4033_v25 = vld [vmem:[%s6066_s1 + $0x2c] sm:$0xf0]  ;;  %v4031_v26 = vld [vmem:[%s6066_s1 + $0x24] sm:$0xf] }
  0xce   : > { %v4255_v42 = vpop.eup %4254  ;;  %v454_v43 = vadd.f32 %v4251_v30, %v453_v38  ;;  %v3248_v38 = vld [vmem:[%s6066_s1 + $0xb8] sm:$0xf0]  ;;  %v3199_v21 = vor.u32 %v4038_v19, %v3198_v18 }
  0xcf   : > { %v4257_v44 = vpop.eup %4256  ;;  %v490_v45 = vmul.f32 %v4255_v42, %v488_v28  ;;  %v473_v47 = vadd.f32 %v4253_v31, %v472_v40  ;;  %vm495_vm8 = vweird.f32 %v4255_v42  ;;  %v3238_v28 = vld [vmem:[%s6066_s1 + $0xa0] sm:$0xf]  ;;  %v3251_v40 = vor.u32 %v4048_v36, %v3248_v38  ;;  %1062 = vmatpush.bf16.msra.mxu2 %v3247_v37  ;;  %v4032_v38 = vld [vmem:[%s6066_s1 + $0x2c] sm:$0xf] }
  0xd0   : > { %v458_v49 = vsel %vm457_vm4, %v4251_v30, %v454_v43  ;;  %vm496_vm10 = vmor %vm494_vm9, %vm495_vm8  ;;  %v4047_v30 = vld [vmem:[%s6066_s1 + $0xa4] sm:$0xf] }
  0xd1   : > { %v491_v51 = vsub.f32 1.0, %v490_v45  ;;  %v463_v52 = vsel %vm460_vm6, %v462_v46, %v458_v49  ;;  %v477_v53 = vsel %vm476_vm5, %v4253_v31, %v473_v47  ;;  %v3239_v31 = vor.u32 %v4049_v29, %v3238_v28  ;;  %v4043_v43 = vld [vmem:[%s6066_s1 + $0x84] sm:$0xf]  ;;  %1075 = vmatpush.bf16.msra.mxu3 %v3251_v40  ;;  %v3224_v45 = vld [vmem:[%s6066_s1 + $0x90] sm:$0xf0] }
  0xd2   : > { %v482_v54 = vsel %vm479_vm7, %v481_v48, %v477_v53  ;;  %v506_v55 = vmul.f32 %v4257_v44, %v463_v52  ;;  %v3243_v35 = vor.u32 %v4047_v30, %v3240_v32  ;;  %v3230_v46 = vld [vmem:[%s6066_s1 + $0x88] sm:$0xf]  ;;  %v4046_v47 = vld [vmem:[%s6066_s1 + $0x94] sm:$0xf0]  ;;  %v3227_v48 = vor.u32 %v4043_v43, %v3224_v45  ;;  %v3176_v30 = vld [vmem:[%s6066_s1 + $0x30] sm:$0xf0] }
  0xd3   : > { %v492_v56 = vmul.f32 %v4255_v42, %v491_v51  ;;  %v505_v57 = vmul.f32 %v504_v50, %v482_v54  ;;  %1036 = vmatpush.bf16.msra.mxu0 %v3239_v31  ;;  %v3231_v49 = vor.u32 %v4046_v47, %v3230_v46  ;;  %v4044_v50 = vld [vmem:[%s6066_s1 + $0x8c] sm:$0xf]  ;;  %v3232_v51 = vld [vmem:[%s6066_s1 + $0x98] sm:$0xf0]  ;;  %v763_v52 = vunpack.c.l.bf16 %v3150_v39  ;;  %v3182_v31 = vld [vmem:[%s6066_s1 + $0x28] sm:$0xf] }
  0xd4   : > { %1049 = vmatpush.bf16.msra.mxu1 %v3243_v35  ;;  %v764_v53 = vunpack.c.h.bf16 %v3150_v39  ;;  %v3235_v54 = vor.u32 %v4044_v50, %v3232_v51  ;;  %v3175_v29 = vor.u32 %v4033_v25, %v3174_v24  ;;  %v4034_v32 = vld [vmem:[%s6066_s1 + $0x34] sm:$0xf0]  ;;  %v3179_v37 = vor.u32 %v4031_v26, %v3176_v30  ;;  %v3184_v39 = vld [vmem:[%s6066_s1 + $0x38] sm:$0xf0]  ;;  %v4029_v43 = vld [vmem:[%s6066_s1 + $0xc] sm:$0xf0] }
  0xd5   : > { %v4830_v58 = vadd.f32 %v506_v55, %v505_v57  ;;  %v493_v59 = vadd.f32 %v4255_v42, %v492_v56  ;;  %1063 = vmatpush.bf16.msra.mxu2 %v3231_v49  ;;  %v3206_v55 = vld [vmem:[%s6066_s1 + $0x60] sm:$0xf]  ;;  %v4041_v56 = vld [vmem:[%s6066_s1 + $0x6c] sm:$0xf0]  ;;  %v4039_v57 = vld [vmem:[%s6066_s1 + $0x64] sm:$0xf]  ;;  %v3183_v36 = vor.u32 %v4034_v32, %v3182_v31  ;;  %v3187_v40 = vor.u32 %v4032_v38, %v3184_v39 }
  0xd6   : > { %1076 = vmatpush.bf16.msra.mxu3 %v3235_v54  ;;  %v4027_v46 = vld [vmem:[%s6066_s1 + $0x4] sm:$0xf]  ;;  %v3160_v47 = vld [vmem:[%s6066_s1 + $0x10] sm:$0xf0]  ;;  %v4089_v38 = vld [vmem:[%s6066_s1 + $0xec] sm:$0xf0] }
  0xd7   : > { %4258 = vtanh.f32 %v4830_v58  ;;  %v497_v62 = vsel %vm496_vm10, %v4255_v42, %v493_v59  ;;  %v4045_v42 = vld [vmem:[%s6066_s1 + $0x8c] sm:$0xf0]  ;;  %v3207_v59 = vor.u32 %v4041_v56, %v3206_v55  ;;  %v3163_v51 = vor.u32 %v4027_v46, %v3160_v47  ;;  %v4028_v55 = vld [vmem:[%s6066_s1 + $0xc] sm:$0xf]  ;;  %v3168_v56 = vld [vmem:[%s6066_s1 + $0x18] sm:$0xf0] }
  0xd8   : > { %v502_v1 = vsel %vm499_vm11, %v501_v63, %v497_v62  ;;  %v3223_v44 = vor.u32 %v4045_v42, %v3222_v41  ;;  %1050 = vmatpush.bf16.msra.mxu1 %v3227_v48  ;;  %v4042_v62 = vld [vmem:[%s6066_s1 + $0x74] sm:$0xf0]  ;;  %v3158_v42 = vld [vmem:[%s6066_s1] sm:$0xf]  ;;  %v3166_v48 = vld [vmem:[%s6066_s1 + $0x8] sm:$0xf] }
  0xd9   : > { %v3159_v45 = vor.u32 %v4029_v43, %v3158_v42  ;;  %v4087_v39 = vld [vmem:[%s6066_s1 + $0xe4] sm:$0xf]  ;;  %v3412_v42 = vld [vmem:[%s6066_s1 + $0xe8] sm:$0xf]  ;;  %v4090_v43 = vld [vmem:[%s6066_s1 + $0xf4] sm:$0xf0] }
  0xda   : > { %1037 = vmatpush.bf16.msra.mxu0 %v3223_v44  ;;  %v4088_v46 = vld [vmem:[%s6066_s1 + $0xec] sm:$0xf]  ;;  %v3414_v47 = vld [vmem:[%s6066_s1 + $0xf8] sm:$0xf0] }
  0xdd   : > { %v4259_v0 = vpop.eup %4258 }
  0xde   : > { %v509_v2 = vmul.f32 %v4259_v0, %v502_v1  ;;  %v3211_v1 = vor.u32 %v4039_v57, %v3208_v60  ;;  %1038 = vmatpush.bf16.msra.mxu0 %v3207_v59  ;;  %v765_v60 = vunpack.c.l.bf16 %v4956_v7 }
  0xe0   : > { %v512_v3 = vpack.c.bf16 %v509_v2, %v509_v2  ;;  %v3215_v2 = vor.u32 %v4042_v62, %v3214_v61  ;;  %1051 = vmatpush.bf16.msra.mxu1 %v3211_v1  ;;  %v3171_v61 = vor.u32 %v4028_v55, %v3168_v56  ;;  %v4086_v55 = vld [vmem:[%s6066_s1 + $0xd4] sm:$0xf0] }
  0xe2   : > { %513 = vst [vmem:[%s4438_s21] sm:$0xf] %v512_v3  ;;  %716 = vmatmul.bf16.vlgmr.msrb.gmra.mxu0 %v512_v3  ;;  %729 = vmatmul.bf16.vlgmr.msrb.gmra.mxu1 %v512_v3 }
  0xe3   : > { %742 = vmatmul.bf16.vlgmr.msrb.gmra.mxu2 %v512_v3  ;;  %755 = vmatmul.bf16.vlgmr.msrb.gmra.mxu3 %v512_v3  ;;  %v4040_v3 = vld [vmem:[%s6066_s1 + $0x6c] sm:$0xf] }
  0xe4   : > { %v3219_v8 = vor.u32 %v4040_v3, %v3216_v4  ;;  %1064 = vmatpush.bf16.msra.mxu2 %v3215_v2  ;;  %1039 = vmatpush.bf16.msra.mxu0 %v3191_v14 }
  0xe5   : > { %1052 = vmatpush.bf16.msra.mxu1 %v3195_v17 }
  0xe6   : > { %1077 = vmatpush.bf16.msra.mxu3 %v3219_v8 }
  0xe8   : > { %1065 = vmatpush.bf16.msra.mxu2 %v3199_v21  ;;  %1040 = vmatpush.bf16.msra.mxu0 %v3175_v29 }
  0xe9   : > { %1053 = vmatpush.bf16.msra.mxu1 %v3179_v37 }
  0xea   : > { %1078 = vmatpush.bf16.msra.mxu3 %v3203_v23 }
  0xec   : > { %1066 = vmatpush.bf16.msra.mxu2 %v3183_v36  ;;  %1041 = vmatpush.bf16.msra.mxu0 %v3159_v45  ;;  %v3413_v45 = vor.u32 %v4090_v43, %v3412_v42  ;;  %v3324_v42 = vld [vmem:[%s6066_s1 + $0x40] sm:$0xf]  ;;  %v4069_v43 = vld [vmem:[%s6066_s1 + $0x4c] sm:$0xf0] }
  0xed   : > { %1054 = vmatpush.bf16.msra.mxu1 %v3163_v51  ;;  %v4083_v51 = vld [vmem:[%s6066_s1 + $0xc4] sm:$0xf] }
  0xee   : > { %1079 = vmatpush.bf16.msra.mxu3 %v3187_v40 }
  0xf2   : > { %1080 = vmatpush.bf16.msra.mxu3 %v3171_v61 }
 0x15f   : > { %v717_v63 = vpop.f32.mrf.mxu0  ;;  %v730_v0 = vpop.f32.mrf.mxu1 }
 0x160   : > { %v767_v5 = vadd.f32 %v763_v52, %v717_v63  ;;  %v768_v6 = vadd.f32 %v764_v53, %v730_v0  ;;  %v4030_v52 = vld [vmem:[%s6066_s1 + $0x14] sm:$0xf0] }
 0x161   : > { %v3167_v54 = vor.u32 %v4030_v52, %v3166_v48  ;;  %v3417_v48 = vor.u32 %v4088_v46, %v3414_v47  ;;  %v3325_v47 = vor.u32 %v4069_v43, %v3324_v42 }
 0x162   : > { %v3152_v12 = vmul.f32 -1.442695, %v767_v5  ;;  %v3153_v13 = vmul.f32 -1.442695, %v768_v6 }
 0x163   : > { %1067 = vmatpush.bf16.msra.mxu2 %v3167_v54  ;;  %1399 = vmatpush.bf16.msrb.mxu3 %v3417_v48  ;;  %v3396_v54 = vld [vmem:[%s6066_s1 + $0xc8] sm:$0xf]  ;;  %v3326_v48 = vld [vmem:[%s6066_s1 + $0x50] sm:$0xf0] }
 0x164   : > { %4260 = vpow2.f32 %v3152_v12 }
 0x165   : > { %4262 = vpow2.f32 %v3153_v13 }
 0x166   : > { %v743_v27 = vpop.f32.mrf.mxu2  ;;  %v756_v28 = vpop.f32.mrf.mxu3 }
 0x167   : > { %v770_v33 = vadd.f32 %v766_v16, %v756_v28  ;;  %v719_v34 = vpop.f32.mrf.mxu0  ;;  %v732_v35 = vpop.f32.mrf.mxu1  ;;  %v769_v1 = vadd.f32 %v765_v60, %v743_v27  ;;  %1386 = vmatpush.bf16.msrb.mxu2 %v3413_v45  ;;  %v3398_v60 = vld [vmem:[%s6066_s1 + $0xd8] sm:$0xf0] }
 0x169   : > { %v3154_v41 = vmul.f32 -1.442695, %v770_v33 }
 0x16a   : > { %v4261_v44 = vpop.eup %4260 }
 0x16b   : > { %v4263_v49 = vpop.eup %4262  ;;  %v774_v50 = vadd.f32 1.0, %v4261_v44  ;;  %4264 = vpow2.f32 %v3154_v41  ;;  %v3406_v41 = vld [vmem:[%s6066_s1 + $0xf0] sm:$0xf0] }
 0x16c   : > { %v793_v53 = vadd.f32 1.0, %v4263_v49  ;;  %v3409_v44 = vor.u32 %v4087_v39, %v3406_v41  ;;  %v3388_v49 = vld [vmem:[%s6066_s1 + $0xc0] sm:$0xf] }
 0x16d   : > { %4266 = vrcp.f32 %v774_v50  ;;  %v786_v8 = vand.u32 2147483648, %v774_v50  ;;  %v784_v11 = vand.u32 2147483647, %v774_v50  ;;  %vm780_vm14 = vweird.f32 %v774_v50 }
 0x16e   : > { %4268 = vrcp.f32 %v793_v53  ;;  %v745_v57 = vpop.f32.mrf.mxu2  ;;  %v758_v59 = vpop.f32.mrf.mxu3  ;;  %v805_v9 = vand.u32 2147483648, %v793_v53  ;;  %v803_v7 = vand.u32 2147483647, %v793_v53  ;;  %vm799_vm15 = vweird.f32 %v793_v53  ;;  %1373 = vmatpush.bf16.msrb.mxu1 %v3409_v44  ;;  %v4067_v44 = vld [vmem:[%s6066_s1 + $0x44] sm:$0xf] }
 0x16f   : > { %v787_v15 = vor.u32 1.1754944e-38, %v786_v8  ;;  %vm785_vm2 = vcmp.eq.f32.partialorder %v784_v11, 8.507059e+37  ;;  %v3397_v57 = vor.u32 %v4086_v55, %v3396_v54  ;;  %v4084_v59 = vld [vmem:[%s6066_s1 + $0xcc] sm:$0xf]  ;;  %v3334_v55 = vld [vmem:[%s6066_s1 + $0x58] sm:$0xf0] }
 0x170   : > { %v806_v18 = vor.u32 1.1754944e-38, %v805_v9  ;;  %vm804_vm3 = vcmp.eq.f32.partialorder %v803_v7, 8.507059e+37  ;;  %v3401_v61 = vor.u32 %v4084_v59, %v3398_v60  ;;  %v4080_v8 = vld [vmem:[%s6066_s1 + $0xac] sm:$0xf]  ;;  %v3382_v9 = vld [vmem:[%s6066_s1 + $0xb8] sm:$0xf0] }
 0x171   : > { %v4265_v62 = vpop.eup %4264  ;;  %1387 = vmatpush.bf16.msrb.mxu2 %v3397_v57  ;;  %v3385_v11 = vor.u32 %v4080_v8, %v3382_v9  ;;  %v4077_v7 = vld [vmem:[%s6066_s1 + $0x8c] sm:$0xf0]  ;;  %v3308_v57 = vld [vmem:[%s6066_s1 + $0x20] sm:$0xf]  ;;  %v4063_v60 = vld [vmem:[%s6066_s1 + $0x24] sm:$0xf] }
 0x172   : > { %v813_v63 = vadd.f32 1.0, %v4265_v62  ;;  %v3372_v62 = vld [vmem:[%s6066_s1 + $0xa0] sm:$0xf]  ;;  %1400 = vmatpush.bf16.msrb.mxu3 %v3401_v61  ;;  %v4065_v59 = vld [vmem:[%s6066_s1 + $0x2c] sm:$0xf0] }
 0x173   : > { %v4267_v0 = vpop.eup %4266  ;;  %v4064_v9 = vld [vmem:[%s6066_s1 + $0x2c] sm:$0xf] }
 0x174   : > { %v4269_v2 = vpop.eup %4268  ;;  %v776_v3 = vmul.f32 %v4267_v0, %v774_v50  ;;  %4270 = vrcp.f32 %v813_v63  ;;  %vm781_vm12 = vweird.f32 %v4267_v0  ;;  %v825_v30 = vand.u32 2147483648, %v813_v63  ;;  %v4085_v50 = vld [vmem:[%s6066_s1 + $0xcc] sm:$0xf0] }
 0x175   : > { %v795_v4 = vmul.f32 %v4269_v2, %v793_v53  ;;  %4272 = vtanh.f32 %v769_v1  ;;  %vm800_vm13 = vweird.f32 %v4269_v2  ;;  %vm782_vm0 = vmor %vm780_vm14, %vm781_vm12  ;;  %vm819_vm5 = vweird.f32 %v813_v63  ;;  %v3390_v53 = vld [vmem:[%s6066_s1 + $0xd0] sm:$0xf0] }
 0x176   : > { %v777_v5 = vsub.f32 1.0, %v776_v3  ;;  %vm801_vm1 = vmor %vm799_vm15, %vm800_vm13  ;;  %v823_v31 = vand.u32 2147483647, %v813_v63  ;;  %v826_v33 = vor.u32 1.1754944e-38, %v825_v30  ;;  %v3389_v52 = vor.u32 %v4085_v50, %v3388_v49  ;;  %v3380_v3 = vld [vmem:[%s6066_s1 + $0xa8] sm:$0xf]  ;;  %1401 = vmatpush.bf16.msrb.mxu3 %v3385_v11 }
 0x177   : > { %v796_v6 = vsub.f32 1.0, %v795_v4  ;;  %v3393_v56 = vor.u32 %v4083_v51, %v3390_v53  ;;  %v4082_v4 = vld [vmem:[%s6066_s1 + $0xb4] sm:$0xf0]  ;;  %v3342_v30 = vld [vmem:[%s6066_s1 + $0x70] sm:$0xf0]  ;;  %v3329_v50 = vor.u32 %v4067_v44, %v3326_v48 }
 0x178   : > { %v778_v10 = vmul.f32 %v4267_v0, %v777_v5  ;;  %vm824_vm7 = vcmp.eq.f32.partialorder %v823_v31, 8.507059e+37  ;;  %v3348_v31 = vld [vmem:[%s6066_s1 + $0x68] sm:$0xf]  ;;  %v4068_v53 = vld [vmem:[%s6066_s1 + $0x4c] sm:$0xf] }
 0x179   : > { %v797_v12 = vmul.f32 %v4269_v2, %v796_v6  ;;  %1374 = vmatpush.bf16.msrb.mxu1 %v3393_v56  ;;  %v3381_v6 = vor.u32 %v4082_v4, %v3380_v3  ;;  %v3332_v51 = vld [vmem:[%s6066_s1 + $0x48] sm:$0xf]  ;;  %v3337_v56 = vor.u32 %v4068_v53, %v3334_v55 }
 0x17a   : > { %v4271_v13 = vpop.eup %4270  ;;  %v779_v14 = vadd.f32 %v4267_v0, %v778_v10  ;;  %v3284_v10 = vld [vmem:[%s4433_s18 + $0x20] sm:$0xff] }
 0x17b   : > { %v798_v16 = vadd.f32 %v4269_v2, %v797_v12  ;;  %v815_v17 = vmul.f32 %v4271_v13, %v813_v63  ;;  %v4273_v20 = vpop.eup %4272  ;;  %vm820_vm4 = vweird.f32 %v4271_v13  ;;  %v4081_v63 = vld [vmem:[%s6066_s1 + $0xac] sm:$0xf0]  ;;  %1388 = vmatpush.bf16.msrb.mxu2 %v3381_v6  ;;  %v3356_v12 = vld [vmem:[%s6066_s1 + $0x80] sm:$0xf] }
 0x17c   : > { %v783_v19 = vsel %vm782_vm0, %v4267_v0, %v779_v14  ;;  %vm821_vm6 = vmor %vm819_vm5, %vm820_vm4  ;;  %v4079_v0 = vld [vmem:[%s6066_s1 + $0xa4] sm:$0xf]  ;;  %v3373_v1 = vor.u32 %v4081_v63, %v3372_v62  ;;  %v3357_v14 = vor.u32 %v4077_v7, %v3356_v12  ;;  %v3309_v63 = vor.u32 %v4065_v59, %v3308_v57  ;;  %v3292_v7 = vld [vmem:[%s6066_s1] sm:$0xf] }
 0x17d   : > { %v788_v21 = vsel %vm785_vm2, %v787_v15, %v783_v19  ;;  %v802_v22 = vsel %vm801_vm1, %v4269_v2, %v798_v16  ;;  %v816_v23 = vsub.f32 1.0, %v815_v17  ;;  %v3374_v2 = vld [vmem:[%s6066_s1 + $0xb0] sm:$0xf0]  ;;  %v3364_v16 = vld [vmem:[%s6066_s1 + $0x88] sm:$0xf] }
 0x17e   : > { %v807_v24 = vsel %vm804_vm3, %v806_v18, %v802_v22  ;;  %v831_v25 = vmul.f32 %v4273_v20, %v788_v21  ;;  %v3377_v5 = vor.u32 %v4079_v0, %v3374_v2  ;;  %v3358_v15 = vld [vmem:[%s6066_s1 + $0x90] sm:$0xf0]  ;;  %v4078_v17 = vld [vmem:[%s6066_s1 + $0x94] sm:$0xf0]  ;;  %v4076_v20 = vld [vmem:[%s6066_s1 + $0x8c] sm:$0xf]  ;;  %v1089_v22 = vunpack.c.l.bf16 %v3284_v10 }
 0x17f   : > { %v830_v26 = vmul.f32 %v807_v24, %v4830_v58  ;;  %v817_v27 = vmul.f32 %v4271_v13, %v816_v23  ;;  %v3404_v58 = vld [vmem:[%s6066_s1 + $0xe0] sm:$0xf]  ;;  %v3365_v19 = vor.u32 %v4078_v17, %v3364_v16  ;;  %v3366_v21 = vld [vmem:[%s6066_s1 + $0x98] sm:$0xf0]  ;;  %v1090_v23 = vunpack.c.h.bf16 %v3284_v10  ;;  %v3310_v0 = vld [vmem:[%s6066_s1 + $0x30] sm:$0xf0] }
 0x180   : > { %v3405_v40 = vor.u32 %v4089_v38, %v3404_v58  ;;  %1375 = vmatpush.bf16.msrb.mxu1 %v3377_v5  ;;  %v3369_v24 = vor.u32 %v4076_v20, %v3366_v21  ;;  %v3350_v58 = vld [vmem:[%s6066_s1 + $0x78] sm:$0xf0]  ;;  %v4066_v2 = vld [vmem:[%s6066_s1 + $0x34] sm:$0xf0]  ;;  %v3313_v6 = vor.u32 %v4063_v60, %v3310_v0  ;;  %v4059_v16 = vld [vmem:[%s6066_s1 + $0x4] sm:$0xf] }
 0x181   : > { %v5033_v28 = vadd.f32 %v831_v25, %v830_v26  ;;  %v818_v29 = vadd.f32 %v4271_v13, %v817_v27  ;;  %1389 = vmatpush.bf16.msrb.mxu2 %v3365_v19  ;;  %v3340_v25 = vld [vmem:[%s6066_s1 + $0x60] sm:$0xf]  ;;  %v4073_v26 = vld [vmem:[%s6066_s1 + $0x6c] sm:$0xf0]  ;;  %v4071_v27 = vld [vmem:[%s6066_s1 + $0x64] sm:$0xf] }
 0x182   : > { %1360 = vmatpush.bf16.msrb.mxu0 %v3405_v40  ;;  %1402 = vmatpush.bf16.msrb.mxu3 %v3369_v24  ;;  %v5159_v40 = vld [vmem:[%s4433_s18 + $0x28] sm:$0xff]  ;;  %v3318_v10 = vld [vmem:[%s6066_s1 + $0x38] sm:$0xf0]  ;;  %v3294_v17 = vld [vmem:[%s6066_s1 + $0x10] sm:$0xf0] }
 0x183   : > { %4274 = vtanh.f32 %v5033_v28  ;;  %v822_v32 = vsel %vm821_vm6, %v4271_v13, %v818_v29  ;;  %v4075_v13 = vld [vmem:[%s6066_s1 + $0x84] sm:$0xf]  ;;  %v3341_v29 = vor.u32 %v4073_v26, %v3340_v25  ;;  %v1092_v49 = vunpack.c.h.bf16 %v5159_v40  ;;  %v4060_v25 = vld [vmem:[%s6066_s1 + $0xc] sm:$0xf]  ;;  %v3302_v26 = vld [vmem:[%s6066_s1 + $0x18] sm:$0xf0] }
 0x184   : > { %v827_v35 = vsel %vm824_vm7, %v826_v33, %v822_v32  ;;  %v3361_v18 = vor.u32 %v4075_v13, %v3358_v15  ;;  %v4074_v32 = vld [vmem:[%s6066_s1 + $0x74] sm:$0xf0]  ;;  %v3321_v11 = vor.u32 %v4064_v9, %v3318_v10  ;;  %v4061_v13 = vld [vmem:[%s6066_s1 + $0xc] sm:$0xf0]  ;;  %v3297_v21 = vor.u32 %v4059_v16, %v3294_v17  ;;  %v4119_v10 = vld [vmem:[%s6066_s1 + $0xe4] sm:$0xf] }
 0x185   : > { %v3293_v15 = vor.u32 %v4061_v13, %v3292_v7  ;;  %v4121_v9 = vld [vmem:[%s6066_s1 + $0xec] sm:$0xf0]  ;;  %v3546_v7 = vld [vmem:[%s6066_s1 + $0xe8] sm:$0xf]  ;;  %v4122_v13 = vld [vmem:[%s6066_s1 + $0xf4] sm:$0xf0] }
 0x186   : > { %1361 = vmatpush.bf16.msrb.mxu0 %v3389_v52  ;;  %1376 = vmatpush.bf16.msrb.mxu1 %v3361_v18  ;;  %v4070_v52 = vld [vmem:[%s6066_s1 + $0x54] sm:$0xf0]  ;;  %v3300_v18 = vld [vmem:[%s6066_s1 + $0x8] sm:$0xf]  ;;  %v4120_v16 = vld [vmem:[%s6066_s1 + $0xec] sm:$0xf] }
 0x187   : > { %v3333_v54 = vor.u32 %v4070_v52, %v3332_v51  ;;  %v3548_v17 = vld [vmem:[%s6066_s1 + $0xf8] sm:$0xf0] }
 0x189   : > { %v4275_v34 = vpop.eup %4274 }
 0x18a   : > { %v834_v37 = vmul.f32 %v4275_v34, %v827_v35  ;;  %1362 = vmatpush.bf16.msrb.mxu0 %v3373_v1  ;;  %v3345_v35 = vor.u32 %v4071_v27, %v3342_v30  ;;  %v3316_v1 = vld [vmem:[%s6066_s1 + $0x28] sm:$0xf]  ;;  %v1091_v30 = vunpack.c.l.bf16 %v5159_v40 }
 0x18b   : > { %v3317_v8 = vor.u32 %v4066_v2, %v3316_v1 }
 0x18c   : > { %v837_v36 = vpack.c.bf16 %v834_v37, %v834_v37  ;;  %v3349_v37 = vor.u32 %v4074_v32, %v3348_v31  ;;  %1377 = vmatpush.bf16.msrb.mxu1 %v3345_v35  ;;  %v3305_v31 = vor.u32 %v4060_v25, %v3302_v26  ;;  %v4118_v25 = vld [vmem:[%s6066_s1 + $0xd4] sm:$0xf0] }
 0x18e   : > { %3155 = vst [vmem:[%s4438_s21 + $0x4] sm:$0xf] %v837_v36  ;;  %1042 = vmatmul.bf16.vlgmr.msra.gmra.mxu0 %v837_v36  ;;  %1055 = vmatmul.bf16.vlgmr.msra.gmra.mxu1 %v837_v36 }
 0x18f   : > { %1068 = vmatmul.bf16.vlgmr.msra.gmra.mxu2 %v837_v36  ;;  %1081 = vmatmul.bf16.vlgmr.msra.gmra.mxu3 %v837_v36  ;;  %v4072_v36 = vld [vmem:[%s6066_s1 + $0x6c] sm:$0xf] }
 0x190   : > { %1363 = vmatpush.bf16.msrb.mxu0 %v3357_v14  ;;  %v3353_v41 = vor.u32 %v4072_v36, %v3350_v58  ;;  %1390 = vmatpush.bf16.msrb.mxu2 %v3349_v37 }
 0x191   : > { %1378 = vmatpush.bf16.msrb.mxu1 %v3329_v50 }
 0x192   : > { %1403 = vmatpush.bf16.msrb.mxu3 %v3353_v41 }
 0x194   : > { %1364 = vmatpush.bf16.msrb.mxu0 %v3341_v29  ;;  %1391 = vmatpush.bf16.msrb.mxu2 %v3333_v54 }
 0x195   : > { %1379 = vmatpush.bf16.msrb.mxu1 %v3313_v6 }
 0x196   : > { %1404 = vmatpush.bf16.msrb.mxu3 %v3337_v56 }
 0x198   : > { %1365 = vmatpush.bf16.msrb.mxu0 %v3325_v47  ;;  %1392 = vmatpush.bf16.msrb.mxu2 %v3317_v8 }
 0x199   : > { %1380 = vmatpush.bf16.msrb.mxu1 %v3297_v21  ;;  %v4115_v21 = vld [vmem:[%s6066_s1 + $0xc4] sm:$0xf] }
 0x19a   : > { %1405 = vmatpush.bf16.msrb.mxu3 %v3321_v11 }
 0x19c   : > { %1366 = vmatpush.bf16.msrb.mxu0 %v3309_v63 }
 0x19e   : > { %1406 = vmatpush.bf16.msrb.mxu3 %v3305_v31 }
 0x1a0   : > { %1367 = vmatpush.bf16.msrb.mxu0 %v3293_v15  ;;  %v3547_v15 = vor.u32 %v4122_v13, %v3546_v7  ;;  %v3458_v7 = vld [vmem:[%s6066_s1 + $0x40] sm:$0xf]  ;;  %v4101_v13 = vld [vmem:[%s6066_s1 + $0x4c] sm:$0xf0] }
 0x20b   : > { %v1043_v33 = vpop.f32.mrf.mxu0  ;;  %v1056_v34 = vpop.f32.mrf.mxu1 }
 0x20c   : > { %v1093_v38 = vadd.f32 %v1089_v22, %v1043_v33  ;;  %v1094_v39 = vadd.f32 %v1090_v23, %v1056_v34  ;;  %v4062_v22 = vld [vmem:[%s6066_s1 + $0x14] sm:$0xf0] }
 0x20d   : > { %v3301_v24 = vor.u32 %v4062_v22, %v3300_v18  ;;  %v3551_v18 = vor.u32 %v4120_v16, %v3548_v17  ;;  %v3459_v17 = vor.u32 %v4101_v13, %v3458_v7 }
 0x20e   : > { %v3286_v45 = vmul.f32 -1.442695, %v1093_v38  ;;  %v3287_v46 = vmul.f32 -1.442695, %v1094_v39 }
 0x20f   : > { %1393 = vmatpush.bf16.msrb.mxu2 %v3301_v24  ;;  %1725 = vmatpush.bf16.msra.mxu3 %v3551_v18  ;;  %v3530_v24 = vld [vmem:[%s6066_s1 + $0xc8] sm:$0xf]  ;;  %v3460_v18 = vld [vmem:[%s6066_s1 + $0x50] sm:$0xf0] }
 0x210   : > { %4276 = vpow2.f32 %v3286_v45 }
 0x211   : > { %4278 = vpow2.f32 %v3287_v46 }
 0x212   : > { %v1069_v61 = vpop.f32.mrf.mxu2  ;;  %v1082_v62 = vpop.f32.mrf.mxu3 }
 0x213   : > { %v1096_v3 = vadd.f32 %v1092_v49, %v1082_v62  ;;  %v1045_v4 = vpop.f32.mrf.mxu0  ;;  %v1058_v5 = vpop.f32.mrf.mxu1  ;;  %v1095_v35 = vadd.f32 %v1091_v30, %v1069_v61  ;;  %1712 = vmatpush.bf16.msra.mxu2 %v3547_v15  ;;  %v3532_v30 = vld [vmem:[%s6066_s1 + $0xd8] sm:$0xf0] }
 0x215   : > { %v3288_v12 = vmul.f32 -1.442695, %v1096_v3 }
 0x216   : > { %v4277_v14 = vpop.eup %4276 }
 0x217   : > { %v4279_v19 = vpop.eup %4278  ;;  %v1100_v20 = vadd.f32 1.0, %v4277_v14  ;;  %4280 = vpow2.f32 %v3288_v12  ;;  %v3540_v12 = vld [vmem:[%s6066_s1 + $0xf0] sm:$0xf0] }
 0x218   : > { %v1119_v23 = vadd.f32 1.0, %v4279_v19  ;;  %v3543_v14 = vor.u32 %v4119_v10, %v3540_v12  ;;  %v3522_v19 = vld [vmem:[%s6066_s1 + $0xc0] sm:$0xf] }
 0x219   : > { %4282 = vrcp.f32 %v1100_v20  ;;  %v1112_v41 = vand.u32 2147483648, %v1100_v20  ;;  %v1110_v44 = vand.u32 2147483647, %v1100_v20  ;;  %vm1106_vm10 = vweird.f32 %v1100_v20 }
 0x21a   : > { %4284 = vrcp.f32 %v1119_v23  ;;  %v1071_v27 = vpop.f32.mrf.mxu2  ;;  %v1084_v29 = vpop.f32.mrf.mxu3  ;;  %v1131_v42 = vand.u32 2147483648, %v1119_v23  ;;  %v1129_v40 = vand.u32 2147483647, %v1119_v23  ;;  %vm1125_vm11 = vweird.f32 %v1119_v23  ;;  %1699 = vmatpush.bf16.msra.mxu1 %v3543_v14  ;;  %v4099_v14 = vld [vmem:[%s6066_s1 + $0x44] sm:$0xf] }
 0x21b   : > { %v1113_v48 = vor.u32 1.1754944e-38, %v1112_v41  ;;  %vm1111_vm14 = vcmp.eq.f32.partialorder %v1110_v44, 8.507059e+37  ;;  %v3531_v27 = vor.u32 %v4118_v25, %v3530_v24  ;;  %v4116_v29 = vld [vmem:[%s6066_s1 + $0xcc] sm:$0xf]  ;;  %v3468_v25 = vld [vmem:[%s6066_s1 + $0x58] sm:$0xf0] }
 0x21c   : > { %v1132_v51 = vor.u32 1.1754944e-38, %v1131_v42  ;;  %vm1130_vm15 = vcmp.eq.f32.partialorder %v1129_v40, 8.507059e+37  ;;  %v3535_v31 = vor.u32 %v4116_v29, %v3532_v30  ;;  %v4112_v41 = vld [vmem:[%s6066_s1 + $0xac] sm:$0xf]  ;;  %v3516_v42 = vld [vmem:[%s6066_s1 + $0xb8] sm:$0xf0] }
 0x21d   : > { %v4281_v32 = vpop.eup %4280  ;;  %1713 = vmatpush.bf16.msra.mxu2 %v3531_v27  ;;  %v3519_v44 = vor.u32 %v4112_v41, %v3516_v42  ;;  %v4109_v40 = vld [vmem:[%s6066_s1 + $0x8c] sm:$0xf0]  ;;  %v3442_v27 = vld [vmem:[%s6066_s1 + $0x20] sm:$0xf]  ;;  %v4095_v30 = vld [vmem:[%s6066_s1 + $0x24] sm:$0xf] }
 0x21e   : > { %v1139_v33 = vadd.f32 1.0, %v4281_v32  ;;  %v3506_v32 = vld [vmem:[%s6066_s1 + $0xa0] sm:$0xf]  ;;  %1726 = vmatpush.bf16.msra.mxu3 %v3535_v31  ;;  %v4097_v29 = vld [vmem:[%s6066_s1 + $0x2c] sm:$0xf0] }
 0x21f   : > { %v4283_v34 = vpop.eup %4282  ;;  %v4096_v42 = vld [vmem:[%s6066_s1 + $0x2c] sm:$0xf] }
 0x220   : > { %v4285_v37 = vpop.eup %4284  ;;  %v1102_v36 = vmul.f32 %v4283_v34, %v1100_v20  ;;  %4286 = vrcp.f32 %v1139_v33  ;;  %vm1107_vm8 = vweird.f32 %v4283_v34  ;;  %v1151_v0 = vand.u32 2147483648, %v1139_v33  ;;  %v4117_v20 = vld [vmem:[%s6066_s1 + $0xcc] sm:$0xf0] }
 0x221   : > { %v1121_v58 = vmul.f32 %v4285_v37, %v1119_v23  ;;  %4288 = vtanh.f32 %v1095_v35  ;;  %vm1126_vm9 = vweird.f32 %v4285_v37  ;;  %vm1108_vm12 = vmor %vm1106_vm10, %vm1107_vm8  ;;  %vm1145_vm1 = vweird.f32 %v1139_v33  ;;  %v3524_v23 = vld [vmem:[%s6066_s1 + $0xd0] sm:$0xf0] }
 0x222   : > { %v1103_v38 = vsub.f32 1.0, %v1102_v36  ;;  %vm1127_vm13 = vmor %vm1125_vm11, %vm1126_vm9  ;;  %v1149_v1 = vand.u32 2147483647, %v1139_v33  ;;  %v1152_v3 = vor.u32 1.1754944e-38, %v1151_v0  ;;  %v3523_v22 = vor.u32 %v4117_v20, %v3522_v19  ;;  %v3514_v36 = vld [vmem:[%s6066_s1 + $0xa8] sm:$0xf]  ;;  %1727 = vmatpush.bf16.msra.mxu3 %v3519_v44 }
 0x223   : > { %v1122_v39 = vsub.f32 1.0, %v1121_v58  ;;  %v3527_v26 = vor.u32 %v4115_v21, %v3524_v23  ;;  %v4114_v58 = vld [vmem:[%s6066_s1 + $0xb4] sm:$0xf0]  ;;  %v3476_v0 = vld [vmem:[%s6066_s1 + $0x70] sm:$0xf0]  ;;  %v3463_v20 = vor.u32 %v4099_v14, %v3460_v18 }
 0x224   : > { %v1104_v43 = vmul.f32 %v4283_v34, %v1103_v38  ;;  %vm1150_vm3 = vcmp.eq.f32.partialorder %v1149_v1, 8.507059e+37  ;;  %v3482_v1 = vld [vmem:[%s6066_s1 + $0x68] sm:$0xf]  ;;  %v4100_v23 = vld [vmem:[%s6066_s1 + $0x4c] sm:$0xf] }
 0x225   : > { %v1123_v45 = vmul.f32 %v4285_v37, %v1122_v39  ;;  %1700 = vmatpush.bf16.msra.mxu1 %v3527_v26  ;;  %v3515_v39 = vor.u32 %v4114_v58, %v3514_v36  ;;  %v3466_v21 = vld [vmem:[%s6066_s1 + $0x48] sm:$0xf]  ;;  %v3471_v26 = vor.u32 %v4100_v23, %v3468_v25 }
 0x226   : > { %v4287_v46 = vpop.eup %4286  ;;  %v1105_v47 = vadd.f32 %v4283_v34, %v1104_v43  ;;  %v3418_v43 = vld [vmem:[%s4433_s18 + $0x30] sm:$0xff] }
 0x227   : > { %v1124_v49 = vadd.f32 %v4285_v37, %v1123_v45  ;;  %v1141_v50 = vmul.f32 %v4287_v46, %v1139_v33  ;;  %v4289_v53 = vpop.eup %4288  ;;  %vm1146_vm0 = vweird.f32 %v4287_v46  ;;  %v4113_v33 = vld [vmem:[%s6066_s1 + $0xac] sm:$0xf0]  ;;  %1714 = vmatpush.bf16.msra.mxu2 %v3515_v39  ;;  %v3490_v45 = vld [vmem:[%s6066_s1 + $0x80] sm:$0xf] }
 0x228   : > { %v1109_v52 = vsel %vm1108_vm12, %v4283_v34, %v1105_v47  ;;  %vm1147_vm2 = vmor %vm1145_vm1, %vm1146_vm0  ;;  %v4111_v34 = vld [vmem:[%s6066_s1 + $0xa4] sm:$0xf]  ;;  %v3507_v35 = vor.u32 %v4113_v33, %v3506_v32  ;;  %v3491_v47 = vor.u32 %v4109_v40, %v3490_v45  ;;  %v3443_v33 = vor.u32 %v4097_v29, %v3442_v27  ;;  %v3426_v40 = vld [vmem:[%s6066_s1] sm:$0xf] }
 0x229   : > { %v1114_v54 = vsel %vm1111_vm14, %v1113_v48, %v1109_v52  ;;  %v1128_v55 = vsel %vm1127_vm13, %v4285_v37, %v1124_v49  ;;  %v1142_v56 = vsub.f32 1.0, %v1141_v50  ;;  %v3508_v37 = vld [vmem:[%s6066_s1 + $0xb0] sm:$0xf0]  ;;  %v3498_v49 = vld [vmem:[%s6066_s1 + $0x88] sm:$0xf] }
 0x22a   : > { %v1133_v57 = vsel %vm1130_vm15, %v1132_v51, %v1128_v55  ;;  %v1157_v59 = vmul.f32 %v4289_v53, %v1114_v54  ;;  %v3511_v38 = vor.u32 %v4111_v34, %v3508_v37  ;;  %v3492_v48 = vld [vmem:[%s6066_s1 + $0x90] sm:$0xf0]  ;;  %v4110_v50 = vld [vmem:[%s6066_s1 + $0x94] sm:$0xf0]  ;;  %v4108_v53 = vld [vmem:[%s6066_s1 + $0x8c] sm:$0xf]  ;;  %v1415_v55 = vunpack.c.l.bf16 %v3418_v43 }
 0x22b   : > { %v1156_v60 = vmul.f32 %v1133_v57, %v5033_v28  ;;  %v1143_v61 = vmul.f32 %v4287_v46, %v1142_v56  ;;  %v3538_v28 = vld [vmem:[%s6066_s1 + $0xe0] sm:$0xf]  ;;  %v3499_v52 = vor.u32 %v4110_v50, %v3498_v49  ;;  %v3500_v54 = vld [vmem:[%s6066_s1 + $0x98] sm:$0xf0]  ;;  %v1416_v56 = vunpack.c.h.bf16 %v3418_v43  ;;  %v3444_v34 = vld [vmem:[%s6066_s1 + $0x30] sm:$0xf0] }
 0x22c   : > { %v3539_v11 = vor.u32 %v4121_v9, %v3538_v28  ;;  %1701 = vmatpush.bf16.msra.mxu1 %v3511_v38  ;;  %v3503_v57 = vor.u32 %v4108_v53, %v3500_v54  ;;  %v3484_v28 = vld [vmem:[%s6066_s1 + $0x78] sm:$0xf0]  ;;  %v4098_v37 = vld [vmem:[%s6066_s1 + $0x34] sm:$0xf0]  ;;  %v3447_v39 = vor.u32 %v4095_v30, %v3444_v34  ;;  %v4091_v49 = vld [vmem:[%s6066_s1 + $0x4] sm:$0xf] }
 0x22d   : > { %v5236_v62 = vadd.f32 %v1157_v59, %v1156_v60  ;;  %v1144_v63 = vadd.f32 %v4287_v46, %v1143_v61  ;;  %1715 = vmatpush.bf16.msra.mxu2 %v3499_v52  ;;  %v3474_v59 = vld [vmem:[%s6066_s1 + $0x60] sm:$0xf]  ;;  %v4105_v60 = vld [vmem:[%s6066_s1 + $0x6c] sm:$0xf0]  ;;  %v4103_v61 = vld [vmem:[%s6066_s1 + $0x64] sm:$0xf] }
 0x22e   : > { %1686 = vmatpush.bf16.msra.mxu0 %v3539_v11  ;;  %1728 = vmatpush.bf16.msra.mxu3 %v3503_v57  ;;  %v5362_v11 = vld [vmem:[%s4433_s18 + $0x38] sm:$0xff]  ;;  %v3428_v50 = vld [vmem:[%s6066_s1 + $0x10] sm:$0xf0] }
 0x22f   : > { %4290 = vtanh.f32 %v5236_v62  ;;  %v1148_v2 = vsel %vm1147_vm2, %v4287_v46, %v1144_v63  ;;  %v4107_v46 = vld [vmem:[%s6066_s1 + $0x84] sm:$0xf]  ;;  %v3475_v63 = vor.u32 %v4105_v60, %v3474_v59  ;;  %v1418_v19 = vunpack.c.h.bf16 %v5362_v11  ;;  %v3452_v43 = vld [vmem:[%s6066_s1 + $0x38] sm:$0xf0]  ;;  %v4092_v59 = vld [vmem:[%s6066_s1 + $0xc] sm:$0xf] }
 0x230   : > { %v1153_v5 = vsel %vm1150_vm3, %v1152_v3, %v1148_v2  ;;  %v3495_v51 = vor.u32 %v4107_v46, %v3492_v48  ;;  %v4106_v2 = vld [vmem:[%s6066_s1 + $0x74] sm:$0xf0]  ;;  %v3455_v44 = vor.u32 %v4096_v42, %v3452_v43  ;;  %v4093_v46 = vld [vmem:[%s6066_s1 + $0xc] sm:$0xf0]  ;;  %v3431_v54 = vor.u32 %v4091_v49, %v3428_v50  ;;  %v3436_v60 = vld [vmem:[%s6066_s1 + $0x18] sm:$0xf0] }
 0x231   : > { %v3427_v48 = vor.u32 %v4093_v46, %v3426_v40  ;;  %v4153_v42 = vld [vmem:[%s6066_s1 + $0xec] sm:$0xf0]  ;;  %v4151_v43 = vld [vmem:[%s6066_s1 + $0xe4] sm:$0xf]  ;;  %v3680_v40 = vld [vmem:[%s6066_s1 + $0xe8] sm:$0xf] }
 0x232   : > { %1687 = vmatpush.bf16.msra.mxu0 %v3523_v22  ;;  %1702 = vmatpush.bf16.msra.mxu1 %v3495_v51  ;;  %v4102_v22 = vld [vmem:[%s6066_s1 + $0x54] sm:$0xf0]  ;;  %v3434_v51 = vld [vmem:[%s6066_s1 + $0x8] sm:$0xf]  ;;  %v4152_v49 = vld [vmem:[%s6066_s1 + $0xec] sm:$0xf] }
 0x233   : > { %v3467_v24 = vor.u32 %v4102_v22, %v3466_v21  ;;  %v4154_v46 = vld [vmem:[%s6066_s1 + $0xf4] sm:$0xf0]  ;;  %v3682_v50 = vld [vmem:[%s6066_s1 + $0xf8] sm:$0xf0] }
 0x235   : > { %v4291_v4 = vpop.eup %4290 }
 0x236   : > { %v1160_v6 = vmul.f32 %v4291_v4, %v1153_v5  ;;  %1688 = vmatpush.bf16.msra.mxu0 %v3507_v35  ;;  %v3479_v5 = vor.u32 %v4103_v61, %v3476_v0  ;;  %v3450_v35 = vld [vmem:[%s6066_s1 + $0x28] sm:$0xf]  ;;  %v1417_v0 = vunpack.c.l.bf16 %v5362_v11 }
 0x237   : > { %v3451_v41 = vor.u32 %v4098_v37, %v3450_v35 }
 0x238   : > { %v1163_v8 = vpack.c.bf16 %v1160_v6, %v1160_v6  ;;  %v3483_v6 = vor.u32 %v4106_v2, %v3482_v1  ;;  %1703 = vmatpush.bf16.msra.mxu1 %v3479_v5  ;;  %v3439_v1 = vor.u32 %v4092_v59, %v3436_v60  ;;  %v4150_v59 = vld [vmem:[%s6066_s1 + $0xd4] sm:$0xf0] }
 0x23a   : > { %3289 = vst [vmem:[%s4438_s21 + $0x8] sm:$0xf] %v1163_v8  ;;  %1368 = vmatmul.bf16.vlgmr.msrb.gmra.mxu0 %v1163_v8  ;;  %1381 = vmatmul.bf16.vlgmr.msrb.gmra.mxu1 %v1163_v8 }
 0x23b   : > { %1394 = vmatmul.bf16.vlgmr.msrb.gmra.mxu2 %v1163_v8  ;;  %1407 = vmatmul.bf16.vlgmr.msrb.gmra.mxu3 %v1163_v8  ;;  %v4104_v8 = vld [vmem:[%s6066_s1 + $0x6c] sm:$0xf] }
 0x23c   : > { %1689 = vmatpush.bf16.msra.mxu0 %v3491_v47  ;;  %v3487_v12 = vor.u32 %v4104_v8, %v3484_v28  ;;  %1716 = vmatpush.bf16.msra.mxu2 %v3483_v6 }
 0x23d   : > { %1704 = vmatpush.bf16.msra.mxu1 %v3463_v20 }
 0x23e   : > { %1729 = vmatpush.bf16.msra.mxu3 %v3487_v12 }
 0x240   : > { %1690 = vmatpush.bf16.msra.mxu0 %v3475_v63  ;;  %1717 = vmatpush.bf16.msra.mxu2 %v3467_v24 }
 0x241   : > { %1705 = vmatpush.bf16.msra.mxu1 %v3447_v39 }
 0x242   : > { %1730 = vmatpush.bf16.msra.mxu3 %v3471_v26 }
 0x244   : > { %1691 = vmatpush.bf16.msra.mxu0 %v3459_v17  ;;  %1718 = vmatpush.bf16.msra.mxu2 %v3451_v41 }
 0x245   : > { %1706 = vmatpush.bf16.msra.mxu1 %v3431_v54  ;;  %v4147_v54 = vld [vmem:[%s6066_s1 + $0xc4] sm:$0xf] }
 0x246   : > { %1731 = vmatpush.bf16.msra.mxu3 %v3455_v44 }
 0x248   : > { %1692 = vmatpush.bf16.msra.mxu0 %v3443_v33 }
 0x24a   : > { %1732 = vmatpush.bf16.msra.mxu3 %v3439_v1 }
 0x24c   : > { %1693 = vmatpush.bf16.msra.mxu0 %v3427_v48  ;;  %v3681_v48 = vor.u32 %v4154_v46, %v3680_v40  ;;  %v3592_v40 = vld [vmem:[%s6066_s1 + $0x40] sm:$0xf]  ;;  %v4133_v46 = vld [vmem:[%s6066_s1 + $0x4c] sm:$0xf0] }
 0x2b7   : > { %v1369_v3 = vpop.f32.mrf.mxu0  ;;  %v1382_v4 = vpop.f32.mrf.mxu1 }
 0x2b8   : > { %v1419_v9 = vadd.f32 %v1415_v55, %v1369_v3  ;;  %v1420_v10 = vadd.f32 %v1416_v56, %v1382_v4  ;;  %v4094_v55 = vld [vmem:[%s6066_s1 + $0x14] sm:$0xf0] }
 0x2b9   : > { %v3435_v57 = vor.u32 %v4094_v55, %v3434_v51  ;;  %v3685_v51 = vor.u32 %v4152_v49, %v3682_v50  ;;  %v3593_v50 = vor.u32 %v4133_v46, %v3592_v40 }
 0x2ba   : > { %v3420_v15 = vmul.f32 -1.442695, %v1419_v9  ;;  %v3421_v16 = vmul.f32 -1.442695, %v1420_v10 }
 0x2bb   : > { %1719 = vmatpush.bf16.msra.mxu2 %v3435_v57  ;;  %2051 = vmatpush.bf16.msrb.mxu3 %v3685_v51  ;;  %v3664_v57 = vld [vmem:[%s6066_s1 + $0xc8] sm:$0xf]  ;;  %v3594_v51 = vld [vmem:[%s6066_s1 + $0x50] sm:$0xf0] }
 0x2bc   : > { %4292 = vpow2.f32 %v3420_v15 }
 0x2bd   : > { %4294 = vpow2.f32 %v3421_v16 }
 0x2be   : > { %v1395_v31 = vpop.f32.mrf.mxu2  ;;  %v1408_v32 = vpop.f32.mrf.mxu3 }
 0x2bf   : > { %v1422_v36 = vadd.f32 %v1418_v19, %v1408_v32  ;;  %v1371_v58 = vpop.f32.mrf.mxu0  ;;  %v1384_v38 = vpop.f32.mrf.mxu1  ;;  %v1421_v5 = vadd.f32 %v1417_v0, %v1395_v31  ;;  %2038 = vmatpush.bf16.msrb.mxu2 %v3681_v48  ;;  %v3666_v0 = vld [vmem:[%s6066_s1 + $0xd8] sm:$0xf0] }
 0x2c1   : > { %v3422_v45 = vmul.f32 -1.442695, %v1422_v36 }
 0x2c2   : > { %v4293_v47 = vpop.eup %4292 }
 0x2c3   : > { %v4295_v52 = vpop.eup %4294  ;;  %v1426_v53 = vadd.f32 1.0, %v4293_v47  ;;  %4296 = vpow2.f32 %v3422_v45  ;;  %v3674_v45 = vld [vmem:[%s6066_s1 + $0xf0] sm:$0xf0] }
 0x2c4   : > { %v1445_v56 = vadd.f32 1.0, %v4295_v52  ;;  %v3677_v47 = vor.u32 %v4151_v43, %v3674_v45  ;;  %v3656_v52 = vld [vmem:[%s6066_s1 + $0xc0] sm:$0xf] }
 0x2c5   : > { %4298 = vrcp.f32 %v1426_v53  ;;  %v1438_v12 = vand.u32 2147483648, %v1426_v53  ;;  %v1436_v14 = vand.u32 2147483647, %v1426_v53  ;;  %vm1432_vm6 = vweird.f32 %v1426_v53 }
 0x2c6   : > { %4300 = vrcp.f32 %v1445_v56  ;;  %v1397_v61 = vpop.f32.mrf.mxu2  ;;  %v1410_v63 = vpop.f32.mrf.mxu3  ;;  %v1457_v7 = vand.u32 2147483648, %v1445_v56  ;;  %v1455_v11 = vand.u32 2147483647, %v1445_v56  ;;  %vm1451_vm7 = vweird.f32 %v1445_v56  ;;  %2025 = vmatpush.bf16.msrb.mxu1 %v3677_v47  ;;  %v4131_v47 = vld [vmem:[%s6066_s1 + $0x44] sm:$0xf] }
 0x2c7   : > { %v1439_v18 = vor.u32 1.1754944e-38, %v1438_v12  ;;  %vm1437_vm10 = vcmp.eq.f32.partialorder %v1436_v14, 8.507059e+37  ;;  %v3665_v61 = vor.u32 %v4150_v59, %v3664_v57  ;;  %v4148_v63 = vld [vmem:[%s6066_s1 + $0xcc] sm:$0xf]  ;;  %v3602_v59 = vld [vmem:[%s6066_s1 + $0x58] sm:$0xf0] }
 0x2c8   : > { %v1458_v21 = vor.u32 1.1754944e-38, %v1457_v7  ;;  %vm1456_vm11 = vcmp.eq.f32.partialorder %v1455_v11, 8.507059e+37  ;;  %v3669_v1 = vor.u32 %v4148_v63, %v3666_v0  ;;  %v4144_v12 = vld [vmem:[%s6066_s1 + $0xac] sm:$0xf]  ;;  %v3650_v7 = vld [vmem:[%s6066_s1 + $0xb8] sm:$0xf0] }
 0x2c9   : > { %v4297_v2 = vpop.eup %4296  ;;  %2039 = vmatpush.bf16.msrb.mxu2 %v3665_v61  ;;  %v3653_v14 = vor.u32 %v4144_v12, %v3650_v7  ;;  %v4141_v11 = vld [vmem:[%s6066_s1 + $0x8c] sm:$0xf0]  ;;  %v3576_v61 = vld [vmem:[%s6066_s1 + $0x20] sm:$0xf]  ;;  %v4127_v0 = vld [vmem:[%s6066_s1 + $0x24] sm:$0xf] }
 0x2ca   : > { %v1465_v3 = vadd.f32 1.0, %v4297_v2  ;;  %v3640_v2 = vld [vmem:[%s6066_s1 + $0xa0] sm:$0xf]  ;;  %2052 = vmatpush.bf16.msrb.mxu3 %v3669_v1  ;;  %v4129_v63 = vld [vmem:[%s6066_s1 + $0x2c] sm:$0xf0] }
 0x2cb   : > { %v4299_v4 = vpop.eup %4298  ;;  %v4128_v7 = vld [vmem:[%s6066_s1 + $0x2c] sm:$0xf] }
 0x2cc   : > { %v4301_v6 = vpop.eup %4300  ;;  %v1428_v8 = vmul.f32 %v4299_v4, %v1426_v53  ;;  %4302 = vrcp.f32 %v1465_v3  ;;  %vm1433_vm4 = vweird.f32 %v4299_v4  ;;  %v1477_v34 = vand.u32 2147483648, %v1465_v3  ;;  %v4149_v53 = vld [vmem:[%s6066_s1 + $0xcc] sm:$0xf0] }
 0x2cd   : > { %v1447_v28 = vmul.f32 %v4301_v6, %v1445_v56  ;;  %4304 = vtanh.f32 %v1421_v5  ;;  %vm1452_vm5 = vweird.f32 %v4301_v6  ;;  %vm1434_vm8 = vmor %vm1432_vm6, %vm1433_vm4  ;;  %vm1471_vm13 = vweird.f32 %v1465_v3  ;;  %v3658_v56 = vld [vmem:[%s6066_s1 + $0xd0] sm:$0xf0] }
 0x2ce   : > { %v1429_v9 = vsub.f32 1.0, %v1428_v8  ;;  %vm1453_vm9 = vmor %vm1451_vm7, %vm1452_vm5  ;;  %v1475_v35 = vand.u32 2147483647, %v1465_v3  ;;  %v1478_v36 = vor.u32 1.1754944e-38, %v1477_v34  ;;  %v3657_v55 = vor.u32 %v4149_v53, %v3656_v52  ;;  %v3648_v8 = vld [vmem:[%s6066_s1 + $0xa8] sm:$0xf]  ;;  %2053 = vmatpush.bf16.msrb.mxu3 %v3653_v14 }
 0x2cf   : > { %v1448_v10 = vsub.f32 1.0, %v1447_v28  ;;  %v3661_v60 = vor.u32 %v4147_v54, %v3658_v56  ;;  %v4146_v28 = vld [vmem:[%s6066_s1 + $0xb4] sm:$0xf0]  ;;  %v3610_v34 = vld [vmem:[%s6066_s1 + $0x70] sm:$0xf0]  ;;  %v3597_v53 = vor.u32 %v4131_v47, %v3594_v51 }
 0x2d0   : > { %v1430_v13 = vmul.f32 %v4299_v4, %v1429_v9  ;;  %vm1476_vm15 = vcmp.eq.f32.partialorder %v1475_v35, 8.507059e+37  ;;  %v3616_v35 = vld [vmem:[%s6066_s1 + $0x68] sm:$0xf]  ;;  %v4132_v56 = vld [vmem:[%s6066_s1 + $0x4c] sm:$0xf] }
 0x2d1   : > { %v1449_v15 = vmul.f32 %v4301_v6, %v1448_v10  ;;  %2026 = vmatpush.bf16.msrb.mxu1 %v3661_v60  ;;  %v3649_v10 = vor.u32 %v4146_v28, %v3648_v8  ;;  %v3600_v54 = vld [vmem:[%s6066_s1 + $0x48] sm:$0xf]  ;;  %v3605_v60 = vor.u32 %v4132_v56, %v3602_v59 }
 0x2d2   : > { %v4303_v16 = vpop.eup %4302  ;;  %v1431_v17 = vadd.f32 %v4299_v4, %v1430_v13  ;;  %v3552_v13 = vld [vmem:[%s4433_s18 + $0x40] sm:$0xff] }
 0x2d3   : > { %v1450_v19 = vadd.f32 %v4301_v6, %v1449_v15  ;;  %v1467_v20 = vmul.f32 %v4303_v16, %v1465_v3  ;;  %v4305_v23 = vpop.eup %4304  ;;  %vm1472_vm12 = vweird.f32 %v4303_v16  ;;  %v4145_v3 = vld [vmem:[%s6066_s1 + $0xac] sm:$0xf0]  ;;  %2040 = vmatpush.bf16.msrb.mxu2 %v3649_v10  ;;  %v3624_v15 = vld [vmem:[%s6066_s1 + $0x80] sm:$0xf] }
 0x2d4   : > { %v1435_v22 = vsel %vm1434_vm8, %v4299_v4, %v1431_v17  ;;  %vm1473_vm14 = vmor %vm1471_vm13, %vm1472_vm12  ;;  %v4143_v4 = vld [vmem:[%s6066_s1 + $0xa4] sm:$0xf]  ;;  %v3641_v5 = vor.u32 %v4145_v3, %v3640_v2  ;;  %v3625_v17 = vor.u32 %v4141_v11, %v3624_v15  ;;  %v3577_v3 = vor.u32 %v4129_v63, %v3576_v61  ;;  %v3560_v11 = vld [vmem:[%s6066_s1] sm:$0xf] }
 0x2d5   : > { %v1440_v24 = vsel %vm1437_vm10, %v1439_v18, %v1435_v22  ;;  %v1454_v25 = vsel %vm1453_vm9, %v4301_v6, %v1450_v19  ;;  %v1468_v26 = vsub.f32 1.0, %v1467_v20  ;;  %v3642_v6 = vld [vmem:[%s6066_s1 + $0xb0] sm:$0xf0]  ;;  %v3632_v19 = vld [vmem:[%s6066_s1 + $0x88] sm:$0xf] }
 0x2d6   : > { %v1459_v27 = vsel %vm1456_vm11, %v1458_v21, %v1454_v25  ;;  %v1483_v29 = vmul.f32 %v4305_v23, %v1440_v24  ;;  %v3645_v9 = vor.u32 %v4143_v4, %v3642_v6  ;;  %v3626_v18 = vld [vmem:[%s6066_s1 + $0x90] sm:$0xf0]  ;;  %v4142_v20 = vld [vmem:[%s6066_s1 + $0x94] sm:$0xf0]  ;;  %v4140_v23 = vld [vmem:[%s6066_s1 + $0x8c] sm:$0xf]  ;;  %v1741_v25 = vunpack.c.l.bf16 %v3552_v13 }
 0x2d7   : > { %v1482_v30 = vmul.f32 %v1459_v27, %v5236_v62  ;;  %v1469_v31 = vmul.f32 %v4303_v16, %v1468_v26  ;;  %v3672_v62 = vld [vmem:[%s6066_s1 + $0xe0] sm:$0xf]  ;;  %v3633_v22 = vor.u32 %v4142_v20, %v3632_v19  ;;  %v3634_v24 = vld [vmem:[%s6066_s1 + $0x98] sm:$0xf0]  ;;  %v1742_v26 = vunpack.c.h.bf16 %v3552_v13  ;;  %v3578_v4 = vld [vmem:[%s6066_s1 + $0x30] sm:$0xf0] }
 0x2d8   : > { %v3673_v44 = vor.u32 %v4153_v42, %v3672_v62  ;;  %2027 = vmatpush.bf16.msrb.mxu1 %v3645_v9  ;;  %v3637_v27 = vor.u32 %v4140_v23, %v3634_v24  ;;  %v3618_v62 = vld [vmem:[%s6066_s1 + $0x78] sm:$0xf0]  ;;  %v4130_v6 = vld [vmem:[%s6066_s1 + $0x34] sm:$0xf0]  ;;  %v3581_v10 = vor.u32 %v4127_v0, %v3578_v4  ;;  %v4123_v19 = vld [vmem:[%s6066_s1 + $0x4] sm:$0xf] }
 0x2d9   : > { %v5439_v32 = vadd.f32 %v1483_v29, %v1482_v30  ;;  %v1470_v33 = vadd.f32 %v4303_v16, %v1469_v31  ;;  %2041 = vmatpush.bf16.msrb.mxu2 %v3633_v22  ;;  %v3608_v29 = vld [vmem:[%s6066_s1 + $0x60] sm:$0xf]  ;;  %v4137_v30 = vld [vmem:[%s6066_s1 + $0x6c] sm:$0xf0]  ;;  %v4135_v31 = vld [vmem:[%s6066_s1 + $0x64] sm:$0xf] }
 0x2da   : > { %2012 = vmatpush.bf16.msrb.mxu0 %v3673_v44  ;;  %2054 = vmatpush.bf16.msrb.mxu3 %v3637_v27  ;;  %v5565_v44 = vld [vmem:[%s4433_s18 + $0x48] sm:$0xff]  ;;  %v3586_v13 = vld [vmem:[%s6066_s1 + $0x38] sm:$0xf0]  ;;  %v3562_v20 = vld [vmem:[%s6066_s1 + $0x10] sm:$0xf0] }
 0x2db   : > { %4306 = vtanh.f32 %v5439_v32  ;;  %v1474_v37 = vsel %vm1473_vm14, %v4303_v16, %v1470_v33  ;;  %v4139_v16 = vld [vmem:[%s6066_s1 + $0x84] sm:$0xf]  ;;  %v3609_v33 = vor.u32 %v4137_v30, %v3608_v29  ;;  %v1744_v52 = vunpack.c.h.bf16 %v5565_v44  ;;  %v4124_v29 = vld [vmem:[%s6066_s1 + $0xc] sm:$0xf]  ;;  %v3570_v30 = vld [vmem:[%s6066_s1 + $0x18] sm:$0xf0] }
 0x2dc   : > { %v1479_v38 = vsel %vm1476_vm15, %v1478_v36, %v1474_v37  ;;  %v3629_v21 = vor.u32 %v4139_v16, %v3626_v18  ;;  %v4138_v37 = vld [vmem:[%s6066_s1 + $0x74] sm:$0xf0]  ;;  %v3589_v14 = vor.u32 %v4128_v7, %v3586_v13  ;;  %v4125_v16 = vld [vmem:[%s6066_s1 + $0xc] sm:$0xf0]  ;;  %v3565_v24 = vor.u32 %v4123_v19, %v3562_v20  ;;  %v4183_v13 = vld [vmem:[%s6066_s1 + $0xe4] sm:$0xf] }
 0x2dd   : > { %v3561_v18 = vor.u32 %v4125_v16, %v3560_v11  ;;  %v4185_v7 = vld [vmem:[%s6066_s1 + $0xec] sm:$0xf0]  ;;  %v3814_v11 = vld [vmem:[%s6066_s1 + $0xe8] sm:$0xf]  ;;  %v4186_v16 = vld [vmem:[%s6066_s1 + $0xf4] sm:$0xf0] }
 0x2de   : > { %2013 = vmatpush.bf16.msrb.mxu0 %v3657_v55  ;;  %2028 = vmatpush.bf16.msrb.mxu1 %v3629_v21  ;;  %v4134_v55 = vld [vmem:[%s6066_s1 + $0x54] sm:$0xf0]  ;;  %v3568_v21 = vld [vmem:[%s6066_s1 + $0x8] sm:$0xf]  ;;  %v4184_v19 = vld [vmem:[%s6066_s1 + $0xec] sm:$0xf] }
 0x2df   : > { %v3601_v57 = vor.u32 %v4134_v55, %v3600_v54  ;;  %v3816_v20 = vld [vmem:[%s6066_s1 + $0xf8] sm:$0xf0] }
 0x2e1   : > { %v4307_v58 = vpop.eup %4306 }
 0x2e2   : > { %v1486_v39 = vmul.f32 %v4307_v58, %v1479_v38  ;;  %2014 = vmatpush.bf16.msrb.mxu0 %v3641_v5  ;;  %v3613_v38 = vor.u32 %v4135_v31, %v3610_v34  ;;  %v3584_v5 = vld [vmem:[%s6066_s1 + $0x28] sm:$0xf]  ;;  %v1743_v34 = vunpack.c.l.bf16 %v5565_v44 }
 0x2e3   : > { %v3585_v12 = vor.u32 %v4130_v6, %v3584_v5 }
 0x2e4   : > { %v1489_v41 = vpack.c.bf16 %v1486_v39, %v1486_v39  ;;  %v3617_v39 = vor.u32 %v4138_v37, %v3616_v35  ;;  %2029 = vmatpush.bf16.msrb.mxu1 %v3613_v38  ;;  %v3573_v35 = vor.u32 %v4124_v29, %v3570_v30  ;;  %v4182_v29 = vld [vmem:[%s6066_s1 + $0xd4] sm:$0xf0] }
 0x2e6   : > { %3423 = vst [vmem:[%s4438_s21 + $0xc] sm:$0xf] %v1489_v41  ;;  %1694 = vmatmul.bf16.vlgmr.msra.gmra.mxu0 %v1489_v41  ;;  %1707 = vmatmul.bf16.vlgmr.msra.gmra.mxu1 %v1489_v41 }
 0x2e7   : > { %1720 = vmatmul.bf16.vlgmr.msra.gmra.mxu2 %v1489_v41  ;;  %1733 = vmatmul.bf16.vlgmr.msra.gmra.mxu3 %v1489_v41  ;;  %v4136_v41 = vld [vmem:[%s6066_s1 + $0x6c] sm:$0xf] }
 0x2e8   : > { %2015 = vmatpush.bf16.msrb.mxu0 %v3625_v17  ;;  %v3621_v45 = vor.u32 %v4136_v41, %v3618_v62  ;;  %2042 = vmatpush.bf16.msrb.mxu2 %v3617_v39 }
 0x2e9   : > { %2030 = vmatpush.bf16.msrb.mxu1 %v3597_v53 }
 0x2ea   : > { %2055 = vmatpush.bf16.msrb.mxu3 %v3621_v45 }
 0x2ec   : > { %2016 = vmatpush.bf16.msrb.mxu0 %v3609_v33  ;;  %2043 = vmatpush.bf16.msrb.mxu2 %v3601_v57 }
 0x2ed   : > { %2031 = vmatpush.bf16.msrb.mxu1 %v3581_v10 }
 0x2ee   : > { %2056 = vmatpush.bf16.msrb.mxu3 %v3605_v60 }
 0x2f0   : > { %2017 = vmatpush.bf16.msrb.mxu0 %v3593_v50  ;;  %2044 = vmatpush.bf16.msrb.mxu2 %v3585_v12 }
 0x2f1   : > { %2032 = vmatpush.bf16.msrb.mxu1 %v3565_v24  ;;  %v4179_v24 = vld [vmem:[%s6066_s1 + $0xc4] sm:$0xf] }
 0x2f2   : > { %2057 = vmatpush.bf16.msrb.mxu3 %v3589_v14 }
 0x2f4   : > { %2018 = vmatpush.bf16.msrb.mxu0 %v3577_v3 }
 0x2f6   : > { %2058 = vmatpush.bf16.msrb.mxu3 %v3573_v35 }
 0x2f8   : > { %2019 = vmatpush.bf16.msrb.mxu0 %v3561_v18  ;;  %v3815_v18 = vor.u32 %v4186_v16, %v3814_v11  ;;  %v3726_v11 = vld [vmem:[%s6066_s1 + $0x40] sm:$0xf]  ;;  %v4165_v16 = vld [vmem:[%s6066_s1 + $0x4c] sm:$0xf0] }
 0x363   : > { %v1695_v36 = vpop.f32.mrf.mxu0  ;;  %v1708_v58 = vpop.f32.mrf.mxu1 }
 0x364   : > { %v1745_v42 = vadd.f32 %v1741_v25, %v1695_v36  ;;  %v1746_v43 = vadd.f32 %v1742_v26, %v1708_v58  ;;  %v4126_v25 = vld [vmem:[%s6066_s1 + $0x14] sm:$0xf0] }
 0x365   : > { %v3569_v27 = vor.u32 %v4126_v25, %v3568_v21  ;;  %v3819_v21 = vor.u32 %v4184_v19, %v3816_v20  ;;  %v3727_v20 = vor.u32 %v4165_v16, %v3726_v11 }
 0x366   : > { %v3554_v48 = vmul.f32 -1.442695, %v1745_v42  ;;  %v3555_v49 = vmul.f32 -1.442695, %v1746_v43 }
 0x367   : > { %2045 = vmatpush.bf16.msrb.mxu2 %v3569_v27  ;;  %2377 = vmatpush.bf16.msra.mxu3 %v3819_v21  ;;  %v3798_v27 = vld [vmem:[%s6066_s1 + $0xc8] sm:$0xf]  ;;  %v3728_v21 = vld [vmem:[%s6066_s1 + $0x50] sm:$0xf0] }
 0x368   : > { %4308 = vpow2.f32 %v3554_v48 }
 0x369   : > { %4310 = vpow2.f32 %v3555_v49 }
 0x36a   : > { %v1721_v1 = vpop.f32.mrf.mxu2  ;;  %v1734_v2 = vpop.f32.mrf.mxu3 }
 0x36b   : > { %v1748_v8 = vadd.f32 %v1744_v52, %v1734_v2  ;;  %v1697_v28 = vpop.f32.mrf.mxu0  ;;  %v1710_v9 = vpop.f32.mrf.mxu1  ;;  %v1747_v38 = vadd.f32 %v1743_v34, %v1721_v1  ;;  %2364 = vmatpush.bf16.msra.mxu2 %v3815_v18  ;;  %v3800_v34 = vld [vmem:[%s6066_s1 + $0xd8] sm:$0xf0] }
 0x36d   : > { %v3556_v15 = vmul.f32 -1.442695, %v1748_v8 }
 0x36e   : > { %v4309_v17 = vpop.eup %4308 }
 0x36f   : > { %v4311_v22 = vpop.eup %4310  ;;  %v1752_v23 = vadd.f32 1.0, %v4309_v17  ;;  %4312 = vpow2.f32 %v3556_v15  ;;  %v3808_v15 = vld [vmem:[%s6066_s1 + $0xf0] sm:$0xf0] }
 0x370   : > { %v1771_v26 = vadd.f32 1.0, %v4311_v22  ;;  %v3811_v17 = vor.u32 %v4183_v13, %v3808_v15  ;;  %v3790_v22 = vld [vmem:[%s6066_s1 + $0xc0] sm:$0xf] }
 0x371   : > { %4314 = vrcp.f32 %v1752_v23  ;;  %v1764_v45 = vand.u32 2147483648, %v1752_v23  ;;  %v1762_v47 = vand.u32 2147483647, %v1752_v23  ;;  %vm1758_vm2 = vweird.f32 %v1752_v23 }
 0x372   : > { %4316 = vrcp.f32 %v1771_v26  ;;  %v1723_v31 = vpop.f32.mrf.mxu2  ;;  %v1736_v33 = vpop.f32.mrf.mxu3  ;;  %v1783_v40 = vand.u32 2147483648, %v1771_v26  ;;  %v1781_v44 = vand.u32 2147483647, %v1771_v26  ;;  %vm1777_vm3 = vweird.f32 %v1771_v26  ;;  %2351 = vmatpush.bf16.msra.mxu1 %v3811_v17  ;;  %v4163_v17 = vld [vmem:[%s6066_s1 + $0x44] sm:$0xf] }
 0x373   : > { %v1765_v51 = vor.u32 1.1754944e-38, %v1764_v45  ;;  %vm1763_vm6 = vcmp.eq.f32.partialorder %v1762_v47, 8.507059e+37  ;;  %v3799_v31 = vor.u32 %v4182_v29, %v3798_v27  ;;  %v4180_v33 = vld [vmem:[%s6066_s1 + $0xcc] sm:$0xf]  ;;  %v3736_v29 = vld [vmem:[%s6066_s1 + $0x58] sm:$0xf0] }
 0x374   : > { %v1784_v54 = vor.u32 1.1754944e-38, %v1783_v40  ;;  %vm1782_vm7 = vcmp.eq.f32.partialorder %v1781_v44, 8.507059e+37  ;;  %v3803_v35 = vor.u32 %v4180_v33, %v3800_v34  ;;  %v4176_v45 = vld [vmem:[%s6066_s1 + $0xac] sm:$0xf]  ;;  %v3784_v40 = vld [vmem:[%s6066_s1 + $0xb8] sm:$0xf0] }
 0x375   : > { %v4313_v37 = vpop.eup %4312  ;;  %2365 = vmatpush.bf16.msra.mxu2 %v3799_v31  ;;  %v3787_v47 = vor.u32 %v4176_v45, %v3784_v40  ;;  %v4173_v44 = vld [vmem:[%s6066_s1 + $0x8c] sm:$0xf0]  ;;  %v3710_v31 = vld [vmem:[%s6066_s1 + $0x20] sm:$0xf]  ;;  %v4159_v34 = vld [vmem:[%s6066_s1 + $0x24] sm:$0xf] }
 0x376   : > { %v1791_v36 = vadd.f32 1.0, %v4313_v37  ;;  %v3774_v37 = vld [vmem:[%s6066_s1 + $0xa0] sm:$0xf]  ;;  %2378 = vmatpush.bf16.msra.mxu3 %v3803_v35  ;;  %v4161_v33 = vld [vmem:[%s6066_s1 + $0x2c] sm:$0xf0] }
 0x377   : > { %v4315_v58 = vpop.eup %4314  ;;  %v4160_v40 = vld [vmem:[%s6066_s1 + $0x2c] sm:$0xf] }
 0x378   : > { %v4317_v39 = vpop.eup %4316  ;;  %v1754_v41 = vmul.f32 %v4315_v58, %v1752_v23  ;;  %4318 = vrcp.f32 %v1791_v36  ;;  %vm1759_vm0 = vweird.f32 %v4315_v58  ;;  %v1803_v4 = vand.u32 2147483648, %v1791_v36  ;;  %v4181_v23 = vld [vmem:[%s6066_s1 + $0xcc] sm:$0xf0] }
 0x379   : > { %v1773_v62 = vmul.f32 %v4317_v39, %v1771_v26  ;;  %4320 = vtanh.f32 %v1747_v38  ;;  %vm1778_vm1 = vweird.f32 %v4317_v39  ;;  %vm1760_vm4 = vmor %vm1758_vm2, %vm1759_vm0  ;;  %vm1797_vm9 = vweird.f32 %v1791_v36  ;;  %v3792_v26 = vld [vmem:[%s6066_s1 + $0xd0] sm:$0xf0] }
 0x37a   : > { %v1755_v42 = vsub.f32 1.0, %v1754_v41  ;;  %vm1779_vm5 = vmor %vm1777_vm3, %vm1778_vm1  ;;  %v1801_v5 = vand.u32 2147483647, %v1791_v36  ;;  %v1804_v8 = vor.u32 1.1754944e-38, %v1803_v4  ;;  %v3791_v25 = vor.u32 %v4181_v23, %v3790_v22  ;;  %v3782_v41 = vld [vmem:[%s6066_s1 + $0xa8] sm:$0xf]  ;;  %2379 = vmatpush.bf16.msra.mxu3 %v3787_v47 }
 0x37b   : > { %v1774_v43 = vsub.f32 1.0, %v1773_v62  ;;  %v3795_v30 = vor.u32 %v4179_v24, %v3792_v26  ;;  %v4178_v62 = vld [vmem:[%s6066_s1 + $0xb4] sm:$0xf0]  ;;  %v3744_v4 = vld [vmem:[%s6066_s1 + $0x70] sm:$0xf0]  ;;  %v3731_v23 = vor.u32 %v4163_v17, %v3728_v21 }
 0x37c   : > { %v1756_v46 = vmul.f32 %v4315_v58, %v1755_v42  ;;  %vm1802_vm11 = vcmp.eq.f32.partialorder %v1801_v5, 8.507059e+37  ;;  %v3750_v5 = vld [vmem:[%s6066_s1 + $0x68] sm:$0xf]  ;;  %v4164_v26 = vld [vmem:[%s6066_s1 + $0x4c] sm:$0xf] }
 0x37d   : > { %v1775_v48 = vmul.f32 %v4317_v39, %v1774_v43  ;;  %2352 = vmatpush.bf16.msra.mxu1 %v3795_v30  ;;  %v3783_v43 = vor.u32 %v4178_v62, %v3782_v41  ;;  %v3734_v24 = vld [vmem:[%s6066_s1 + $0x48] sm:$0xf]  ;;  %v3739_v30 = vor.u32 %v4164_v26, %v3736_v29 }
 0x37e   : > { %v4319_v49 = vpop.eup %4318  ;;  %v1757_v50 = vadd.f32 %v4315_v58, %v1756_v46  ;;  %v3686_v46 = vld [vmem:[%s4433_s18 + $0x50] sm:$0xff] }
 0x37f   : > { %v1776_v52 = vadd.f32 %v4317_v39, %v1775_v48  ;;  %v1793_v53 = vmul.f32 %v4319_v49, %v1791_v36  ;;  %v4321_v56 = vpop.eup %4320  ;;  %vm1798_vm8 = vweird.f32 %v4319_v49  ;;  %v4177_v36 = vld [vmem:[%s6066_s1 + $0xac] sm:$0xf0]  ;;  %2366 = vmatpush.bf16.msra.mxu2 %v3783_v43  ;;  %v3758_v48 = vld [vmem:[%s6066_s1 + $0x80] sm:$0xf] }
 0x380   : > { %v1761_v55 = vsel %vm1760_vm4, %v4315_v58, %v1757_v50  ;;  %vm1799_vm10 = vmor %vm1797_vm9, %vm1798_vm8  ;;  %v4175_v58 = vld [vmem:[%s6066_s1 + $0xa4] sm:$0xf]  ;;  %v3775_v38 = vor.u32 %v4177_v36, %v3774_v37  ;;  %v3759_v50 = vor.u32 %v4173_v44, %v3758_v48  ;;  %v3711_v36 = vor.u32 %v4161_v33, %v3710_v31  ;;  %v3694_v44 = vld [vmem:[%s6066_s1] sm:$0xf] }
 0x381   : > { %v1766_v57 = vsel %vm1763_vm6, %v1765_v51, %v1761_v55  ;;  %v1780_v59 = vsel %vm1779_vm5, %v4317_v39, %v1776_v52  ;;  %v1794_v60 = vsub.f32 1.0, %v1793_v53  ;;  %v3776_v39 = vld [vmem:[%s6066_s1 + $0xb0] sm:$0xf0]  ;;  %v3766_v52 = vld [vmem:[%s6066_s1 + $0x88] sm:$0xf] }
 0x382   : > { %v1785_v61 = vsel %vm1782_vm7, %v1784_v54, %v1780_v59  ;;  %v1809_v63 = vmul.f32 %v4321_v56, %v1766_v57  ;;  %v3779_v42 = vor.u32 %v4175_v58, %v3776_v39  ;;  %v3760_v51 = vld [vmem:[%s6066_s1 + $0x90] sm:$0xf0]  ;;  %v4174_v53 = vld [vmem:[%s6066_s1 + $0x94] sm:$0xf0]  ;;  %v4172_v56 = vld [vmem:[%s6066_s1 + $0x8c] sm:$0xf]  ;;  %v2067_v59 = vunpack.c.l.bf16 %v3686_v46 }
 0x383   : > { %v1808_v0 = vmul.f32 %v1785_v61, %v5439_v32  ;;  %v1795_v1 = vmul.f32 %v4319_v49, %v1794_v60  ;;  %v3806_v32 = vld [vmem:[%s6066_s1 + $0xe0] sm:$0xf]  ;;  %v3767_v55 = vor.u32 %v4174_v53, %v3766_v52  ;;  %v3768_v57 = vld [vmem:[%s6066_s1 + $0x98] sm:$0xf0]  ;;  %v2068_v60 = vunpack.c.h.bf16 %v3686_v46  ;;  %v3712_v58 = vld [vmem:[%s6066_s1 + $0x30] sm:$0xf0] }
 0x384   : > { %v3807_v14 = vor.u32 %v4185_v7, %v3806_v32  ;;  %2353 = vmatpush.bf16.msra.mxu1 %v3779_v42  ;;  %v3771_v61 = vor.u32 %v4172_v56, %v3768_v57  ;;  %v3752_v32 = vld [vmem:[%s6066_s1 + $0x78] sm:$0xf0]  ;;  %v4162_v39 = vld [vmem:[%s6066_s1 + $0x34] sm:$0xf0]  ;;  %v3715_v43 = vor.u32 %v4159_v34, %v3712_v58  ;;  %v4155_v52 = vld [vmem:[%s6066_s1 + $0x4] sm:$0xf] }
 0x385   : > { %v5642_v2 = vadd.f32 %v1809_v63, %v1808_v0  ;;  %v1796_v3 = vadd.f32 %v4319_v49, %v1795_v1  ;;  %2367 = vmatpush.bf16.msra.mxu2 %v3767_v55  ;;  %v3742_v63 = vld [vmem:[%s6066_s1 + $0x60] sm:$0xf]  ;;  %v4169_v0 = vld [vmem:[%s6066_s1 + $0x6c] sm:$0xf0]  ;;  %v4167_v1 = vld [vmem:[%s6066_s1 + $0x64] sm:$0xf] }
 0x386   : > { %2338 = vmatpush.bf16.msra.mxu0 %v3807_v14  ;;  %2380 = vmatpush.bf16.msra.mxu3 %v3771_v61  ;;  %v5768_v14 = vld [vmem:[%s4433_s18 + $0x58] sm:$0xff]  ;;  %v3696_v53 = vld [vmem:[%s6066_s1 + $0x10] sm:$0xf0] }
 0x387   : > { %4322 = vtanh.f32 %v5642_v2  ;;  %v1800_v6 = vsel %vm1799_vm10, %v4319_v49, %v1796_v3  ;;  %v4171_v49 = vld [vmem:[%s6066_s1 + $0x84] sm:$0xf]  ;;  %v3743_v3 = vor.u32 %v4169_v0, %v3742_v63  ;;  %v2070_v22 = vunpack.c.h.bf16 %v5768_v14  ;;  %v3720_v46 = vld [vmem:[%s6066_s1 + $0x38] sm:$0xf0]  ;;  %v4156_v63 = vld [vmem:[%s6066_s1 + $0xc] sm:$0xf] }
 0x388   : > { %v1805_v9 = vsel %vm1802_vm11, %v1804_v8, %v1800_v6  ;;  %v3763_v54 = vor.u32 %v4171_v49, %v3760_v51  ;;  %v4170_v6 = vld [vmem:[%s6066_s1 + $0x74] sm:$0xf0]  ;;  %v3723_v47 = vor.u32 %v4160_v40, %v3720_v46  ;;  %v4157_v49 = vld [vmem:[%s6066_s1 + $0xc] sm:$0xf0]  ;;  %v3699_v57 = vor.u32 %v4155_v52, %v3696_v53  ;;  %v3704_v0 = vld [vmem:[%s6066_s1 + $0x18] sm:$0xf0] }
 0x389   : > { %v3695_v51 = vor.u32 %v4157_v49, %v3694_v44  ;;  %v4217_v40 = vld [vmem:[%s6066_s1 + $0xec] sm:$0xf0]  ;;  %v4215_v46 = vld [vmem:[%s6066_s1 + $0xe4] sm:$0xf]  ;;  %v3948_v44 = vld [vmem:[%s6066_s1 + $0xe8] sm:$0xf] }
 0x38a   : > { %2339 = vmatpush.bf16.msra.mxu0 %v3791_v25  ;;  %2354 = vmatpush.bf16.msra.mxu1 %v3763_v54  ;;  %v4166_v25 = vld [vmem:[%s6066_s1 + $0x54] sm:$0xf0]  ;;  %v3702_v54 = vld [vmem:[%s6066_s1 + $0x8] sm:$0xf]  ;;  %v4216_v52 = vld [vmem:[%s6066_s1 + $0xec] sm:$0xf] }
 0x38b   : > { %v3735_v27 = vor.u32 %v4166_v25, %v3734_v24  ;;  %v4218_v49 = vld [vmem:[%s6066_s1 + $0xf4] sm:$0xf0]  ;;  %v3950_v53 = vld [vmem:[%s6066_s1 + $0xf8] sm:$0xf0] }
 0x38d   : > { %v4323_v28 = vpop.eup %4322 }
 0x38e   : > { %v1812_v10 = vmul.f32 %v4323_v28, %v1805_v9  ;;  %2340 = vmatpush.bf16.msra.mxu0 %v3775_v38  ;;  %v3747_v9 = vor.u32 %v4167_v1, %v3744_v4  ;;  %v3718_v38 = vld [vmem:[%s6066_s1 + $0x28] sm:$0xf]  ;;  %v2069_v4 = vunpack.c.l.bf16 %v5768_v14 }
 0x38f   : > { %v3719_v45 = vor.u32 %v4162_v39, %v3718_v38 }
 0x390   : > { %v1815_v12 = vpack.c.bf16 %v1812_v10, %v1812_v10  ;;  %v3751_v10 = vor.u32 %v4170_v6, %v3750_v5  ;;  %2355 = vmatpush.bf16.msra.mxu1 %v3747_v9  ;;  %v3707_v5 = vor.u32 %v4156_v63, %v3704_v0  ;;  %v4214_v63 = vld [vmem:[%s6066_s1 + $0xd4] sm:$0xf0] }
 0x392   : > { %3557 = vst [vmem:[%s4438_s21 + $0x10] sm:$0xf] %v1815_v12  ;;  %2020 = vmatmul.bf16.vlgmr.msrb.gmra.mxu0 %v1815_v12  ;;  %2033 = vmatmul.bf16.vlgmr.msrb.gmra.mxu1 %v1815_v12 }
 0x393   : > { %2046 = vmatmul.bf16.vlgmr.msrb.gmra.mxu2 %v1815_v12  ;;  %2059 = vmatmul.bf16.vlgmr.msrb.gmra.mxu3 %v1815_v12  ;;  %v4168_v12 = vld [vmem:[%s6066_s1 + $0x6c] sm:$0xf] }
 0x394   : > { %2341 = vmatpush.bf16.msra.mxu0 %v3759_v50  ;;  %v3755_v15 = vor.u32 %v4168_v12, %v3752_v32  ;;  %2368 = vmatpush.bf16.msra.mxu2 %v3751_v10 }
 0x395   : > { %2356 = vmatpush.bf16.msra.mxu1 %v3731_v23 }
 0x396   : > { %2381 = vmatpush.bf16.msra.mxu3 %v3755_v15 }
 0x398   : > { %2342 = vmatpush.bf16.msra.mxu0 %v3743_v3  ;;  %2369 = vmatpush.bf16.msra.mxu2 %v3735_v27 }
 0x399   : > { %2357 = vmatpush.bf16.msra.mxu1 %v3715_v43 }
 0x39a   : > { %2382 = vmatpush.bf16.msra.mxu3 %v3739_v30 }
 0x39c   : > { %2343 = vmatpush.bf16.msra.mxu0 %v3727_v20  ;;  %2370 = vmatpush.bf16.msra.mxu2 %v3719_v45 }
 0x39d   : > { %2358 = vmatpush.bf16.msra.mxu1 %v3699_v57  ;;  %v4211_v57 = vld [vmem:[%s6066_s1 + $0xc4] sm:$0xf] }
 0x39e   : > { %2383 = vmatpush.bf16.msra.mxu3 %v3723_v47 }
 0x3a0   : > { %2344 = vmatpush.bf16.msra.mxu0 %v3711_v36 }
 0x3a2   : > { %2384 = vmatpush.bf16.msra.mxu3 %v3707_v5 }
 0x3a4   : > { %2345 = vmatpush.bf16.msra.mxu0 %v3695_v51  ;;  %v3949_v51 = vor.u32 %v4218_v49, %v3948_v44  ;;  %v3860_v44 = vld [vmem:[%s6066_s1 + $0x40] sm:$0xf]  ;;  %v4197_v49 = vld [vmem:[%s6066_s1 + $0x4c] sm:$0xf0] }
 0x40f   : > { %v2021_v8 = vpop.f32.mrf.mxu0  ;;  %v2034_v28 = vpop.f32.mrf.mxu1 }
 0x410   : > { %v2071_v7 = vadd.f32 %v2067_v59, %v2021_v8  ;;  %v2072_v13 = vadd.f32 %v2068_v60, %v2034_v28  ;;  %v4158_v59 = vld [vmem:[%s6066_s1 + $0x14] sm:$0xf0] }
 0x411   : > { %v3703_v61 = vor.u32 %v4158_v59, %v3702_v54  ;;  %v3953_v54 = vor.u32 %v4216_v52, %v3950_v53  ;;  %v3861_v53 = vor.u32 %v4197_v49, %v3860_v44 }
 0x412   : > { %v3688_v18 = vmul.f32 -1.442695, %v2071_v7  ;;  %v3689_v19 = vmul.f32 -1.442695, %v2072_v13 }
 0x413   : > { %2371 = vmatpush.bf16.msra.mxu2 %v3703_v61  ;;  %2703 = vmatpush.bf16.msrb.mxu3 %v3953_v54  ;;  %v3932_v61 = vld [vmem:[%s6066_s1 + $0xc8] sm:$0xf]  ;;  %v3862_v54 = vld [vmem:[%s6066_s1 + $0x50] sm:$0xf0] }
 0x414   : > { %4324 = vpow2.f32 %v3688_v18 }
 0x415   : > { %4326 = vpow2.f32 %v3689_v19 }
 0x416   : > { %v2047_v35 = vpop.f32.mrf.mxu2  ;;  %v2060_v37 = vpop.f32.mrf.mxu3 }
 0x417   : > { %v2074_v41 = vadd.f32 %v2070_v22, %v2060_v37  ;;  %v2023_v62 = vpop.f32.mrf.mxu0  ;;  %v2036_v42 = vpop.f32.mrf.mxu1  ;;  %v2073_v9 = vadd.f32 %v2069_v4, %v2047_v35  ;;  %2690 = vmatpush.bf16.msrb.mxu2 %v3949_v51  ;;  %v3934_v4 = vld [vmem:[%s6066_s1 + $0xd8] sm:$0xf0] }
 0x419   : > { %v3690_v48 = vmul.f32 -1.442695, %v2074_v41 }
 0x41a   : > { %v4325_v50 = vpop.eup %4324 }
 0x41b   : > { %v4327_v55 = vpop.eup %4326  ;;  %v2078_v56 = vadd.f32 1.0, %v4325_v50  ;;  %4328 = vpow2.f32 %v3690_v48  ;;  %v3942_v48 = vld [vmem:[%s6066_s1 + $0xf0] sm:$0xf0] }
 0x41c   : > { %v2097_v60 = vadd.f32 1.0, %v4327_v55  ;;  %v3945_v50 = vor.u32 %v4215_v46, %v3942_v48  ;;  %v3924_v55 = vld [vmem:[%s6066_s1 + $0xc0] sm:$0xf] }
 0x41d   : > { %4330 = vrcp.f32 %v2078_v56  ;;  %v2090_v15 = vand.u32 2147483648, %v2078_v56  ;;  %v2088_v17 = vand.u32 2147483647, %v2078_v56  ;;  %vm2084_vm14 = vweird.f32 %v2078_v56 }
 0x41e   : > { %4332 = vrcp.f32 %v2097_v60  ;;  %v2049_v1 = vpop.f32.mrf.mxu2  ;;  %v2062_v3 = vpop.f32.mrf.mxu3  ;;  %v2109_v11 = vand.u32 2147483648, %v2097_v60  ;;  %v2107_v14 = vand.u32 2147483647, %v2097_v60  ;;  %vm2103_vm15 = vweird.f32 %v2097_v60  ;;  %2677 = vmatpush.bf16.msrb.mxu1 %v3945_v50  ;;  %v4195_v50 = vld [vmem:[%s6066_s1 + $0x44] sm:$0xf] }
 0x41f   : > { %v2091_v21 = vor.u32 1.1754944e-38, %v2090_v15  ;;  %vm2089_vm2 = vcmp.eq.f32.partialorder %v2088_v17, 8.507059e+37  ;;  %v3933_v1 = vor.u32 %v4214_v63, %v3932_v61  ;;  %v4212_v3 = vld [vmem:[%s6066_s1 + $0xcc] sm:$0xf]  ;;  %v3870_v63 = vld [vmem:[%s6066_s1 + $0x58] sm:$0xf0] }
 0x420   : > { %v2110_v24 = vor.u32 1.1754944e-38, %v2109_v11  ;;  %vm2108_vm3 = vcmp.eq.f32.partialorder %v2107_v14, 8.507059e+37  ;;  %v3937_v5 = vor.u32 %v4212_v3, %v3934_v4  ;;  %v4208_v15 = vld [vmem:[%s6066_s1 + $0xac] sm:$0xf]  ;;  %v3918_v11 = vld [vmem:[%s6066_s1 + $0xb8] sm:$0xf0] }
 0x421   : > { %v4329_v6 = vpop.eup %4328  ;;  %2691 = vmatpush.bf16.msrb.mxu2 %v3933_v1  ;;  %v3921_v17 = vor.u32 %v4208_v15, %v3918_v11  ;;  %v4205_v14 = vld [vmem:[%s6066_s1 + $0x8c] sm:$0xf0]  ;;  %v3844_v1 = vld [vmem:[%s6066_s1 + $0x20] sm:$0xf]  ;;  %v4191_v4 = vld [vmem:[%s6066_s1 + $0x24] sm:$0xf] }
 0x422   : > { %v2117_v8 = vadd.f32 1.0, %v4329_v6  ;;  %v3908_v6 = vld [vmem:[%s6066_s1 + $0xa0] sm:$0xf]  ;;  %2704 = vmatpush.bf16.msrb.mxu3 %v3937_v5  ;;  %v4193_v3 = vld [vmem:[%s6066_s1 + $0x2c] sm:$0xf0] }
 0x423   : > { %v4331_v28 = vpop.eup %4330  ;;  %v4192_v11 = vld [vmem:[%s6066_s1 + $0x2c] sm:$0xf] }
 0x424   : > { %v4333_v10 = vpop.eup %4332  ;;  %v2080_v12 = vmul.f32 %v4331_v28, %v2078_v56  ;;  %4334 = vrcp.f32 %v2117_v8  ;;  %vm2085_vm12 = vweird.f32 %v4331_v28  ;;  %v2129_v58 = vand.u32 2147483648, %v2117_v8  ;;  %v4213_v56 = vld [vmem:[%s6066_s1 + $0xcc] sm:$0xf0] }
 0x425   : > { %v2099_v32 = vmul.f32 %v4333_v10, %v2097_v60  ;;  %4336 = vtanh.f32 %v2073_v9  ;;  %vm2104_vm13 = vweird.f32 %v4333_v10  ;;  %vm2086_vm0 = vmor %vm2084_vm14, %vm2085_vm12  ;;  %vm2123_vm5 = vweird.f32 %v2117_v8  ;;  %v3926_v60 = vld [vmem:[%s6066_s1 + $0xd0] sm:$0xf0] }
 0x426   : > { %v2081_v7 = vsub.f32 1.0, %v2080_v12  ;;  %vm2105_vm1 = vmor %vm2103_vm15, %vm2104_vm13  ;;  %v2127_v38 = vand.u32 2147483647, %v2117_v8  ;;  %v2130_v41 = vor.u32 1.1754944e-38, %v2129_v58  ;;  %v3925_v59 = vor.u32 %v4213_v56, %v3924_v55  ;;  %v3916_v12 = vld [vmem:[%s6066_s1 + $0xa8] sm:$0xf]  ;;  %2705 = vmatpush.bf16.msrb.mxu3 %v3921_v17 }
 0x427   : > { %v2100_v13 = vsub.f32 1.0, %v2099_v32  ;;  %v3929_v0 = vor.u32 %v4211_v57, %v3926_v60  ;;  %v4210_v32 = vld [vmem:[%s6066_s1 + $0xb4] sm:$0xf0]  ;;  %v3878_v58 = vld [vmem:[%s6066_s1 + $0x70] sm:$0xf0]  ;;  %v3865_v56 = vor.u32 %v4195_v50, %v3862_v54 }
 0x428   : > { %v2082_v16 = vmul.f32 %v4331_v28, %v2081_v7  ;;  %vm2128_vm7 = vcmp.eq.f32.partialorder %v2127_v38, 8.507059e+37  ;;  %v3884_v38 = vld [vmem:[%s6066_s1 + $0x68] sm:$0xf]  ;;  %v4196_v60 = vld [vmem:[%s6066_s1 + $0x4c] sm:$0xf] }
 0x429   : > { %v2101_v18 = vmul.f32 %v4333_v10, %v2100_v13  ;;  %2678 = vmatpush.bf16.msrb.mxu1 %v3929_v0  ;;  %v3917_v13 = vor.u32 %v4210_v32, %v3916_v12  ;;  %v3868_v57 = vld [vmem:[%s6066_s1 + $0x48] sm:$0xf]  ;;  %v3873_v0 = vor.u32 %v4196_v60, %v3870_v63 }
 0x42a   : > { %v4335_v19 = vpop.eup %4334  ;;  %v2083_v20 = vadd.f32 %v4331_v28, %v2082_v16  ;;  %v3820_v16 = vld [vmem:[%s4433_s18 + $0x60] sm:$0xff] }
 0x42b   : > { %v2102_v22 = vadd.f32 %v4333_v10, %v2101_v18  ;;  %v2119_v23 = vmul.f32 %v4335_v19, %v2117_v8  ;;  %v4337_v26 = vpop.eup %4336  ;;  %vm2124_vm4 = vweird.f32 %v4335_v19  ;;  %v4209_v8 = vld [vmem:[%s6066_s1 + $0xac] sm:$0xf0]  ;;  %2692 = vmatpush.bf16.msrb.mxu2 %v3917_v13  ;;  %v3892_v18 = vld [vmem:[%s6066_s1 + $0x80] sm:$0xf] }
 0x42c   : > { %v2087_v25 = vsel %vm2086_vm0, %v4331_v28, %v2083_v20  ;;  %vm2125_vm6 = vmor %vm2123_vm5, %vm2124_vm4  ;;  %v4207_v28 = vld [vmem:[%s6066_s1 + $0xa4] sm:$0xf]  ;;  %v3909_v9 = vor.u32 %v4209_v8, %v3908_v6  ;;  %v3893_v20 = vor.u32 %v4205_v14, %v3892_v18  ;;  %v3845_v8 = vor.u32 %v4193_v3, %v3844_v1  ;;  %v3828_v14 = vld [vmem:[%s6066_s1] sm:$0xf] }
 0x42d   : > { %v2092_v27 = vsel %vm2089_vm2, %v2091_v21, %v2087_v25  ;;  %v2106_v29 = vsel %vm2105_vm1, %v4333_v10, %v2102_v22  ;;  %v2120_v30 = vsub.f32 1.0, %v2119_v23  ;;  %v3910_v10 = vld [vmem:[%s6066_s1 + $0xb0] sm:$0xf0]  ;;  %v3900_v22 = vld [vmem:[%s6066_s1 + $0x88] sm:$0xf] }
 0x42e   : > { %v2111_v31 = vsel %vm2108_vm3, %v2110_v24, %v2106_v29  ;;  %v2135_v33 = vmul.f32 %v4337_v26, %v2092_v27  ;;  %v3913_v7 = vor.u32 %v4207_v28, %v3910_v10  ;;  %v3894_v21 = vld [vmem:[%s6066_s1 + $0x90] sm:$0xf0]  ;;  %v4206_v23 = vld [vmem:[%s6066_s1 + $0x94] sm:$0xf0]  ;;  %v4204_v26 = vld [vmem:[%s6066_s1 + $0x8c] sm:$0xf]  ;;  %v2393_v29 = vunpack.c.l.bf16 %v3820_v16 }
 0x42f   : > { %v2134_v34 = vmul.f32 %v2111_v31, %v5642_v2  ;;  %v2121_v35 = vmul.f32 %v4335_v19, %v2120_v30  ;;  %v3940_v2 = vld [vmem:[%s6066_s1 + $0xe0] sm:$0xf]  ;;  %v3901_v25 = vor.u32 %v4206_v23, %v3900_v22  ;;  %v3902_v27 = vld [vmem:[%s6066_s1 + $0x98] sm:$0xf0]  ;;  %v2394_v30 = vunpack.c.h.bf16 %v3820_v16  ;;  %v3846_v28 = vld [vmem:[%s6066_s1 + $0x30] sm:$0xf0] }
 0x430   : > { %v3941_v47 = vor.u32 %v4217_v40, %v3940_v2  ;;  %2679 = vmatpush.bf16.msrb.mxu1 %v3913_v7  ;;  %v3905_v31 = vor.u32 %v4204_v26, %v3902_v27  ;;  %v3886_v2 = vld [vmem:[%s6066_s1 + $0x78] sm:$0xf0]  ;;  %v4194_v10 = vld [vmem:[%s6066_s1 + $0x34] sm:$0xf0]  ;;  %v3849_v13 = vor.u32 %v4191_v4, %v3846_v28  ;;  %v4187_v22 = vld [vmem:[%s6066_s1 + $0x4] sm:$0xf] }
 0x431   : > { %v5845_v37 = vadd.f32 %v2135_v33, %v2134_v34  ;;  %v2122_v36 = vadd.f32 %v4335_v19, %v2121_v35  ;;  %2693 = vmatpush.bf16.msrb.mxu2 %v3901_v25  ;;  %v3876_v33 = vld [vmem:[%s6066_s1 + $0x60] sm:$0xf]  ;;  %v4201_v34 = vld [vmem:[%s6066_s1 + $0x6c] sm:$0xf0]  ;;  %v4199_v35 = vld [vmem:[%s6066_s1 + $0x64] sm:$0xf] }
 0x432   : > { %2664 = vmatpush.bf16.msrb.mxu0 %v3941_v47  ;;  %2706 = vmatpush.bf16.msrb.mxu3 %v3905_v31  ;;  %v5971_v47 = vld [vmem:[%s4433_s18 + $0x68] sm:$0xff]  ;;  %v3854_v16 = vld [vmem:[%s6066_s1 + $0x38] sm:$0xf0]  ;;  %v3830_v23 = vld [vmem:[%s6066_s1 + $0x10] sm:$0xf0] }
 0x433   : > { %4338 = vtanh.f32 %v5845_v37  ;;  %v2126_v39 = vsel %vm2125_vm6, %v4335_v19, %v2122_v36  ;;  %v4203_v19 = vld [vmem:[%s6066_s1 + $0x84] sm:$0xf]  ;;  %v3877_v36 = vor.u32 %v4201_v34, %v3876_v33  ;;  %v2396_v55 = vunpack.c.h.bf16 %v5971_v47  ;;  %v4188_v33 = vld [vmem:[%s6066_s1 + $0xc] sm:$0xf]  ;;  %v3838_v34 = vld [vmem:[%s6066_s1 + $0x18] sm:$0xf0] }
 0x434   : > { %v2131_v42 = vsel %vm2128_vm7, %v2130_v41, %v2126_v39  ;;  %v3897_v24 = vor.u32 %v4203_v19, %v3894_v21  ;;  %v4202_v39 = vld [vmem:[%s6066_s1 + $0x74] sm:$0xf0]  ;;  %v3857_v17 = vor.u32 %v4192_v11, %v3854_v16  ;;  %v4189_v19 = vld [vmem:[%s6066_s1 + $0xc] sm:$0xf0]  ;;  %v3833_v27 = vor.u32 %v4187_v22, %v3830_v23 }
 0x435   : > { %v3829_v21 = vor.u32 %v4189_v19, %v3828_v14 }
 0x436   : > { %2665 = vmatpush.bf16.msrb.mxu0 %v3925_v59  ;;  %2680 = vmatpush.bf16.msrb.mxu1 %v3897_v24  ;;  %v4198_v59 = vld [vmem:[%s6066_s1 + $0x54] sm:$0xf0]  ;;  %v3836_v24 = vld [vmem:[%s6066_s1 + $0x8] sm:$0xf] }
 0x437   : > { %v3869_v61 = vor.u32 %v4198_v59, %v3868_v57 }
 0x439   : > { %v4339_v62 = vpop.eup %4338 }
 0x43a   : > { %v2138_v43 = vmul.f32 %v4339_v62, %v2131_v42  ;;  %2666 = vmatpush.bf16.msrb.mxu0 %v3909_v9  ;;  %v3881_v42 = vor.u32 %v4199_v35, %v3878_v58  ;;  %v3852_v9 = vld [vmem:[%s6066_s1 + $0x28] sm:$0xf]  ;;  %v2395_v58 = vunpack.c.l.bf16 %v5971_v47 }
 0x43b   : > { %v3853_v15 = vor.u32 %v4194_v10, %v3852_v9 }
 0x43c   : > { %v2141_v45 = vpack.c.bf16 %v2138_v43, %v2138_v43  ;;  %v3885_v43 = vor.u32 %v4202_v39, %v3884_v38  ;;  %2681 = vmatpush.bf16.msrb.mxu1 %v3881_v42  ;;  %v3841_v38 = vor.u32 %v4188_v33, %v3838_v34 }
 0x43e   : > { %3691 = vst [vmem:[%s4438_s21 + $0x14] sm:$0xf] %v2141_v45  ;;  %2346 = vmatmul.bf16.vlgmr.msra.gmra.mxu0 %v2141_v45  ;;  %2359 = vmatmul.bf16.vlgmr.msra.gmra.mxu1 %v2141_v45 }
 0x43f   : > { %2372 = vmatmul.bf16.vlgmr.msra.gmra.mxu2 %v2141_v45  ;;  %2385 = vmatmul.bf16.vlgmr.msra.gmra.mxu3 %v2141_v45  ;;  %v4200_v45 = vld [vmem:[%s6066_s1 + $0x6c] sm:$0xf] }
 0x440   : > { %2667 = vmatpush.bf16.msrb.mxu0 %v3893_v20  ;;  %v3889_v48 = vor.u32 %v4200_v45, %v3886_v2  ;;  %2694 = vmatpush.bf16.msrb.mxu2 %v3885_v43 }
 0x441   : > { %2682 = vmatpush.bf16.msrb.mxu1 %v3865_v56 }
 0x442   : > { %2707 = vmatpush.bf16.msrb.mxu3 %v3889_v48 }
 0x444   : > { %2668 = vmatpush.bf16.msrb.mxu0 %v3877_v36  ;;  %2695 = vmatpush.bf16.msrb.mxu2 %v3869_v61 }
 0x445   : > { %2683 = vmatpush.bf16.msrb.mxu1 %v3849_v13 }
 0x446   : > { %2708 = vmatpush.bf16.msrb.mxu3 %v3873_v0 }
 0x448   : > { %2669 = vmatpush.bf16.msrb.mxu0 %v3861_v53  ;;  %2696 = vmatpush.bf16.msrb.mxu2 %v3853_v15  ;;  %v3954_v15 = vld [vmem:[%s4433_s18 + $0x70] sm:$0xff] }
 0x449   : > { %2684 = vmatpush.bf16.msrb.mxu1 %v3833_v27  ;;  %v2719_v11 = vunpack.c.l.bf16 %v3954_v15  ;;  %v2720_v16 = vunpack.c.h.bf16 %v3954_v15 }
 0x44a   : > { %2709 = vmatpush.bf16.msrb.mxu3 %v3857_v17 }
 0x44c   : > { %2670 = vmatpush.bf16.msrb.mxu0 %v3845_v8 }
 0x44e   : > { %2710 = vmatpush.bf16.msrb.mxu3 %v3841_v38 }
 0x450   : > { %2671 = vmatpush.bf16.msrb.mxu0 %v3829_v21 }
 0x4bb   : > { %v2347_v41 = vpop.f32.mrf.mxu0  ;;  %v2360_v62 = vpop.f32.mrf.mxu1 }
 0x4bc   : > { %v2397_v40 = vadd.f32 %v2393_v29, %v2347_v41  ;;  %v2398_v46 = vadd.f32 %v2394_v30, %v2360_v62  ;;  %v4190_v29 = vld [vmem:[%s6066_s1 + $0x14] sm:$0xf0] }
 0x4bd   : > { %v3837_v31 = vor.u32 %v4190_v29, %v3836_v24 }
 0x4be   : > { %v3822_v51 = vmul.f32 -1.442695, %v2397_v40  ;;  %v3823_v52 = vmul.f32 -1.442695, %v2398_v46 }
 0x4bf   : > { %2697 = vmatpush.bf16.msrb.mxu2 %v3837_v31 }
 0x4c0   : > { %4340 = vpow2.f32 %v3822_v51 }
 0x4c1   : > { %4342 = vpow2.f32 %v3823_v52 }
 0x4c2   : > { %v2373_v5 = vpop.f32.mrf.mxu2  ;;  %v2386_v6 = vpop.f32.mrf.mxu3 }
 0x4c3   : > { %v2400_v12 = vadd.f32 %v2396_v55, %v2386_v6  ;;  %v2349_v32 = vpop.f32.mrf.mxu0  ;;  %v2362_v7 = vpop.f32.mrf.mxu1  ;;  %v2399_v42 = vadd.f32 %v2395_v58, %v2373_v5 }
 0x4c5   : > { %v3824_v18 = vmul.f32 -1.442695, %v2400_v12 }
 0x4c6   : > { %v4341_v20 = vpop.eup %4340 }
 0x4c7   : > { %v4343_v25 = vpop.eup %4342  ;;  %v2404_v26 = vadd.f32 1.0, %v4341_v20  ;;  %4344 = vpow2.f32 %v3824_v18  ;;  %v3955_v20 = vld [vmem:[%s4433_s18 + $0x78] sm:$0xff] }
 0x4c8   : > { %v2423_v30 = vadd.f32 1.0, %v4343_v25  ;;  %v2722_v23 = vunpack.c.h.bf16 %v3955_v20  ;;  %v2721_v38 = vunpack.c.l.bf16 %v3955_v20 }
 0x4c9   : > { %4346 = vrcp.f32 %v2404_v26  ;;  %v2416_v48 = vand.u32 2147483648, %v2404_v26  ;;  %v2414_v50 = vand.u32 2147483647, %v2404_v26  ;;  %vm2410_vm10 = vweird.f32 %v2404_v26 }
 0x4ca   : > { %4348 = vrcp.f32 %v2423_v30  ;;  %v2375_v35 = vpop.f32.mrf.mxu2  ;;  %v2388_v36 = vpop.f32.mrf.mxu3  ;;  %v2435_v44 = vand.u32 2147483648, %v2423_v30  ;;  %v2433_v47 = vand.u32 2147483647, %v2423_v30  ;;  %vm2429_vm11 = vweird.f32 %v2423_v30 }
 0x4cb   : > { %v2417_v54 = vor.u32 1.1754944e-38, %v2416_v48  ;;  %vm2415_vm14 = vcmp.eq.f32.partialorder %v2414_v50, 8.507059e+37 }
 0x4cc   : > { %v2436_v57 = vor.u32 1.1754944e-38, %v2435_v44  ;;  %vm2434_vm15 = vcmp.eq.f32.partialorder %v2433_v47, 8.507059e+37 }
 0x4cd   : > { %v4345_v39 = vpop.eup %4344 }
 0x4ce   : > { %v2443_v41 = vadd.f32 1.0, %v4345_v39 }
 0x4cf   : > { %v4347_v62 = vpop.eup %4346 }
 0x4d0   : > { %v4349_v43 = vpop.eup %4348  ;;  %v2406_v45 = vmul.f32 %v4347_v62, %v2404_v26  ;;  %4350 = vrcp.f32 %v2443_v41  ;;  %vm2411_vm8 = vweird.f32 %v4347_v62  ;;  %v2455_v28 = vand.u32 2147483648, %v2443_v41 }
 0x4d1   : > { %v2425_v2 = vmul.f32 %v4349_v43, %v2423_v30  ;;  %4352 = vtanh.f32 %v2399_v42  ;;  %vm2430_vm9 = vweird.f32 %v4349_v43  ;;  %vm2412_vm12 = vmor %vm2410_vm10, %vm2411_vm8  ;;  %vm2449_vm1 = vweird.f32 %v2443_v41 }
 0x4d2   : > { %v2407_v40 = vsub.f32 1.0, %v2406_v45  ;;  %vm2431_vm13 = vmor %vm2429_vm11, %vm2430_vm9  ;;  %v2453_v9 = vand.u32 2147483647, %v2443_v41  ;;  %v2456_v12 = vor.u32 1.1754944e-38, %v2455_v28 }
 0x4d3   : > { %v2426_v46 = vsub.f32 1.0, %v2425_v2 }
 0x4d4   : > { %v2408_v49 = vmul.f32 %v4347_v62, %v2407_v40  ;;  %vm2454_vm3 = vcmp.eq.f32.partialorder %v2453_v9, 8.507059e+37 }
 0x4d5   : > { %v2427_v51 = vmul.f32 %v4349_v43, %v2426_v46 }
 0x4d6   : > { %v4351_v52 = vpop.eup %4350  ;;  %v2409_v53 = vadd.f32 %v4347_v62, %v2408_v49 }
 0x4d7   : > { %v2428_v55 = vadd.f32 %v4349_v43, %v2427_v51  ;;  %v2445_v56 = vmul.f32 %v4351_v52, %v2443_v41  ;;  %v4353_v60 = vpop.eup %4352  ;;  %vm2450_vm0 = vweird.f32 %v4351_v52 }
 0x4d8   : > { %v2413_v59 = vsel %vm2412_vm12, %v4347_v62, %v2409_v53  ;;  %vm2451_vm2 = vmor %vm2449_vm1, %vm2450_vm0 }
 0x4d9   : > { %v2418_v61 = vsel %vm2415_vm14, %v2417_v54, %v2413_v59  ;;  %v2432_v63 = vsel %vm2431_vm13, %v4349_v43, %v2428_v55  ;;  %v2446_v0 = vsub.f32 1.0, %v2445_v56 }
 0x4da   : > { %v2437_v1 = vsel %vm2434_vm15, %v2436_v57, %v2432_v63  ;;  %v2461_v3 = vmul.f32 %v4353_v60, %v2418_v61 }
 0x4db   : > { %v2460_v4 = vmul.f32 %v2437_v1, %v5845_v37  ;;  %v2447_v5 = vmul.f32 %v4351_v52, %v2446_v0 }
 0x4dd   : > { %v6048_v6 = vadd.f32 %v2461_v3, %v2460_v4  ;;  %v2448_v8 = vadd.f32 %v4351_v52, %v2447_v5 }
 0x4df   : > { %4354 = vtanh.f32 %v6048_v6  ;;  %v2452_v10 = vsel %vm2451_vm2, %v4351_v52, %v2448_v8 }
 0x4e0   : > { %v2457_v7 = vsel %vm2454_vm3, %v2456_v12, %v2452_v10 }
 0x4e5   : > { %v4355_v32 = vpop.eup %4354 }
 0x4e6   : > { %v2464_v37 = vmul.f32 %v4355_v32, %v2457_v7 }
 0x4e8   : > { %v2467_v13 = vpack.c.bf16 %v2464_v37, %v2464_v37 }
 0x4ea   : > { %3825 = vst [vmem:[%s4438_s21 + $0x18] sm:$0xf] %v2467_v13  ;;  %2672 = vmatmul.bf16.vlgmr.msrb.gmra.mxu0 %v2467_v13  ;;  %2685 = vmatmul.bf16.vlgmr.msrb.gmra.mxu1 %v2467_v13 }
 0x4eb   : > { %2698 = vmatmul.bf16.vlgmr.msrb.gmra.mxu2 %v2467_v13  ;;  %2711 = vmatmul.bf16.vlgmr.msrb.gmra.mxu3 %v2467_v13 }
 0x567   : > { %v2673_v17 = vpop.f32.mrf.mxu0  ;;  %v2686_v18 = vpop.f32.mrf.mxu1 }
 0x568   : > { %v2723_v14 = vadd.f32 %v2719_v11, %v2673_v17  ;;  %v2724_v19 = vadd.f32 %v2720_v16, %v2686_v18 }
 0x56a   : > { %v3956_v21 = vmul.f32 -1.442695, %v2723_v14  ;;  %v3957_v22 = vmul.f32 -1.442695, %v2724_v19 }
 0x56c   : > { %4356 = vpow2.f32 %v3956_v21 }
 0x56d   : > { %4358 = vpow2.f32 %v3957_v22 }
 0x56e   : > { %v2699_v24 = vpop.f32.mrf.mxu2  ;;  %v2712_v25 = vpop.f32.mrf.mxu3 }
 0x56f   : > { %v2726_v26 = vadd.f32 %v2722_v23, %v2712_v25  ;;  %v2675_v27 = vpop.f32.mrf.mxu0  ;;  %v2688_v29 = vpop.f32.mrf.mxu1  ;;  %v2725_v42 = vadd.f32 %v2721_v38, %v2699_v24 }
 0x571   : > { %v3958_v30 = vmul.f32 -1.442695, %v2726_v26 }
 0x572   : > { %v4357_v31 = vpop.eup %4356 }
 0x573   : > { %v4359_v33 = vpop.eup %4358  ;;  %v2730_v34 = vadd.f32 1.0, %v4357_v31  ;;  %4360 = vpow2.f32 %v3958_v30 }
 0x574   : > { %v2749_v35 = vadd.f32 1.0, %v4359_v33 }
 0x575   : > { %4362 = vrcp.f32 %v2730_v34  ;;  %v2742_v48 = vand.u32 2147483648, %v2730_v34  ;;  %v2740_v50 = vand.u32 2147483647, %v2730_v34  ;;  %vm2736_vm6 = vweird.f32 %v2730_v34 }
 0x576   : > { %4364 = vrcp.f32 %v2749_v35  ;;  %v2701_v36 = vpop.f32.mrf.mxu2  ;;  %v2714_v58 = vpop.f32.mrf.mxu3  ;;  %v2761_v44 = vand.u32 2147483648, %v2749_v35  ;;  %v2759_v47 = vand.u32 2147483647, %v2749_v35  ;;  %vm2755_vm7 = vweird.f32 %v2749_v35 }
 0x577   : > { %v2743_v54 = vor.u32 1.1754944e-38, %v2742_v48  ;;  %vm2741_vm10 = vcmp.eq.f32.partialorder %v2740_v50, 8.507059e+37 }
 0x578   : > { %v2762_v57 = vor.u32 1.1754944e-38, %v2761_v44  ;;  %vm2760_vm11 = vcmp.eq.f32.partialorder %v2759_v47, 8.507059e+37 }
 0x579   : > { %v4361_v39 = vpop.eup %4360 }
 0x57a   : > { %v2769_v41 = vadd.f32 1.0, %v4361_v39 }
 0x57b   : > { %v4363_v62 = vpop.eup %4362 }
 0x57c   : > { %v4365_v43 = vpop.eup %4364  ;;  %v2732_v45 = vmul.f32 %v4363_v62, %v2730_v34  ;;  %4366 = vrcp.f32 %v2769_v41  ;;  %vm2737_vm4 = vweird.f32 %v4363_v62  ;;  %v2781_v9 = vand.u32 2147483648, %v2769_v41 }
 0x57d   : > { %v2751_v2 = vmul.f32 %v4365_v43, %v2749_v35  ;;  %4368 = vtanh.f32 %v2725_v42  ;;  %vm2756_vm5 = vweird.f32 %v4365_v43  ;;  %vm2738_vm8 = vmor %vm2736_vm6, %vm2737_vm4  ;;  %vm2775_vm13 = vweird.f32 %v2769_v41 }
 0x57e   : > { %v2733_v40 = vsub.f32 1.0, %v2732_v45  ;;  %vm2757_vm9 = vmor %vm2755_vm7, %vm2756_vm5  ;;  %v2779_v10 = vand.u32 2147483647, %v2769_v41  ;;  %v2782_v32 = vor.u32 1.1754944e-38, %v2781_v9 }
 0x57f   : > { %v2752_v46 = vsub.f32 1.0, %v2751_v2 }
 0x580   : > { %v2734_v49 = vmul.f32 %v4363_v62, %v2733_v40  ;;  %vm2780_vm15 = vcmp.eq.f32.partialorder %v2779_v10, 8.507059e+37 }
 0x581   : > { %v2753_v51 = vmul.f32 %v4365_v43, %v2752_v46 }
 0x582   : > { %v4367_v52 = vpop.eup %4366  ;;  %v2735_v53 = vadd.f32 %v4363_v62, %v2734_v49 }
 0x583   : > { %v2754_v55 = vadd.f32 %v4365_v43, %v2753_v51  ;;  %v2771_v56 = vmul.f32 %v4367_v52, %v2769_v41  ;;  %v4369_v60 = vpop.eup %4368  ;;  %vm2776_vm12 = vweird.f32 %v4367_v52 }
 0x584   : > { %v2739_v59 = vsel %vm2738_vm8, %v4363_v62, %v2735_v53  ;;  %vm2777_vm14 = vmor %vm2775_vm13, %vm2776_vm12 }
 0x585   : > { %v2744_v61 = vsel %vm2741_vm10, %v2743_v54, %v2739_v59  ;;  %v2758_v63 = vsel %vm2757_vm9, %v4365_v43, %v2754_v55  ;;  %v2772_v0 = vsub.f32 1.0, %v2771_v56 }
 0x586   : > { %v2763_v1 = vsel %vm2760_vm11, %v2762_v57, %v2758_v63  ;;  %v2787_v3 = vmul.f32 %v4369_v60, %v2744_v61 }
 0x587   : > { %v2786_v4 = vmul.f32 %v2763_v1, %v6048_v6  ;;  %v2773_v5 = vmul.f32 %v4367_v52, %v2772_v0 }
 0x589   : > { %v2788_v8 = vadd.f32 %v2787_v3, %v2786_v4  ;;  %v2774_v28 = vadd.f32 %v4367_v52, %v2773_v5 }
 0x58b   : > { %4370 = vtanh.f32 %v2788_v8  ;;  %2791 = vst [vmem:[#allocation3] sm:$0xff] %v2788_v8  ;;  %v2778_v12 = vsel %vm2777_vm14, %v4367_v52, %v2774_v28 }
 0x58c   : > { %v2783_v37 = vsel %vm2780_vm15, %v2782_v32, %v2778_v12 }
 0x591   : > { %v4371_v7 = vpop.eup %4370 }
 0x592   : > { %v2790_v13 = vmul.f32 %v4371_v7, %v2783_v37 }
 0x594   : > { %2792 = vst [vmem:[#allocation2] sm:$0xff] %v2790_v13  ;;  %v2793_v15 = vpack.c.bf16 %v2790_v13, %v2790_v13 }
 0x596   : > { %3959 = vst [vmem:[%s4438_s21 + $0x1c] sm:$0xf] %v2793_v15 }
 0x597 PF: > { %s12_s11 = sadd.s32 1, %s4394_s11   ;;  %s6068_s9 = smov %s4390_s10 }
 0x598   : > { %p9_p6 = scmp.ge.s32.totalorder %s12_s11, 4   ;;  %s6069_s10 = smov %s6071_s12 }
 0x59a   :  { %11 = sbr.rel (!%p9_p6) target bundleno = 2 (0x2), region = 76 }

</bundles_post_ra>
